<compile_context>
chip_gen: v7x
topology: tpu7x:2x2x1
jax: 0.10.0
libtpu: 0.0.40
codegen_flags: <defaults>
</compile_context>

<pallas_src>
import math

import jax
import jax.numpy as jnp
from jax.experimental import pallas as pl
from jax.experimental.pallas import tpu as pltpu


# ---------------------------------------------------------------------------
# Kernel 1: fused  conv-as-GEMM  +  bias  +  2x2 max-pool  +  ReLU
# ---------------------------------------------------------------------------
def _conv_pool_relu_kernel(p_ref, w_ref, b_ref, o_ref):
    """p_ref: (4, tg, K) im2col patches; leading axis = the four 2x2-pool
    partners of each pooled output position.  w_ref: (K, Cout).
    b_ref: (1, Cout).  o_ref: (tg, Cout) = relu(maxpool(conv) + bias)."""
    w = w_ref[...]
    y00 = jnp.dot(p_ref[0], w, preferred_element_type=jnp.float32)
    y01 = jnp.dot(p_ref[1], w, preferred_element_type=jnp.float32)
    y10 = jnp.dot(p_ref[2], w, preferred_element_type=jnp.float32)
    y11 = jnp.dot(p_ref[3], w, preferred_element_type=jnp.float32)
    pooled = jnp.maximum(jnp.maximum(y00, y01), jnp.maximum(y10, y11))
    # Bias is constant over a pool window, so max(conv)+b == max(conv+b).
    o_ref[...] = jnp.maximum(pooled + b_ref[...], 0.0).astype(o_ref.dtype)


def _pick_row_tile(g, row_bytes, target_bytes=4 << 20):
    """Largest row tile that divides g, is (8,128)-legal and fits ~4 MiB.
    Whole-extent blocks preferred (fewer, larger DMAs); only split when a
    layer would not fit comfortably in scoped VMEM (v7x: 64 MiB physical)."""
    if g * row_bytes <= target_bytes:
        return g
    start = g - (g % 8)
    for t in range(start, 7, -8):          # multiples of 8 only
        if t > 0 and g % t == 0 and t * row_bytes <= target_bytes:
            return t
    return g


def _im2col_pool_groups(x_nhwc, ksize):
    """Extract ksize x ksize valid-conv patches, grouped by 2x2 pool window.

    Returns patches of shape (4, G, K):
      leading axis  q = dh*2 + dw                (position inside pool window)
      row axis      G = N * PH * PW              ordered (n, ph, pw)
      feature axis  K = Cin * ksize * ksize      ordered (ci, kh, kw) to match
                                                 PyTorch's OIHW weight flatten.
    """
    n, h, w, c = x_nhwc.shape
    oh, ow = h - ksize + 1, w - ksize + 1
    ph, pw = oh // 2, ow // 2
    cols = []
    for kh in range(ksize):
        for kw in range(ksize):
            cols.append(x_nhwc[:, kh:kh + oh, kw:kw + ow, :])   # (n, oh, ow, c)
    p = jnp.stack(cols, axis=-1)                  # (n, oh, ow, c, k*k)
    p = p.reshape(n, oh, ow, c * ksize * ksize)   # features ordered (c, kh, kw)
    p = p.reshape(n, ph, 2, pw, 2, c * ksize * ksize)
    p = p.transpose(2, 4, 0, 1, 3, 5)             # (dh, dw, n, ph, pw, K)
    return p.reshape(4, n * ph * pw, c * ksize * ksize), (n, ph, pw)


def conv5x5_pool2_relu(x_nhwc, w_oihw, b):
    """relu(maxpool2x2(conv2d_valid(x, w) + b)) via one fused Pallas kernel."""
    cout, cin, kh, kw = w_oihw.shape
    patches, (n, ph, pw) = _im2col_pool_groups(x_nhwc, kh)
    g = n * ph * pw
    k = cin * kh * kw
    w_mat = w_oihw.reshape(cout, k).T             # (K, Cout)
    b_mat = b.reshape(1, cout)
    tg = _pick_row_tile(g, row_bytes=(4 * k + cout) * 4)
    grid = (g // tg,)
    out = pl.pallas_call(
        _conv_pool_relu_kernel,
        out_shape=jax.ShapeDtypeStruct((g, cout), x_nhwc.dtype),
        grid_spec=pltpu.PrefetchScalarGridSpec(
            num_scalar_prefetch=0,
            grid=grid,
            in_specs=[
                pl.BlockSpec((4, tg, k), lambda i: (0, i, 0)),
                pl.BlockSpec((k, cout), lambda i: (0, 0)),
                pl.BlockSpec((1, cout), lambda i: (0, 0)),
            ],
            out_specs=pl.BlockSpec((tg, cout), lambda i: (i, 0)),
        ),
        compiler_params=pltpu.CompilerParams(dimension_semantics=("parallel",)),
    )(patches, w_mat, b_mat)
    return out.reshape(n, ph, pw, cout)           # NHWC


# ---------------------------------------------------------------------------
# Kernel 2: fused MLP head  (fc1 + ReLU + fc2)
# ---------------------------------------------------------------------------
def _mlp_head_kernel(x_ref, w1_ref, b1_ref, w2_ref, b2_ref, o_ref):
    h = jnp.dot(x_ref[...], w1_ref[...], preferred_element_type=jnp.float32)
    h = jnp.maximum(h + b1_ref[...], 0.0)
    y = jnp.dot(h, w2_ref[...], preferred_element_type=jnp.float32)
    o_ref[...] = (y + b2_ref[...]).astype(o_ref.dtype)


def mlp_head(x, fc1_w, fc1_b, fc2_w, fc2_b):
    n, d = x.shape
    hdim = fc1_w.shape[0]
    c = fc2_w.shape[0]
    return pl.pallas_call(
        _mlp_head_kernel,
        out_shape=jax.ShapeDtypeStruct((n, c), x.dtype),
        grid_spec=pltpu.PrefetchScalarGridSpec(
            num_scalar_prefetch=0,
            grid=(1,),
            in_specs=[
                pl.BlockSpec((n, d), lambda i: (0, 0)),
                pl.BlockSpec((d, hdim), lambda i: (0, 0)),
                pl.BlockSpec((1, hdim), lambda i: (0, 0)),
                pl.BlockSpec((hdim, c), lambda i: (0, 0)),
                pl.BlockSpec((1, c), lambda i: (0, 0)),
            ],
            out_specs=pl.BlockSpec((n, c), lambda i: (0, 0)),
        ),
        compiler_params=pltpu.CompilerParams(dimension_semantics=("arbitrary",)),
    )(x, fc1_w.T, fc1_b.reshape(1, hdim), fc2_w.T, fc2_b.reshape(1, c))


# ---------------------------------------------------------------------------
# LeNet module (forward only)
# ---------------------------------------------------------------------------
class LeNet:
    """JAX/Pallas equivalent of the PyTorch LeNet module."""

    def __init__(self, num_classes, key):
        ks = jax.random.split(key, 8)

        def u(k, shape, fan_in):
            bound = 1.0 / math.sqrt(fan_in)
            return jax.random.uniform(k, shape, jnp.float32, -bound, bound)

        self.conv1_w = u(ks[0], (10, 1, 5, 5), 1 * 5 * 5)
        self.conv1_b = u(ks[1], (10,), 1 * 5 * 5)
        self.conv2_w = u(ks[2], (20, 10, 5, 5), 10 * 5 * 5)
        self.conv2_b = u(ks[3], (20,), 10 * 5 * 5)
        self.fc1_w = u(ks[4], (50, 500), 500)
        self.fc1_b = u(ks[5], (50,), 500)
        self.fc2_w = u(ks[6], (num_classes, 50), 50)
        self.fc2_b = u(ks[7], (num_classes,), 50)

    def __call__(self, x):
        # x: (N, 1, 32, 32) NCHW float32 (PyTorch layout).
        x = jnp.transpose(x, (0, 2, 3, 1))                        # -> NHWC
        x = conv5x5_pool2_relu(x, self.conv1_w, self.conv1_b)     # (N,14,14,10)
        x = conv5x5_pool2_relu(x, self.conv2_w, self.conv2_b)     # (N, 5, 5,20)
        # x.view(-1, 500): metadata-only in PyTorch; match its NCHW flatten
        # order with a transpose+reshape — no copy kernel (perf feedback).
        n = x.shape[0]
        x = jnp.transpose(x, (0, 3, 1, 2)).reshape(n, 500)
        return mlp_head(x, self.fc1_w, self.fc1_b, self.fc2_w, self.fc2_b)


# ---------------------------------------------------------------------------
# Pure-JAX reference for correctness checking
# ---------------------------------------------------------------------------
def _lenet_reference(model, x):
    def conv(x, w, b):
        y = jax.lax.conv_general_dilated(
            x, w, window_strides=(1, 1), padding="VALID",
            dimension_numbers=("NCHW", "OIHW", "NCHW"))
        return y + b.reshape(1, -1, 1, 1)

    def mpool(x):
        return jax.lax.reduce_window(
            x, -jnp.inf, jax.lax.max, (1, 1, 2, 2), (1, 1, 2, 2), "VALID")

    x = jnp.maximum(mpool(conv(x, model.conv1_w, model.conv1_b)), 0.0)
    x = jnp.maximum(mpool(conv(x, model.conv2_w, model.conv2_b)), 0.0)
    x = x.reshape(x.shape[0], -1)
    x = jnp.maximum(x @ model.fc1_w.T + model.fc1_b, 0.0)
    return x @ model.fc2_w.T + model.fc2_b


if __name__ == "__main__":
    key = jax.random.PRNGKey(0)
    k_param, k_x = jax.random.split(key)
    model = LeNet(num_classes=10, key=k_param)

    # Input shape implied by the forward: view(-1, 500) with 20 channels after
    # two conv5 + pool2 stages -> 5x5 spatial -> 32x32 input images.
    x = jax.random.normal(k_x, (2, 1, 32, 32), dtype=jnp.float32)

    out = jax.block_until_ready(jax.jit(model.__call__)(x))
    ref = jax.block_until_ready(_lenet_reference(model, x))

    assert out.shape == (2, 10), out.shape
    assert out.dtype == jnp.float32
    assert bool(jnp.allclose(out, ref, atol=2e-2, rtol=2e-2)), (
        "Pallas LeNet mismatch: max abs err "
        f"{float(jnp.max(jnp.abs(out - ref)))}")
    print("KERNEL_OK")
</pallas_src>

<mosaic_0001>
module attributes {stable_mosaic.version = 11 : i64} {
  func.func @_conv_pool_relu_kernel(%arg0: i32, %arg1: memref<4x392x25xf32, #tpu.memory_space<vmem>>, %arg2: memref<25x10xf32, #tpu.memory_space<vmem>>, %arg3: memref<1x10xf32, #tpu.memory_space<vmem>>, %arg4: memref<392x10xf32, #tpu.memory_space<vmem>>) attributes {dimension_semantics = [#tpu.dimension_semantics<parallel>], iteration_bounds = array<i64: 1>, scalar_prefetch = 0 : i64, scratch_operands = 0 : i64, tpu.core_type = #tpu.core_type<tc>, window_params = [{transform_indices = @transform_0, window_bounds = array<i64: 4, 392, 25>}, {pipeline_mode = #tpu.pipeline_mode<synchronous>, transform_indices = @transform_1, window_bounds = array<i64: 25, 10>}, {pipeline_mode = #tpu.pipeline_mode<synchronous>, transform_indices = @transform_2, window_bounds = array<i64: 1, 10>}, {transform_indices = @transform_3, window_bounds = array<i64: 392, 10>}]} {
    %c0 = arith.constant 0 : index
    %c0_0 = arith.constant 0 : index
    %0 = vector.load %arg2[%c0, %c0_0] : memref<25x10xf32, #tpu.memory_space<vmem>>, vector<25x10xf32>
    %c0_1 = arith.constant 0 : index
    %c0_2 = arith.constant 0 : index
    %c0_3 = arith.constant 0 : index
    %1 = vector.load %arg1[%c0_1, %c0_2, %c0_3] : memref<4x392x25xf32, #tpu.memory_space<vmem>>, vector<1x392x25xf32>
    %2 = vector.shape_cast %1 : vector<1x392x25xf32> to vector<392x25xf32>
    %cst = arith.constant dense<0.000000e+00> : vector<392x10xf32>
    %3 = tpu.matmul %2, %0, %cst {dimension_numbers = #tpu.dot_dimension_numbers<[1], [0], [0], [1], [0, 0, 1, 1], [], []>} : vector<392x25xf32>, vector<25x10xf32>, vector<392x10xf32> -> vector<392x10xf32>
    %c1 = arith.constant 1 : index
    %c0_4 = arith.constant 0 : index
    %c0_5 = arith.constant 0 : index
    %4 = vector.load %arg1[%c1, %c0_4, %c0_5] : memref<4x392x25xf32, #tpu.memory_space<vmem>>, vector<1x392x25xf32>
    %5 = vector.shape_cast %4 : vector<1x392x25xf32> to vector<392x25xf32>
    %cst_6 = arith.constant dense<0.000000e+00> : vector<392x10xf32>
    %6 = tpu.matmul %5, %0, %cst_6 {dimension_numbers = #tpu.dot_dimension_numbers<[1], [0], [0], [1], [0, 0, 1, 1], [], []>} : vector<392x25xf32>, vector<25x10xf32>, vector<392x10xf32> -> vector<392x10xf32>
    %c2 = arith.constant 2 : index
    %c0_7 = arith.constant 0 : index
    %c0_8 = arith.constant 0 : index
    %7 = vector.load %arg1[%c2, %c0_7, %c0_8] : memref<4x392x25xf32, #tpu.memory_space<vmem>>, vector<1x392x25xf32>
    %8 = vector.shape_cast %7 : vector<1x392x25xf32> to vector<392x25xf32>
    %cst_9 = arith.constant dense<0.000000e+00> : vector<392x10xf32>
    %9 = tpu.matmul %8, %0, %cst_9 {dimension_numbers = #tpu.dot_dimension_numbers<[1], [0], [0], [1], [0, 0, 1, 1], [], []>} : vector<392x25xf32>, vector<25x10xf32>, vector<392x10xf32> -> vector<392x10xf32>
    %c3 = arith.constant 3 : index
    %c0_10 = arith.constant 0 : index
    %c0_11 = arith.constant 0 : index
    %10 = vector.load %arg1[%c3, %c0_10, %c0_11] : memref<4x392x25xf32, #tpu.memory_space<vmem>>, vector<1x392x25xf32>
    %11 = vector.shape_cast %10 : vector<1x392x25xf32> to vector<392x25xf32>
    %cst_12 = arith.constant dense<0.000000e+00> : vector<392x10xf32>
    %12 = tpu.matmul %11, %0, %cst_12 {dimension_numbers = #tpu.dot_dimension_numbers<[1], [0], [0], [1], [0, 0, 1, 1], [], []>} : vector<392x25xf32>, vector<25x10xf32>, vector<392x10xf32> -> vector<392x10xf32>
    %13 = arith.maximumf %3, %6 : vector<392x10xf32>
    %14 = arith.maximumf %9, %12 : vector<392x10xf32>
    %15 = arith.maximumf %13, %14 : vector<392x10xf32>
    %c0_13 = arith.constant 0 : index
    %c0_14 = arith.constant 0 : index
    %16 = vector.load %arg3[%c0_13, %c0_14] : memref<1x10xf32, #tpu.memory_space<vmem>>, vector<1x10xf32>
    %17 = vector.broadcast %16 : vector<1x10xf32> to vector<392x10xf32>
    %18 = arith.addf %15, %17 : vector<392x10xf32>
    %cst_15 = arith.constant 0.000000e+00 : f32
    %19 = vector.broadcast %cst_15 : f32 to vector<392x10xf32>
    %20 = arith.maximumf %18, %19 : vector<392x10xf32>
    %c0_16 = arith.constant 0 : index
    %c0_17 = arith.constant 0 : index
    %21 = vector.load %arg4[%c0_16, %c0_17] : memref<392x10xf32, #tpu.memory_space<vmem>>, vector<392x10xf32>
    tpu.vector_store %arg4[%c0_16, %c0_17], %20 {strides = array<i32>} : memref<392x10xf32, #tpu.memory_space<vmem>>, vector<392x10xf32>,
    return
  }
  func.func @transform_0(%arg0: i32) -> (i32, i32, i32) {
    %c0_i32 = arith.constant 0 : i32
    %c0_i32_0 = arith.constant 0 : i32
    %c0_i32_1 = arith.constant 0 : i32
    return %c0_i32, %arg0, %c0_i32_0 : i32, i32, i32
  }
  func.func @transform_1(%arg0: i32) -> (i32, i32) {
    %c0_i32 = arith.constant 0 : i32
    %c0_i32_0 = arith.constant 0 : i32
    %c0_i32_1 = arith.constant 0 : i32
    return %c0_i32, %c0_i32_0 : i32, i32
  }
  func.func @transform_2(%arg0: i32) -> (i32, i32) {
    %c0_i32 = arith.constant 0 : i32
    %c0_i32_0 = arith.constant 0 : i32
    %c0_i32_1 = arith.constant 0 : i32
    return %c0_i32, %c0_i32_0 : i32, i32
  }
  func.func @transform_3(%arg0: i32) -> (i32, i32) {
    %c0_i32 = arith.constant 0 : i32
    %c0_i32_0 = arith.constant 0 : i32
    return %arg0, %c0_i32 : i32, i32
  }
}

module attributes {stable_mosaic.version = 11 : i64} {
  func.func @_conv_pool_relu_kernel(%arg0: i32, %arg1: memref<4x50x250xf32, #tpu.memory_space<vmem>>, %arg2: memref<250x20xf32, #tpu.memory_space<vmem>>, %arg3: memref<1x20xf32, #tpu.memory_space<vmem>>, %arg4: memref<50x20xf32, #tpu.memory_space<vmem>>) attributes {dimension_semantics = [#tpu.dimension_semantics<parallel>], iteration_bounds = array<i64: 1>, scalar_prefetch = 0 : i64, scratch_operands = 0 : i64, tpu.core_type = #tpu.core_type<tc>, window_params = [{transform_indices = @transform_0, window_bounds = array<i64: 4, 50, 250>}, {pipeline_mode = #tpu.pipeline_mode<synchronous>, transform_indices = @transform_1, window_bounds = array<i64: 250, 20>}, {pipeline_mode = #tpu.pipeline_mode<synchronous>, transform_indices = @transform_2, window_bounds = array<i64: 1, 20>}, {transform_indices = @transform_3, window_bounds = array<i64: 50, 20>}]} {
    %c0 = arith.constant 0 : index
    %c0_0 = arith.constant 0 : index
    %0 = vector.load %arg2[%c0, %c0_0] : memref<250x20xf32, #tpu.memory_space<vmem>>, vector<250x20xf32>
    %c0_1 = arith.constant 0 : index
    %c0_2 = arith.constant 0 : index
    %c0_3 = arith.constant 0 : index
    %1 = vector.load %arg1[%c0_1, %c0_2, %c0_3] : memref<4x50x250xf32, #tpu.memory_space<vmem>>, vector<1x50x250xf32>
    %2 = vector.shape_cast %1 : vector<1x50x250xf32> to vector<50x250xf32>
    %cst = arith.constant dense<0.000000e+00> : vector<50x20xf32>
    %3 = tpu.matmul %2, %0, %cst {dimension_numbers = #tpu.dot_dimension_numbers<[1], [0], [0], [1], [0, 0, 1, 1], [], []>} : vector<50x250xf32>, vector<250x20xf32>, vector<50x20xf32> -> vector<50x20xf32>
    %c1 = arith.constant 1 : index
    %c0_4 = arith.constant 0 : index
    %c0_5 = arith.constant 0 : index
    %4 = vector.load %arg1[%c1, %c0_4, %c0_5] : memref<4x50x250xf32, #tpu.memory_space<vmem>>, vector<1x50x250xf32>
    %5 = vector.shape_cast %4 : vector<1x50x250xf32> to vector<50x250xf32>
    %cst_6 = arith.constant dense<0.000000e+00> : vector<50x20xf32>
    %6 = tpu.matmul %5, %0, %cst_6 {dimension_numbers = #tpu.dot_dimension_numbers<[1], [0], [0], [1], [0, 0, 1, 1], [], []>} : vector<50x250xf32>, vector<250x20xf32>, vector<50x20xf32> -> vector<50x20xf32>
    %c2 = arith.constant 2 : index
    %c0_7 = arith.constant 0 : index
    %c0_8 = arith.constant 0 : index
    %7 = vector.load %arg1[%c2, %c0_7, %c0_8] : memref<4x50x250xf32, #tpu.memory_space<vmem>>, vector<1x50x250xf32>
    %8 = vector.shape_cast %7 : vector<1x50x250xf32> to vector<50x250xf32>
    %cst_9 = arith.constant dense<0.000000e+00> : vector<50x20xf32>
    %9 = tpu.matmul %8, %0, %cst_9 {dimension_numbers = #tpu.dot_dimension_numbers<[1], [0], [0], [1], [0, 0, 1, 1], [], []>} : vector<50x250xf32>, vector<250x20xf32>, vector<50x20xf32> -> vector<50x20xf32>
    %c3 = arith.constant 3 : index
    %c0_10 = arith.constant 0 : index
    %c0_11 = arith.constant 0 : index
    %10 = vector.load %arg1[%c3, %c0_10, %c0_11] : memref<4x50x250xf32, #tpu.memory_space<vmem>>, vector<1x50x250xf32>
    %11 = vector.shape_cast %10 : vector<1x50x250xf32> to vector<50x250xf32>
    %cst_12 = arith.constant dense<0.000000e+00> : vector<50x20xf32>
    %12 = tpu.matmul %11, %0, %cst_12 {dimension_numbers = #tpu.dot_dimension_numbers<[1], [0], [0], [1], [0, 0, 1, 1], [], []>} : vector<50x250xf32>, vector<250x20xf32>, vector<50x20xf32> -> vector<50x20xf32>
    %13 = arith.maximumf %3, %6 : vector<50x20xf32>
    %14 = arith.maximumf %9, %12 : vector<50x20xf32>
    %15 = arith.maximumf %13, %14 : vector<50x20xf32>
    %c0_13 = arith.constant 0 : index
    %c0_14 = arith.constant 0 : index
    %16 = vector.load %arg3[%c0_13, %c0_14] : memref<1x20xf32, #tpu.memory_space<vmem>>, vector<1x20xf32>
    %17 = vector.broadcast %16 : vector<1x20xf32> to vector<50x20xf32>
    %18 = arith.addf %15, %17 : vector<50x20xf32>
    %cst_15 = arith.constant 0.000000e+00 : f32
    %19 = vector.broadcast %cst_15 : f32 to vector<50x20xf32>
    %20 = arith.maximumf %18, %19 : vector<50x20xf32>
    %c0_16 = arith.constant 0 : index
    %c0_17 = arith.constant 0 : index
    %21 = vector.load %arg4[%c0_16, %c0_17] : memref<50x20xf32, #tpu.memory_space<vmem>>, vector<50x20xf32>
    tpu.vector_store %arg4[%c0_16, %c0_17], %20 {strides = array<i32>} : memref<50x20xf32, #tpu.memory_space<vmem>>, vector<50x20xf32>,
    return
  }
  func.func @transform_0(%arg0: i32) -> (i32, i32, i32) {
    %c0_i32 = arith.constant 0 : i32
    %c0_i32_0 = arith.constant 0 : i32
    %c0_i32_1 = arith.constant 0 : i32
    return %c0_i32, %arg0, %c0_i32_0 : i32, i32, i32
  }
  func.func @transform_1(%arg0: i32) -> (i32, i32) {
    %c0_i32 = arith.constant 0 : i32
    %c0_i32_0 = arith.constant 0 : i32
    %c0_i32_1 = arith.constant 0 : i32
    return %c0_i32, %c0_i32_0 : i32, i32
  }
  func.func @transform_2(%arg0: i32) -> (i32, i32) {
    %c0_i32 = arith.constant 0 : i32
    %c0_i32_0 = arith.constant 0 : i32
    %c0_i32_1 = arith.constant 0 : i32
    return %c0_i32, %c0_i32_0 : i32, i32
  }
  func.func @transform_3(%arg0: i32) -> (i32, i32) {
    %c0_i32 = arith.constant 0 : i32
    %c0_i32_0 = arith.constant 0 : i32
    return %arg0, %c0_i32 : i32, i32
  }
}

module attributes {stable_mosaic.version = 11 : i64} {
  func.func @_mlp_head_kernel(%arg0: i32, %arg1: memref<2x500xf32, #tpu.memory_space<vmem>>, %arg2: memref<500x50xf32, #tpu.memory_space<vmem>>, %arg3: memref<1x50xf32, #tpu.memory_space<vmem>>, %arg4: memref<50x10xf32, #tpu.memory_space<vmem>>, %arg5: memref<1x10xf32, #tpu.memory_space<vmem>>, %arg6: memref<2x10xf32, #tpu.memory_space<vmem>>) attributes {dimension_semantics = [#tpu.dimension_semantics<arbitrary>], iteration_bounds = array<i64: 1>, scalar_prefetch = 0 : i64, scratch_operands = 0 : i64, tpu.core_type = #tpu.core_type<tc>, window_params = [{pipeline_mode = #tpu.pipeline_mode<synchronous>, transform_indices = @transform_0, window_bounds = array<i64: 2, 500>}, {pipeline_mode = #tpu.pipeline_mode<synchronous>, transform_indices = @transform_1, window_bounds = array<i64: 500, 50>}, {pipeline_mode = #tpu.pipeline_mode<synchronous>, transform_indices = @transform_2, window_bounds = array<i64: 1, 50>}, {pipeline_mode = #tpu.pipeline_mode<synchronous>, transform_indices = @transform_3, window_bounds = array<i64: 50, 10>}, {pipeline_mode = #tpu.pipeline_mode<synchronous>, transform_indices = @transform_4, window_bounds = array<i64: 1, 10>}, {pipeline_mode = #tpu.pipeline_mode<synchronous>, transform_indices = @transform_5, window_bounds = array<i64: 2, 10>}]} {
    %c0 = arith.constant 0 : index
    %c0_0 = arith.constant 0 : index
    %0 = vector.load %arg1[%c0, %c0_0] : memref<2x500xf32, #tpu.memory_space<vmem>>, vector<2x500xf32>
    %c0_1 = arith.constant 0 : index
    %c0_2 = arith.constant 0 : index
    %1 = vector.load %arg2[%c0_1, %c0_2] : memref<500x50xf32, #tpu.memory_space<vmem>>, vector<500x50xf32>
    %cst = arith.constant dense<0.000000e+00> : vector<2x50xf32>
    %2 = tpu.matmul %0, %1, %cst {dimension_numbers = #tpu.dot_dimension_numbers<[1], [0], [0], [1], [0, 0, 1, 1], [], []>} : vector<2x500xf32>, vector<500x50xf32>, vector<2x50xf32> -> vector<2x50xf32>
    %c0_3 = arith.constant 0 : index
    %c0_4 = arith.constant 0 : index
    %3 = vector.load %arg3[%c0_3, %c0_4] : memref<1x50xf32, #tpu.memory_space<vmem>>, vector<1x50xf32>
    %4 = vector.broadcast %3 : vector<1x50xf32> to vector<2x50xf32>
    %5 = arith.addf %2, %4 : vector<2x50xf32>
    %cst_5 = arith.constant 0.000000e+00 : f32
    %6 = vector.broadcast %cst_5 : f32 to vector<2x50xf32>
    %7 = arith.maximumf %5, %6 : vector<2x50xf32>
    %c0_6 = arith.constant 0 : index
    %c0_7 = arith.constant 0 : index
    %8 = vector.load %arg4[%c0_6, %c0_7] : memref<50x10xf32, #tpu.memory_space<vmem>>, vector<50x10xf32>
    %cst_8 = arith.constant dense<0.000000e+00> : vector<2x10xf32>
    %9 = tpu.matmul %7, %8, %cst_8 {dimension_numbers = #tpu.dot_dimension_numbers<[1], [0], [0], [1], [0, 0, 1, 1], [], []>} : vector<2x50xf32>, vector<50x10xf32>, vector<2x10xf32> -> vector<2x10xf32>
    %c0_9 = arith.constant 0 : index
    %c0_10 = arith.constant 0 : index
    %10 = vector.load %arg5[%c0_9, %c0_10] : memref<1x10xf32, #tpu.memory_space<vmem>>, vector<1x10xf32>
    %11 = vector.broadcast %10 : vector<1x10xf32> to vector<2x10xf32>
    %12 = arith.addf %9, %11 : vector<2x10xf32>
    %c0_11 = arith.constant 0 : index
    %c0_12 = arith.constant 0 : index
    %13 = vector.load %arg6[%c0_11, %c0_12] : memref<2x10xf32, #tpu.memory_space<vmem>>, vector<2x10xf32>
    tpu.vector_store %arg6[%c0_11, %c0_12], %12 {strides = array<i32>} : memref<2x10xf32, #tpu.memory_space<vmem>>, vector<2x10xf32>,
    return
  }
  func.func @transform_0(%arg0: i32) -> (i32, i32) {
    %c0_i32 = arith.constant 0 : i32
    %c0_i32_0 = arith.constant 0 : i32
    %c0_i32_1 = arith.constant 0 : i32
    return %c0_i32, %c0_i32_0 : i32, i32
  }
  func.func @transform_1(%arg0: i32) -> (i32, i32) {
    %c0_i32 = arith.constant 0 : i32
    %c0_i32_0 = arith.constant 0 : i32
    %c0_i32_1 = arith.constant 0 : i32
    return %c0_i32, %c0_i32_0 : i32, i32
  }
  func.func @transform_2(%arg0: i32) -> (i32, i32) {
    %c0_i32 = arith.constant 0 : i32
    %c0_i32_0 = arith.constant 0 : i32
    %c0_i32_1 = arith.constant 0 : i32
    return %c0_i32, %c0_i32_0 : i32, i32
  }
  func.func @transform_3(%arg0: i32) -> (i32, i32) {
    %c0_i32 = arith.constant 0 : i32
    %c0_i32_0 = arith.constant 0 : i32
    %c0_i32_1 = arith.constant 0 : i32
    return %c0_i32, %c0_i32_0 : i32, i32
  }
  func.func @transform_4(%arg0: i32) -> (i32, i32) {
    %c0_i32 = arith.constant 0 : i32
    %c0_i32_0 = arith.constant 0 : i32
    %c0_i32_1 = arith.constant 0 : i32
    return %c0_i32, %c0_i32_0 : i32, i32
  }
  func.func @transform_5(%arg0: i32) -> (i32, i32) {
    %c0_i32 = arith.constant 0 : i32
    %c0_i32_0 = arith.constant 0 : i32
    %c0_i32_1 = arith.constant 0 : i32
    return %c0_i32, %c0_i32_0 : i32, i32
  }
}

</mosaic_0001>

<bundles_post_ra>
// kernel: a_call__.3
= control target key start
LH: loop header
LB: loop body
LE: loop exit
PB: predicated region body
PF: predicated region fallthrough
CT: control target
= control target key end

     0   :  { %v3568_v0 = vmov 0.0|0.0   ;;  %vm215_vm0 = vcmask 1040384   ;;  %vm3569_vm1 = vmmov 0   ;;  %v3570_v6 = vmov 0.0   ;;  %s5483_s1 = inlined_call_operand.vmem [shape: f32[25,10], index: 1, kind: input, shape index: {}]   ;;  %s5484_s0 = inlined_call_operand.vmem [shape: f32[4,392,25], index: 0, kind: input, shape index: {}]   ;;  %s5485_s2 = inlined_call_operand.vmem [shape: f32[1,10], index: 2, kind: input, shape index: {}]   ;;  %s5486_s3 = inlined_call_operand.vmem [shape: f32[392,10], index: 3, kind: output, shape index: {}]  }
   0x1   :  { %3536 = vmatprep.subr.bf16.mxu0 %v3568_v0  ;;  %3543 = vmatprep.subr.bf16.mxu1 %v3568_v0  ;;  %v14_v1 = vld [vmem:[%s5483_s1] sm:$0xff]  ;;  %v15_v2 = vld [vmem:[%s5483_s1 + $0x8] sm:$0xff]  ;;  %v16_v3 = vld [vmem:[%s5483_s1 + $0x10] sm:$0xff]  ;;  %vm3571_vm2 = vmmov 1   ;;  %vm67_vm4 = vcmask 203776   ;;  %vm2302_vm5 = vcmask 80896  }
   0x2   :  { %v3537_v4 = vpack.c.bf16 %v15_v2, %v14_v1  ;;  %v17_v5 = vld [vmem:[%s5483_s1 + $0x18] sm:$0x1]  ;;  %2924 = vmatprep.mubr.msk.f32.mxu0 %vm3569_vm1, %v3570_v6  ;;  %3079 = vmatprep.mubr.msk.f32.mxu1 %vm3569_vm1, %v3570_v6  ;;  %vm3608_vm3 = vmpackc.low %vm215_vm0, %vm3571_vm2  ;;  %v18_v9 = vld [vmem:[%s5484_s0] sm:$0xff] }
   0x3   :  { %v3540_v7 = vpack.c.bf16 %v17_v5, %v16_v3  ;;  %v2406_v10 = vld [vmem:[%s5484_s0 + $0x188] sm:$0xff]  ;;  %v2407_v12 = vld [vmem:[%s5484_s0 + $0x190] sm:$0xff]  ;;  %v2408_v14 = vld [vmem:[%s5484_s0 + $0x198] sm:$0xff] }
   0x4   :  { %3538 = vmatpush3.bf16.msra.mxu0 %v3537_v4  ;;  %3545 = vmatpush3.bf16.msra.mxu1 %v3537_v4  ;;  %v19_v11 = vld [vmem:[%s5484_s0 + $0x8] sm:$0xff]  ;;  %v20_v13 = vld [vmem:[%s5484_s0 + $0x10] sm:$0xff]  ;;  %v21_v15 = vld [vmem:[%s5484_s0 + $0x18] sm:$0xff] }
   0x5   :  { %3539 = vmatprep.subr.bf16.mxu0 %v3568_v0  ;;  %3546 = vmatprep.subr.bf16.mxu1 %v3568_v0  ;;  %v2409_v16 = vld [vmem:[%s5484_s0 + $0x1a0] sm:$0xff]  ;;  %v2410_v18 = vld [vmem:[%s5484_s0 + $0x1a8] sm:$0xff]  ;;  %v2411_v20 = vld [vmem:[%s5484_s0 + $0x1b0] sm:$0xff] }
   0x6   :  { %v22_v17 = vld [vmem:[%s5484_s0 + $0x20] sm:$0xff]  ;;  %v23_v19 = vld [vmem:[%s5484_s0 + $0x28] sm:$0xff]  ;;  %v24_v21 = vld [vmem:[%s5484_s0 + $0x30] sm:$0xff] }
   0x7   :  { %v2412_v22 = vld [vmem:[%s5484_s0 + $0x1b8] sm:$0xff]  ;;  %v2413_v24 = vld [vmem:[%s5484_s0 + $0x1c0] sm:$0xff]  ;;  %v2414_v26 = vld [vmem:[%s5484_s0 + $0x1c8] sm:$0xff] }
   0x8   :  { %3542 = vmatpush3.bf16.msk.msra.mxu0 %vm3608_vm3, %v3540_v7  ;;  %3549 = vmatpush3.bf16.msk.msra.mxu1 %vm3608_vm3, %v3540_v7  ;;  %v25_v23 = vld [vmem:[%s5484_s0 + $0x38] sm:$0xff]  ;;  %v26_v25 = vld [vmem:[%s5484_s0 + $0x40] sm:$0xff]  ;;  %v27_v27 = vld [vmem:[%s5484_s0 + $0x48] sm:$0xff] }
   0x9   :  { %3550 = vmatprep.subr.bf16.mxu0 %v3568_v0  ;;  %3557 = vmatprep.subr.bf16.mxu1 %v3568_v0  ;;  %v2415_v28 = vld [vmem:[%s5484_s0 + $0x1d0] sm:$0xff]  ;;  %v2416_v30 = vld [vmem:[%s5484_s0 + $0x1d8] sm:$0xff]  ;;  %v2417_v32 = vld [vmem:[%s5484_s0 + $0x1e0] sm:$0xff] }
   0xa   :  { %v28_v29 = vld [vmem:[%s5484_s0 + $0x50] sm:$0xff]  ;;  %v29_v31 = vld [vmem:[%s5484_s0 + $0x58] sm:$0xff]  ;;  %v30_v33 = vld [vmem:[%s5484_s0 + $0x60] sm:$0xff] }
   0xb   :  { %2925 = vmatmul.mubr.msk.f32.vlgmr.msra.gmra.mrb[0].mxu0 %vm67_vm4, %v18_v9  ;;  %3080 = vmatmul.mubr.msk.f32.vlgmr.msra.gmra.mrb[0].mxu1 %vm67_vm4, %v2406_v10  ;;  %v2418_v34 = vld [vmem:[%s5484_s0 + $0x1e8] sm:$0xff]  ;;  %v2419_v36 = vld [vmem:[%s5484_s0 + $0x1f0] sm:$0xff]  ;;  %v2420_v38 = vld [vmem:[%s5484_s0 + $0x1f8] sm:$0xff] }
   0xc   :  { %3552 = vmatpush3.bf16.msra.mxu0 %v3537_v4  ;;  %3559 = vmatpush3.bf16.msra.mxu1 %v3537_v4  ;;  %v31_v35 = vld [vmem:[%s5484_s0 + $0x68] sm:$0xff]  ;;  %v32_v37 = vld [vmem:[%s5484_s0 + $0x70] sm:$0xff]  ;;  %v33_v39 = vld [vmem:[%s5484_s0 + $0x78] sm:$0xff] }
   0xd   :  { %2927 = vmatprep.mubr.msk.f32.mxu0 %vm3569_vm1, %v3570_v6  ;;  %3082 = vmatprep.mubr.msk.f32.mxu1 %vm3569_vm1, %v3570_v6  ;;  %v2421_v40 = vld [vmem:[%s5484_s0 + $0x200] sm:$0xff]  ;;  %v2422_v42 = vld [vmem:[%s5484_s0 + $0x208] sm:$0xff]  ;;  %v2423_v44 = vld [vmem:[%s5484_s0 + $0x210] sm:$0xff] }
   0xe   :  { %3553 = vmatprep.subr.bf16.mxu0 %v3568_v0  ;;  %3560 = vmatprep.subr.bf16.mxu1 %v3568_v0  ;;  %v34_v41 = vld [vmem:[%s5484_s0 + $0x80] sm:$0xff]  ;;  %v35_v43 = vld [vmem:[%s5484_s0 + $0x88] sm:$0xff]  ;;  %v36_v45 = vld [vmem:[%s5484_s0 + $0x90] sm:$0xff] }
   0xf   :  { %2928 = vmatmul.mubr.msk.f32.gmra.mrb[2].mxu0 %vm67_vm4, %v19_v11  ;;  %3083 = vmatmul.mubr.msk.f32.gmra.mrb[2].mxu1 %vm67_vm4, %v2407_v12  ;;  %v2424_v46 = vld [vmem:[%s5484_s0 + $0x218] sm:$0xff]  ;;  %v2425_v48 = vld [vmem:[%s5484_s0 + $0x220] sm:$0xff]  ;;  %v2426_v50 = vld [vmem:[%s5484_s0 + $0x228] sm:$0xff] }
  0x10   :  { %2930 = vmatprep.mubr.msk.f32.mxu0 %vm3569_vm1, %v3570_v6  ;;  %3085 = vmatprep.mubr.msk.f32.mxu1 %vm3569_vm1, %v3570_v6  ;;  %v37_v47 = vld [vmem:[%s5484_s0 + $0x98] sm:$0xff]  ;;  %v38_v49 = vld [vmem:[%s5484_s0 + $0xa0] sm:$0xff]  ;;  %v39_v51 = vld [vmem:[%s5484_s0 + $0xa8] sm:$0xff] }
  0x11   :  { %3556 = vmatpush3.bf16.msk.msra.mxu0 %vm3608_vm3, %v3540_v7  ;;  %3563 = vmatpush3.bf16.msk.msra.mxu1 %vm3608_vm3, %v3540_v7  ;;  %v2427_v52 = vld [vmem:[%s5484_s0 + $0x230] sm:$0xff]  ;;  %v2428_v54 = vld [vmem:[%s5484_s0 + $0x238] sm:$0xff]  ;;  %v2429_v56 = vld [vmem:[%s5484_s0 + $0x240] sm:$0xff] }
  0x12   :  { %v40_v53 = vld [vmem:[%s5484_s0 + $0xb0] sm:$0xff]  ;;  %v41_v55 = vld [vmem:[%s5484_s0 + $0xb8] sm:$0xff]  ;;  %v42_v57 = vld [vmem:[%s5484_s0 + $0xc0] sm:$0xff] }
  0x13   :  { %2931 = vmatmul.mubr.msk.f32.gmra.mrb[4].mxu0 %vm67_vm4, %v20_v13  ;;  %3086 = vmatmul.mubr.msk.f32.gmra.mrb[4].mxu1 %vm67_vm4, %v2408_v14  ;;  %v2430_v58 = vld [vmem:[%s5484_s0 + $0x248] sm:$0xff]  ;;  %v2431_v60 = vld [vmem:[%s5484_s0 + $0x250] sm:$0xff]  ;;  %v2432_v62 = vld [vmem:[%s5484_s0 + $0x258] sm:$0xff] }
  0x14   :  { %2933 = vmatprep.mubr.msk.f32.mxu0 %vm3569_vm1, %v3570_v6  ;;  %3088 = vmatprep.mubr.msk.f32.mxu1 %vm3569_vm1, %v3570_v6  ;;  %v43_v59 = vld [vmem:[%s5484_s0 + $0xc8] sm:$0xff]  ;;  %v44_v61 = vld [vmem:[%s5484_s0 + $0xd0] sm:$0xff]  ;;  %v45_v63 = vld [vmem:[%s5484_s0 + $0xd8] sm:$0xff] }
  0x15   :  { %v2433_v0 = vld [vmem:[%s5484_s0 + $0x260] sm:$0xff]  ;;  %v2434_v2 = vld [vmem:[%s5484_s0 + $0x268] sm:$0xff]  ;;  %v2435_v4 = vld [vmem:[%s5484_s0 + $0x270] sm:$0xff] }
  0x16   :  { %v46_v1 = vld [vmem:[%s5484_s0 + $0xe0] sm:$0xff]  ;;  %v47_v3 = vld [vmem:[%s5484_s0 + $0xe8] sm:$0xff]  ;;  %v48_v5 = vld [vmem:[%s5484_s0 + $0xf0] sm:$0xff] }
  0x17   :  { %2934 = vmatmul.mubr.msk.f32.gmra.mrb[6].mxu0 %vm67_vm4, %v21_v15  ;;  %3089 = vmatmul.mubr.msk.f32.gmra.mrb[6].mxu1 %vm67_vm4, %v2409_v16  ;;  %v2436_v7 = vld [vmem:[%s5484_s0 + $0x278] sm:$0xff]  ;;  %v2437_v9 = vld [vmem:[%s5484_s0 + $0x280] sm:$0xff]  ;;  %v2438_v11 = vld [vmem:[%s5484_s0 + $0x288] sm:$0xff] }
  0x18   :  { %2936 = vmatprep.mubr.msk.f32.mxu0 %vm3569_vm1, %v3570_v6  ;;  %3091 = vmatprep.mubr.msk.f32.mxu1 %vm3569_vm1, %v3570_v6  ;;  %v49_v8 = vld [vmem:[%s5484_s0 + $0xf8] sm:$0xff]  ;;  %v50_v10 = vld [vmem:[%s5484_s0 + $0x100] sm:$0xff]  ;;  %v51_v12 = vld [vmem:[%s5484_s0 + $0x108] sm:$0xff] }
  0x19   :  { %v2439_v13 = vld [vmem:[%s5484_s0 + $0x290] sm:$0xff]  ;;  %v2440_v15 = vld [vmem:[%s5484_s0 + $0x298] sm:$0xff] }
  0x1a   :  { %v52_v14 = vld [vmem:[%s5484_s0 + $0x110] sm:$0xff]  ;;  %v53_v16 = vld [vmem:[%s5484_s0 + $0x118] sm:$0xff] }
  0x1b   :  { %2937 = vmatmul.mubr.msk.f32.gmra.mrb[8].mxu0 %vm67_vm4, %v22_v17  ;;  %3092 = vmatmul.mubr.msk.f32.gmra.mrb[8].mxu1 %vm67_vm4, %v2410_v18  ;;  %v2441_v17 = vld [vmem:[%s5484_s0 + $0x2a0] sm:$0xff] }
  0x1c   :  { %2939 = vmatprep.mubr.msk.f32.mxu0 %vm3569_vm1, %v3570_v6  ;;  %3094 = vmatprep.mubr.msk.f32.mxu1 %vm3569_vm1, %v3570_v6  ;;  %v54_v18 = vld [vmem:[%s5484_s0 + $0x120] sm:$0xff] }
  0x1f   :  { %2940 = vmatmul.mubr.msk.f32.gmra.mrb[10].mxu0 %vm67_vm4, %v23_v19  ;;  %3095 = vmatmul.mubr.msk.f32.gmra.mrb[10].mxu1 %vm67_vm4, %v2411_v20  ;;  %v2442_v19 = vld [vmem:[%s5484_s0 + $0x2a8] sm:$0xff] }
  0x20   :  { %2942 = vmatprep.mubr.msk.f32.mxu0 %vm3569_vm1, %v3570_v6  ;;  %3097 = vmatprep.mubr.msk.f32.mxu1 %vm3569_vm1, %v3570_v6  ;;  %v55_v20 = vld [vmem:[%s5484_s0 + $0x128] sm:$0xff] }
  0x23   :  { %2943 = vmatmul.mubr.msk.f32.gmra.mrb[12].mxu0 %vm67_vm4, %v24_v21  ;;  %3098 = vmatmul.mubr.msk.f32.gmra.mrb[12].mxu1 %vm67_vm4, %v2412_v22  ;;  %v2443_v21 = vld [vmem:[%s5484_s0 + $0x2b0] sm:$0xff] }
  0x24   :  { %2945 = vmatprep.mubr.msk.f32.mxu0 %vm3569_vm1, %v3570_v6  ;;  %3100 = vmatprep.mubr.msk.f32.mxu1 %vm3569_vm1, %v3570_v6  ;;  %v56_v22 = vld [vmem:[%s5484_s0 + $0x130] sm:$0xff] }
  0x27   :  { %2946 = vmatmul.mubr.msk.f32.gmra.mrb[14].mxu0 %vm67_vm4, %v25_v23  ;;  %3101 = vmatmul.mubr.msk.f32.gmra.mrb[14].mxu1 %vm67_vm4, %v2413_v24  ;;  %v2444_v23 = vld [vmem:[%s5484_s0 + $0x2b8] sm:$0xff] }
  0x28   :  { %2948 = vmatprep.mubr.msk.f32.mxu0 %vm3569_vm1, %v3570_v6  ;;  %3103 = vmatprep.mubr.msk.f32.mxu1 %vm3569_vm1, %v3570_v6  ;;  %v57_v24 = vld [vmem:[%s5484_s0 + $0x138] sm:$0xff] }
  0x2b   :  { %2949 = vmatmul.mubr.msk.f32.gmra.mrb[16].mxu0 %vm67_vm4, %v26_v25  ;;  %3104 = vmatmul.mubr.msk.f32.gmra.mrb[16].mxu1 %vm67_vm4, %v2414_v26  ;;  %v2445_v25 = vld [vmem:[%s5484_s0 + $0x2c0] sm:$0xff] }
  0x2c   :  { %2951 = vmatprep.mubr.msk.f32.mxu0 %vm3569_vm1, %v3570_v6  ;;  %3106 = vmatprep.mubr.msk.f32.mxu1 %vm3569_vm1, %v3570_v6  ;;  %v58_v26 = vld [vmem:[%s5484_s0 + $0x140] sm:$0xff] }
  0x2f   :  { %2952 = vmatmul.mubr.msk.f32.gmra.mrb[18].mxu0 %vm67_vm4, %v27_v27  ;;  %3107 = vmatmul.mubr.msk.f32.gmra.mrb[18].mxu1 %vm67_vm4, %v2415_v28  ;;  %v2446_v27 = vld [vmem:[%s5484_s0 + $0x2c8] sm:$0xff] }
  0x30   :  { %2954 = vmatprep.mubr.msk.f32.mxu0 %vm3569_vm1, %v3570_v6  ;;  %3109 = vmatprep.mubr.msk.f32.mxu1 %vm3569_vm1, %v3570_v6  ;;  %v59_v28 = vld [vmem:[%s5484_s0 + $0x148] sm:$0xff] }
  0x33   :  { %2955 = vmatmul.mubr.msk.f32.gmra.mrb[20].mxu0 %vm67_vm4, %v28_v29  ;;  %3110 = vmatmul.mubr.msk.f32.gmra.mrb[20].mxu1 %vm67_vm4, %v2416_v30  ;;  %v2447_v29 = vld [vmem:[%s5484_s0 + $0x2d0] sm:$0xff] }
  0x34   :  { %2957 = vmatprep.mubr.msk.f32.mxu0 %vm3569_vm1, %v3570_v6  ;;  %3112 = vmatprep.mubr.msk.f32.mxu1 %vm3569_vm1, %v3570_v6  ;;  %v60_v30 = vld [vmem:[%s5484_s0 + $0x150] sm:$0xff] }
  0x37   :  { %2958 = vmatmul.mubr.msk.f32.gmra.mrb[22].mxu0 %vm67_vm4, %v29_v31  ;;  %3113 = vmatmul.mubr.msk.f32.gmra.mrb[22].mxu1 %vm67_vm4, %v2417_v32  ;;  %v2448_v31 = vld [vmem:[%s5484_s0 + $0x2d8] sm:$0xff] }
  0x38   :  { %2960 = vmatprep.mubr.msk.f32.mxu0 %vm3569_vm1, %v3570_v6  ;;  %3115 = vmatprep.mubr.msk.f32.mxu1 %vm3569_vm1, %v3570_v6  ;;  %v61_v32 = vld [vmem:[%s5484_s0 + $0x158] sm:$0xff] }
  0x3b   :  { %2961 = vmatmul.mubr.msk.f32.gmra.mrb[24].mxu0 %vm67_vm4, %v30_v33  ;;  %3116 = vmatmul.mubr.msk.f32.gmra.mrb[24].mxu1 %vm67_vm4, %v2418_v34  ;;  %v2449_v33 = vld [vmem:[%s5484_s0 + $0x2e0] sm:$0xff] }
  0x3c   :  { %2963 = vmatprep.mubr.msk.f32.mxu0 %vm3569_vm1, %v3570_v6  ;;  %3118 = vmatprep.mubr.msk.f32.mxu1 %vm3569_vm1, %v3570_v6  ;;  %v62_v34 = vld [vmem:[%s5484_s0 + $0x160] sm:$0xff] }
  0x3f   :  { %2964 = vmatmul.mubr.msk.f32.gmra.mrb[26].mxu0 %vm67_vm4, %v31_v35  ;;  %3119 = vmatmul.mubr.msk.f32.gmra.mrb[26].mxu1 %vm67_vm4, %v2419_v36  ;;  %v2450_v35 = vld [vmem:[%s5484_s0 + $0x2e8] sm:$0xff] }
  0x40   :  { %2966 = vmatprep.mubr.msk.f32.mxu0 %vm3569_vm1, %v3570_v6  ;;  %3121 = vmatprep.mubr.msk.f32.mxu1 %vm3569_vm1, %v3570_v6  ;;  %v63_v36 = vld [vmem:[%s5484_s0 + $0x168] sm:$0xff] }
  0x43   :  { %2967 = vmatmul.mubr.msk.f32.gmra.mrb[28].mxu0 %vm67_vm4, %v32_v37  ;;  %3122 = vmatmul.mubr.msk.f32.gmra.mrb[28].mxu1 %vm67_vm4, %v2420_v38  ;;  %v2451_v37 = vld [vmem:[%s5484_s0 + $0x2f0] sm:$0xff] }
  0x44   :  { %2969 = vmatprep.mubr.msk.f32.mxu0 %vm3569_vm1, %v3570_v6  ;;  %3124 = vmatprep.mubr.msk.f32.mxu1 %vm3569_vm1, %v3570_v6  ;;  %v64_v38 = vld [vmem:[%s5484_s0 + $0x170] sm:$0xff] }
  0x47   :  { %2970 = vmatmul.mubr.msk.f32.gmra.mrb[30].mxu0 %vm67_vm4, %v33_v39  ;;  %3125 = vmatmul.mubr.msk.f32.gmra.mrb[30].mxu1 %vm67_vm4, %v2421_v40  ;;  %v2452_v39 = vld [vmem:[%s5484_s0 + $0x2f8] sm:$0xff] }
  0x48   :  { %2972 = vmatprep.mubr.msk.f32.mxu0 %vm3569_vm1, %v3570_v6  ;;  %3127 = vmatprep.mubr.msk.f32.mxu1 %vm3569_vm1, %v3570_v6  ;;  %v65_v40 = vld [vmem:[%s5484_s0 + $0x178] sm:$0xff] }
  0x4b   :  { %2973 = vmatmul.mubr.msk.f32.gmra.mrb[32].mxu0 %vm67_vm4, %v34_v41  ;;  %3128 = vmatmul.mubr.msk.f32.gmra.mrb[32].mxu1 %vm67_vm4, %v2422_v42  ;;  %v2453_v41 = vld [vmem:[%s5484_s0 + $0x300] sm:$0xff] }
  0x4c   :  { %2975 = vmatprep.mubr.msk.f32.mxu0 %vm3569_vm1, %v3570_v6  ;;  %3130 = vmatprep.mubr.msk.f32.mxu1 %vm3569_vm1, %v3570_v6  ;;  %v66_v42 = vld [vmem:[%s5484_s0 + $0x180] sm:$0xff] }
  0x4f   :  { %2976 = vmatmul.mubr.msk.f32.gmra.mrb[34].mxu0 %vm67_vm4, %v35_v43  ;;  %3131 = vmatmul.mubr.msk.f32.gmra.mrb[34].mxu1 %vm67_vm4, %v2423_v44  ;;  %v2454_v43 = vld [vmem:[%s5484_s0 + $0x308] sm:$0xff]  ;;  %v2505_v44 = vld [vmem:[%s5484_s0 + $0x310] sm:$0xff] }
  0x50   :  { %2978 = vmatprep.mubr.msk.f32.mxu0 %vm3569_vm1, %v3570_v6  ;;  %3133 = vmatprep.mubr.msk.f32.mxu1 %vm3569_vm1, %v3570_v6 }
  0x53   :  { %2979 = vmatmul.mubr.msk.f32.gmra.mrb[36].mxu0 %vm67_vm4, %v36_v45  ;;  %3134 = vmatmul.mubr.msk.f32.gmra.mrb[36].mxu1 %vm67_vm4, %v2424_v46  ;;  %v2604_v45 = vld [vmem:[%s5484_s0 + $0x498] sm:$0xff] }
  0x54   :  { %2981 = vmatprep.mubr.msk.f32.mxu0 %vm3569_vm1, %v3570_v6  ;;  %3136 = vmatprep.mubr.msk.f32.mxu1 %vm3569_vm1, %v3570_v6  ;;  %v2506_v46 = vld [vmem:[%s5484_s0 + $0x318] sm:$0xff] }
  0x57   :  { %2982 = vmatmul.mubr.msk.f32.gmra.mrb[38].mxu0 %vm67_vm4, %v37_v47  ;;  %3137 = vmatmul.mubr.msk.f32.gmra.mrb[38].mxu1 %vm67_vm4, %v2425_v48  ;;  %v2605_v47 = vld [vmem:[%s5484_s0 + $0x4a0] sm:$0xff] }
  0x58   :  { %2984 = vmatprep.mubr.msk.f32.mxu0 %vm3569_vm1, %v3570_v6  ;;  %3139 = vmatprep.mubr.msk.f32.mxu1 %vm3569_vm1, %v3570_v6  ;;  %v2507_v48 = vld [vmem:[%s5484_s0 + $0x320] sm:$0xff] }
  0x5b   :  { %2985 = vmatmul.mubr.msk.f32.gmra.mrb[40].mxu0 %vm67_vm4, %v38_v49  ;;  %3140 = vmatmul.mubr.msk.f32.gmra.mrb[40].mxu1 %vm67_vm4, %v2426_v50  ;;  %v2606_v49 = vld [vmem:[%s5484_s0 + $0x4a8] sm:$0xff] }
  0x5c   :  { %2987 = vmatprep.mubr.msk.f32.mxu0 %vm3569_vm1, %v3570_v6  ;;  %3142 = vmatprep.mubr.msk.f32.mxu1 %vm3569_vm1, %v3570_v6  ;;  %v2508_v50 = vld [vmem:[%s5484_s0 + $0x328] sm:$0xff] }
  0x5f   :  { %2988 = vmatmul.mubr.msk.f32.gmra.mrb[42].mxu0 %vm67_vm4, %v39_v51  ;;  %3143 = vmatmul.mubr.msk.f32.gmra.mrb[42].mxu1 %vm67_vm4, %v2427_v52  ;;  %v2607_v51 = vld [vmem:[%s5484_s0 + $0x4b0] sm:$0xff] }
  0x60   :  { %2990 = vmatprep.mubr.msk.f32.mxu0 %vm3569_vm1, %v3570_v6  ;;  %3145 = vmatprep.mubr.msk.f32.mxu1 %vm3569_vm1, %v3570_v6  ;;  %v2509_v52 = vld [vmem:[%s5484_s0 + $0x330] sm:$0xff] }
  0x63   :  { %2991 = vmatmul.mubr.msk.f32.gmra.mrb[44].mxu0 %vm67_vm4, %v40_v53  ;;  %3146 = vmatmul.mubr.msk.f32.gmra.mrb[44].mxu1 %vm67_vm4, %v2428_v54  ;;  %v2608_v53 = vld [vmem:[%s5484_s0 + $0x4b8] sm:$0xff] }
  0x64   :  { %2993 = vmatprep.mubr.msk.f32.mxu0 %vm3569_vm1, %v3570_v6  ;;  %3148 = vmatprep.mubr.msk.f32.mxu1 %vm3569_vm1, %v3570_v6 }
  0x67   :  { %2994 = vmatmul.mubr.msk.f32.gmra.mrb[46].mxu0 %vm67_vm4, %v41_v55  ;;  %3149 = vmatmul.mubr.msk.f32.gmra.mrb[46].mxu1 %vm67_vm4, %v2429_v56 }
  0x68   :  { %2996 = vmatprep.mubr.msk.f32.mxu0 %vm3569_vm1, %v3570_v6  ;;  %3151 = vmatprep.mubr.msk.f32.mxu1 %vm3569_vm1, %v3570_v6 }
  0x6b   :  { %2997 = vmatmul.mubr.msk.f32.gmra.mrb[48].mxu0 %vm67_vm4, %v42_v57  ;;  %3152 = vmatmul.mubr.msk.f32.gmra.mrb[48].mxu1 %vm67_vm4, %v2430_v58 }
  0x6c   :  { %2999 = vmatprep.mubr.msk.f32.mxu0 %vm3569_vm1, %v3570_v6  ;;  %3154 = vmatprep.mubr.msk.f32.mxu1 %vm3569_vm1, %v3570_v6 }
  0x6f   :  { %3000 = vmatmul.mubr.msk.f32.gmra.mrb[50].mxu0 %vm67_vm4, %v43_v59  ;;  %3155 = vmatmul.mubr.msk.f32.gmra.mrb[50].mxu1 %vm67_vm4, %v2431_v60  ;;  %v2510_v59 = vld [vmem:[%s5484_s0 + $0x338] sm:$0xff]  ;;  %v2609_v60 = vld [vmem:[%s5484_s0 + $0x4c0] sm:$0xff] }
  0x70   :  { %3002 = vmatprep.mubr.msk.f32.mxu0 %vm3569_vm1, %v3570_v6  ;;  %3157 = vmatprep.mubr.msk.f32.mxu1 %vm3569_vm1, %v3570_v6 }
  0x73   :  { %3003 = vmatmul.mubr.msk.f32.gmra.mrb[52].mxu0 %vm67_vm4, %v44_v61  ;;  %3158 = vmatmul.mubr.msk.f32.gmra.mrb[52].mxu1 %vm67_vm4, %v2432_v62 }
  0x74   :  { %3005 = vmatprep.mubr.msk.f32.mxu0 %vm3569_vm1, %v3570_v6  ;;  %3160 = vmatprep.mubr.msk.f32.mxu1 %vm3569_vm1, %v3570_v6 }
  0x77   :  { %3006 = vmatmul.mubr.msk.f32.gmra.mrb[54].mxu0 %vm67_vm4, %v45_v63  ;;  %3161 = vmatmul.mubr.msk.f32.gmra.mrb[54].mxu1 %vm67_vm4, %v2433_v0  ;;  %v2537_v63 = vld [vmem:[%s5484_s0 + $0x410] sm:$0xff] }
  0x78   :  { %3008 = vmatprep.mubr.msk.f32.mxu0 %vm3569_vm1, %v3570_v6  ;;  %3163 = vmatprep.mubr.msk.f32.mxu1 %vm3569_vm1, %v3570_v6 }
  0x7b   :  { %3009 = vmatmul.mubr.msk.f32.gmra.mrb[56].mxu0 %vm67_vm4, %v46_v1  ;;  %3164 = vmatmul.mubr.msk.f32.gmra.mrb[56].mxu1 %vm67_vm4, %v2434_v2  ;;  %v2511_v2 = vld [vmem:[%s5484_s0 + $0x340] sm:$0xff] }
  0x7c   :  { %3011 = vmatprep.mubr.msk.f32.mxu0 %vm3569_vm1, %v3570_v6  ;;  %3166 = vmatprep.mubr.msk.f32.mxu1 %vm3569_vm1, %v3570_v6 }
  0x7f   :  { %3012 = vmatmul.mubr.msk.f32.gmra.mrb[58].mxu0 %vm67_vm4, %v47_v3  ;;  %3167 = vmatmul.mubr.msk.f32.gmra.mrb[58].mxu1 %vm67_vm4, %v2435_v4  ;;  %v2610_v3 = vld [vmem:[%s5484_s0 + $0x4c8] sm:$0xff] }
  0x80   :  { %3014 = vmatprep.mubr.msk.f32.mxu0 %vm3569_vm1, %v3570_v6  ;;  %3169 = vmatprep.mubr.msk.f32.mxu1 %vm3569_vm1, %v3570_v6 }
  0x83   :  { %3015 = vmatmul.mubr.msk.f32.gmra.mrb[60].mxu0 %vm67_vm4, %v48_v5  ;;  %3170 = vmatmul.mubr.msk.f32.gmra.mrb[60].mxu1 %vm67_vm4, %v2436_v7 }
  0x84   :  { %3017 = vmatprep.mubr.msk.f32.mxu0 %vm3569_vm1, %v3570_v6  ;;  %3172 = vmatprep.mubr.msk.f32.mxu1 %vm3569_vm1, %v3570_v6 }
  0x87   :  { %3018 = vmatmul.mubr.msk.f32.gmra.mrb[62].mxu0 %vm67_vm4, %v49_v8  ;;  %3173 = vmatmul.mubr.msk.f32.gmra.mrb[62].mxu1 %vm67_vm4, %v2437_v9 }
  0x88   :  { %3020 = vmatprep.mubr.msk.f32.mxu0 %vm3569_vm1, %v3570_v6  ;;  %3175 = vmatprep.mubr.msk.f32.mxu1 %vm3569_vm1, %v3570_v6 }
  0x8b   :  { %3021 = vmatmul.mubr.msk.f32.gmra.mrb[64].mxu0 %vm67_vm4, %v50_v10  ;;  %3176 = vmatmul.mubr.msk.f32.gmra.mrb[64].mxu1 %vm67_vm4, %v2438_v11  ;;  %v2512_v10 = vld [vmem:[%s5484_s0 + $0x348] sm:$0xff]  ;;  %v2611_v11 = vld [vmem:[%s5484_s0 + $0x4d0] sm:$0xff] }
  0x8c   :  { %3023 = vmatprep.mubr.msk.f32.mxu0 %vm3569_vm1, %v3570_v6  ;;  %3178 = vmatprep.mubr.msk.f32.mxu1 %vm3569_vm1, %v3570_v6 }
  0x8f   :  { %3024 = vmatmul.mubr.msk.f32.gmra.mrb[66].mxu0 %vm67_vm4, %v51_v12  ;;  %3179 = vmatmul.mubr.msk.f32.gmra.mrb[66].mxu1 %vm67_vm4, %v2439_v13 }
  0x90   :  { %3026 = vmatprep.mubr.msk.f32.mxu0 %vm3569_vm1, %v3570_v6  ;;  %3181 = vmatprep.mubr.msk.f32.mxu1 %vm3569_vm1, %v3570_v6 }
  0x93   :  { %3027 = vmatmul.mubr.msk.f32.gmra.mrb[68].mxu0 %vm67_vm4, %v52_v14  ;;  %3182 = vmatmul.mubr.msk.f32.gmra.mrb[68].mxu1 %vm67_vm4, %v2440_v15  ;;  %v2536_v14 = vld [vmem:[%s5484_s0 + $0x408] sm:$0xff] }
  0x94   :  { %3029 = vmatprep.mubr.msk.f32.mxu0 %vm3569_vm1, %v3570_v6  ;;  %3184 = vmatprep.mubr.msk.f32.mxu1 %vm3569_vm1, %v3570_v6 }
  0x97   :  { %3030 = vmatmul.mubr.msk.f32.gmra.mrb[70].mxu0 %vm67_vm4, %v53_v16  ;;  %3185 = vmatmul.mubr.msk.f32.gmra.mrb[70].mxu1 %vm67_vm4, %v2441_v17  ;;  %v2513_v17 = vld [vmem:[%s5484_s0 + $0x350] sm:$0xff] }
  0x98   :  { %3032 = vmatprep.mubr.msk.f32.mxu0 %vm3569_vm1, %v3570_v6  ;;  %3187 = vmatprep.mubr.msk.f32.mxu1 %vm3569_vm1, %v3570_v6 }
  0x9b   :  { %3033 = vmatmul.mubr.msk.f32.gmra.mrb[72].mxu0 %vm67_vm4, %v54_v18  ;;  %3188 = vmatmul.mubr.msk.f32.gmra.mrb[72].mxu1 %vm67_vm4, %v2442_v19  ;;  %v2612_v18 = vld [vmem:[%s5484_s0 + $0x4d8] sm:$0xff] }
  0x9c   :  { %3035 = vmatprep.mubr.msk.f32.mxu0 %vm3569_vm1, %v3570_v6  ;;  %3190 = vmatprep.mubr.msk.f32.mxu1 %vm3569_vm1, %v3570_v6 }
  0x9f   :  { %3036 = vmatmul.mubr.msk.f32.gmra.mrb[74].mxu0 %vm67_vm4, %v55_v20  ;;  %3191 = vmatmul.mubr.msk.f32.gmra.mrb[74].mxu1 %vm67_vm4, %v2443_v21 }
  0xa0   :  { %3038 = vmatprep.mubr.msk.f32.mxu0 %vm3569_vm1, %v3570_v6  ;;  %3193 = vmatprep.mubr.msk.f32.mxu1 %vm3569_vm1, %v3570_v6 }
  0xa3   :  { %3039 = vmatmul.mubr.msk.f32.gmra.mrb[76].mxu0 %vm67_vm4, %v56_v22  ;;  %3194 = vmatmul.mubr.msk.f32.gmra.mrb[76].mxu1 %vm67_vm4, %v2444_v23 }
  0xa4   :  { %3041 = vmatprep.mubr.msk.f32.mxu0 %vm3569_vm1, %v3570_v6  ;;  %3196 = vmatprep.mubr.msk.f32.mxu1 %vm3569_vm1, %v3570_v6 }
  0xa7   :  { %3042 = vmatmul.mubr.msk.f32.gmra.mrb[78].mxu0 %vm67_vm4, %v57_v24  ;;  %3197 = vmatmul.mubr.msk.f32.gmra.mrb[78].mxu1 %vm67_vm4, %v2445_v25  ;;  %v2514_v24 = vld [vmem:[%s5484_s0 + $0x358] sm:$0xff]  ;;  %v2613_v25 = vld [vmem:[%s5484_s0 + $0x4e0] sm:$0xff] }
  0xa8   :  { %3044 = vmatprep.mubr.msk.f32.mxu0 %vm3569_vm1, %v3570_v6  ;;  %3199 = vmatprep.mubr.msk.f32.mxu1 %vm3569_vm1, %v3570_v6 }
  0xab   :  { %3045 = vmatmul.mubr.msk.f32.gmra.mrb[80].mxu0 %vm67_vm4, %v58_v26  ;;  %3200 = vmatmul.mubr.msk.f32.gmra.mrb[80].mxu1 %vm67_vm4, %v2446_v27 }
  0xac   :  { %3047 = vmatprep.mubr.msk.f32.mxu0 %vm3569_vm1, %v3570_v6  ;;  %3202 = vmatprep.mubr.msk.f32.mxu1 %vm3569_vm1, %v3570_v6 }
  0xaf   :  { %3048 = vmatmul.mubr.msk.f32.gmra.mrb[82].mxu0 %vm67_vm4, %v59_v28  ;;  %3203 = vmatmul.mubr.msk.f32.gmra.mrb[82].mxu1 %vm67_vm4, %v2447_v29  ;;  %v2535_v28 = vld [vmem:[%s5484_s0 + $0x400] sm:$0xff] }
  0xb0   :  { %3050 = vmatprep.mubr.msk.f32.mxu0 %vm3569_vm1, %v3570_v6  ;;  %3205 = vmatprep.mubr.msk.f32.mxu1 %vm3569_vm1, %v3570_v6 }
  0xb3   :  { %3051 = vmatmul.mubr.msk.f32.gmra.mrb[84].mxu0 %vm67_vm4, %v60_v30  ;;  %3206 = vmatmul.mubr.msk.f32.gmra.mrb[84].mxu1 %vm67_vm4, %v2448_v31  ;;  %v2515_v31 = vld [vmem:[%s5484_s0 + $0x360] sm:$0xff] }
  0xb4   :  { %3053 = vmatprep.mubr.msk.f32.mxu0 %vm3569_vm1, %v3570_v6  ;;  %3208 = vmatprep.mubr.msk.f32.mxu1 %vm3569_vm1, %v3570_v6 }
  0xb7   :  { %3054 = vmatmul.mubr.msk.f32.gmra.mrb[86].mxu0 %vm67_vm4, %v61_v32  ;;  %3209 = vmatmul.mubr.msk.f32.gmra.mrb[86].mxu1 %vm67_vm4, %v2449_v33  ;;  %v2614_v32 = vld [vmem:[%s5484_s0 + $0x4e8] sm:$0xff] }
  0xb8   :  { %3056 = vmatprep.mubr.msk.f32.mxu0 %vm3569_vm1, %v3570_v6  ;;  %3211 = vmatprep.mubr.msk.f32.mxu1 %vm3569_vm1, %v3570_v6 }
  0xbb   :  { %3057 = vmatmul.mubr.msk.f32.gmra.mrb[88].mxu0 %vm67_vm4, %v62_v34  ;;  %3212 = vmatmul.mubr.msk.f32.gmra.mrb[88].mxu1 %vm67_vm4, %v2450_v35 }
  0xbc   :  { %3059 = vmatprep.mubr.msk.f32.mxu0 %vm3569_vm1, %v3570_v6  ;;  %3214 = vmatprep.mubr.msk.f32.mxu1 %vm3569_vm1, %v3570_v6 }
  0xbf   :  { %3060 = vmatmul.mubr.msk.f32.gmra.mrb[90].mxu0 %vm67_vm4, %v63_v36  ;;  %3215 = vmatmul.mubr.msk.f32.gmra.mrb[90].mxu1 %vm67_vm4, %v2451_v37 }
  0xc0   :  { %3062 = vmatprep.mubr.msk.f32.mxu0 %vm3569_vm1, %v3570_v6  ;;  %3217 = vmatprep.mubr.msk.f32.mxu1 %vm3569_vm1, %v3570_v6 }
  0xc3   :  { %3063 = vmatmul.mubr.msk.f32.gmra.mrb[92].mxu0 %vm67_vm4, %v64_v38  ;;  %3218 = vmatmul.mubr.msk.f32.gmra.mrb[92].mxu1 %vm67_vm4, %v2452_v39  ;;  %v2516_v38 = vld [vmem:[%s5484_s0 + $0x368] sm:$0xff]  ;;  %v2615_v39 = vld [vmem:[%s5484_s0 + $0x4f0] sm:$0xff] }
  0xc4   :  { %3065 = vmatprep.mubr.msk.f32.mxu0 %vm3569_vm1, %v3570_v6  ;;  %3220 = vmatprep.mubr.msk.f32.mxu1 %vm3569_vm1, %v3570_v6 }
  0xc7   :  { %3066 = vmatmul.mubr.msk.f32.gmra.mrb[94].mxu0 %vm67_vm4, %v65_v40  ;;  %3221 = vmatmul.mubr.msk.f32.gmra.mrb[94].mxu1 %vm67_vm4, %v2453_v41 }
  0xc8   :  { %3068 = vmatprep.mubr.msk.f32.mxu0 %vm3569_vm1, %v3570_v6  ;;  %3223 = vmatprep.mubr.msk.f32.mxu1 %vm3569_vm1, %v3570_v6 }
  0xcb   :  { %3069 = vmatmul.mubr.msk.f32.gmra.mrb[96].mxu0 %vm67_vm4, %v66_v42  ;;  %3224 = vmatmul.mubr.msk.f32.gmra.mrb[96].mxu1 %vm67_vm4, %v2454_v43  ;;  %v2534_v42 = vld [vmem:[%s5484_s0 + $0x3f8] sm:$0xff] }
  0xcc   :  { %3234 = vmatprep.mubr.msk.f32.mxu0 %vm3569_vm1, %v3570_v6  ;;  %3389 = vmatprep.mubr.msk.f32.mxu1 %vm3569_vm1, %v3570_v6 }
  0xcf   :  { %3235 = vmatmul.mubr.msk.f32.vlgmr.msra.gmra.mrb[98].mxu0 %vm67_vm4, %v2505_v44  ;;  %3390 = vmatmul.mubr.msk.f32.vlgmr.msra.gmra.mrb[98].mxu1 %vm67_vm4, %v2604_v45  ;;  %v2517_v45 = vld [vmem:[%s5484_s0 + $0x370] sm:$0xff] }
  0xd0   :  { %3237 = vmatprep.mubr.msk.f32.mxu0 %vm3569_vm1, %v3570_v6  ;;  %3392 = vmatprep.mubr.msk.f32.mxu1 %vm3569_vm1, %v3570_v6 }
  0xd3   :  { %3238 = vmatmul.mubr.msk.f32.gmra.mrb[100].mxu0 %vm67_vm4, %v2506_v46  ;;  %3393 = vmatmul.mubr.msk.f32.gmra.mrb[100].mxu1 %vm67_vm4, %v2605_v47  ;;  %v2616_v46 = vld [vmem:[%s5484_s0 + $0x4f8] sm:$0xff] }
  0xd4   :  { %3240 = vmatprep.mubr.msk.f32.mxu0 %vm3569_vm1, %v3570_v6  ;;  %3395 = vmatprep.mubr.msk.f32.mxu1 %vm3569_vm1, %v3570_v6 }
  0xd7   :  { %3241 = vmatmul.mubr.msk.f32.gmra.mrb[102].mxu0 %vm67_vm4, %v2507_v48  ;;  %3396 = vmatmul.mubr.msk.f32.gmra.mrb[102].mxu1 %vm67_vm4, %v2606_v49 }
  0xd8   :  { %3243 = vmatprep.mubr.msk.f32.mxu0 %vm3569_vm1, %v3570_v6  ;;  %3398 = vmatprep.mubr.msk.f32.mxu1 %vm3569_vm1, %v3570_v6 }
  0xdb   :  { %3244 = vmatmul.mubr.msk.f32.gmra.mrb[104].mxu0 %vm67_vm4, %v2508_v50  ;;  %3399 = vmatmul.mubr.msk.f32.gmra.mrb[104].mxu1 %vm67_vm4, %v2607_v51 }
  0xdc   :  { %3246 = vmatprep.mubr.msk.f32.mxu0 %vm3569_vm1, %v3570_v6  ;;  %3401 = vmatprep.mubr.msk.f32.mxu1 %vm3569_vm1, %v3570_v6 }
  0xde   :  { %v4262_v54 = vpop.f32.mrb[0].mxu0  ;;  %v4264_v55 = vpop.f32.mrb[0].mxu1 }
  0xdf   :  { %v2926_v57 = vpop.f32.mrb[1].mxu0  ;;  %v3081_v58 = vpop.f32.mrb[1].mxu1  ;;  %3247 = vmatmul.mubr.msk.f32.gmra.mrb[106].mxu0 %vm67_vm4, %v2509_v52  ;;  %3402 = vmatmul.mubr.msk.f32.gmra.mrb[106].mxu1 %vm67_vm4, %v2608_v53  ;;  %v2518_v52 = vld [vmem:[%s5484_s0 + $0x378] sm:$0xff]  ;;  %v2617_v53 = vld [vmem:[%s5484_s0 + $0x500] sm:$0xff] }
  0xe0   :  { %3249 = vmatprep.mubr.msk.f32.mxu0 %vm3569_vm1, %v3570_v6  ;;  %3404 = vmatprep.mubr.msk.f32.mxu1 %vm3569_vm1, %v3570_v6 }
  0xe2   :  { %v4280_v61 = vpop.f32.mrb[2].mxu0  ;;  %v4282_v62 = vpop.f32.mrb[2].mxu1 }
  0xe3   :  { %v2929_v0 = vpop.f32.mrb[3].mxu0  ;;  %v3084_v1 = vpop.f32.mrb[3].mxu1  ;;  %3250 = vmatmul.mubr.msk.f32.gmra.mrb[108].mxu0 %vm67_vm4, %v2510_v59  ;;  %3405 = vmatmul.mubr.msk.f32.gmra.mrb[108].mxu1 %vm67_vm4, %v2609_v60  ;;  %v2533_v59 = vld [vmem:[%s5484_s0 + $0x3f0] sm:$0xff] }
  0xe4   :  { %3252 = vmatprep.mubr.msk.f32.mxu0 %vm3569_vm1, %v3570_v6  ;;  %3407 = vmatprep.mubr.msk.f32.mxu1 %vm3569_vm1, %v3570_v6  ;;  %v2519_v1 = vld [vmem:[%s5484_s0 + $0x380] sm:$0xff] }
  0xe6   :  { %v4298_v4 = vpop.f32.mrb[4].mxu0  ;;  %v4300_v5 = vpop.f32.mrb[4].mxu1 }
  0xe7   :  { %v2932_v8 = vpop.f32.mrb[5].mxu0  ;;  %v3087_v9 = vpop.f32.mrb[5].mxu1  ;;  %3253 = vmatmul.mubr.msk.f32.gmra.mrb[110].mxu0 %vm67_vm4, %v2511_v2  ;;  %3408 = vmatmul.mubr.msk.f32.gmra.mrb[110].mxu1 %vm67_vm4, %v2610_v3  ;;  %v2618_v2 = vld [vmem:[%s5484_s0 + $0x508] sm:$0xff] }
  0xe8   :  { %3255 = vmatprep.mubr.msk.f32.mxu0 %vm3569_vm1, %v3570_v6  ;;  %3410 = vmatprep.mubr.msk.f32.mxu1 %vm3569_vm1, %v3570_v6 }
  0xea   :  { %v4316_v12 = vpop.f32.mrb[6].mxu0  ;;  %v4318_v13 = vpop.f32.mrb[6].mxu1 }
  0xeb   :  { %v2935_v15 = vpop.f32.mrb[7].mxu0  ;;  %v3090_v16 = vpop.f32.mrb[7].mxu1  ;;  %3256 = vmatmul.mubr.msk.f32.gmra.mrb[112].mxu0 %vm67_vm4, %v2512_v10  ;;  %3411 = vmatmul.mubr.msk.f32.gmra.mrb[112].mxu1 %vm67_vm4, %v2611_v11 }
  0xec   :  { %3258 = vmatprep.mubr.msk.f32.mxu0 %vm3569_vm1, %v3570_v6  ;;  %3413 = vmatprep.mubr.msk.f32.mxu1 %vm3569_vm1, %v3570_v6  ;;  %v2520_v15 = vld [vmem:[%s5484_s0 + $0x388] sm:$0xff]  ;;  %v2619_v16 = vld [vmem:[%s5484_s0 + $0x510] sm:$0xff] }
  0xee   :  { %v4334_v19 = vpop.f32.mrb[8].mxu0  ;;  %v4336_v20 = vpop.f32.mrb[8].mxu1 }
  0xef   :  { %v2938_v22 = vpop.f32.mrb[9].mxu0  ;;  %v3093_v23 = vpop.f32.mrb[9].mxu1  ;;  %3259 = vmatmul.mubr.msk.f32.gmra.mrb[114].mxu0 %vm67_vm4, %v2513_v17  ;;  %3414 = vmatmul.mubr.msk.f32.gmra.mrb[114].mxu1 %vm67_vm4, %v2612_v18 }
  0xf0   :  { %3261 = vmatprep.mubr.msk.f32.mxu0 %vm3569_vm1, %v3570_v6  ;;  %3416 = vmatprep.mubr.msk.f32.mxu1 %vm3569_vm1, %v3570_v6  ;;  %v2532_v22 = vld [vmem:[%s5484_s0 + $0x3e8] sm:$0xff] }
  0xf2   :  { %v4352_v26 = vpop.f32.mrb[10].mxu0  ;;  %v4354_v27 = vpop.f32.mrb[10].mxu1 }
  0xf3   :  { %v2941_v29 = vpop.f32.mrb[11].mxu0  ;;  %v3096_v30 = vpop.f32.mrb[11].mxu1  ;;  %3262 = vmatmul.mubr.msk.f32.gmra.mrb[116].mxu0 %vm67_vm4, %v2514_v24  ;;  %3417 = vmatmul.mubr.msk.f32.gmra.mrb[116].mxu1 %vm67_vm4, %v2613_v25  ;;  %v2521_v25 = vld [vmem:[%s5484_s0 + $0x390] sm:$0xff] }
  0xf4   :  { %3264 = vmatprep.mubr.msk.f32.mxu0 %vm3569_vm1, %v3570_v6  ;;  %3419 = vmatprep.mubr.msk.f32.mxu1 %vm3569_vm1, %v3570_v6  ;;  %v2620_v29 = vld [vmem:[%s5484_s0 + $0x518] sm:$0xff] }
  0xf6   :  { %v4370_v33 = vpop.f32.mrb[12].mxu0  ;;  %v4372_v34 = vpop.f32.mrb[12].mxu1 }
  0xf7   :  { %v2944_v36 = vpop.f32.mrb[13].mxu0  ;;  %v3099_v37 = vpop.f32.mrb[13].mxu1  ;;  %3265 = vmatmul.mubr.msk.f32.gmra.mrb[118].mxu0 %vm67_vm4, %v2515_v31  ;;  %3420 = vmatmul.mubr.msk.f32.gmra.mrb[118].mxu1 %vm67_vm4, %v2614_v32 }
  0xf8   :  { %3267 = vmatprep.mubr.msk.f32.mxu0 %vm3569_vm1, %v3570_v6  ;;  %3422 = vmatprep.mubr.msk.f32.mxu1 %vm3569_vm1, %v3570_v6 }
  0xfa   :  { %v4388_v40 = vpop.f32.mrb[14].mxu0  ;;  %v4390_v41 = vpop.f32.mrb[14].mxu1 }
  0xfb   :  { %v2947_v43 = vpop.f32.mrb[15].mxu0  ;;  %v3102_v44 = vpop.f32.mrb[15].mxu1  ;;  %3268 = vmatmul.mubr.msk.f32.gmra.mrb[120].mxu0 %vm67_vm4, %v2516_v38  ;;  %3423 = vmatmul.mubr.msk.f32.gmra.mrb[120].mxu1 %vm67_vm4, %v2615_v39  ;;  %v2522_v38 = vld [vmem:[%s5484_s0 + $0x398] sm:$0xff]  ;;  %v2621_v39 = vld [vmem:[%s5484_s0 + $0x520] sm:$0xff] }
  0xfc   :  { %3270 = vmatprep.mubr.msk.f32.mxu0 %vm3569_vm1, %v3570_v6  ;;  %3425 = vmatprep.mubr.msk.f32.mxu1 %vm3569_vm1, %v3570_v6 }
  0xfe   :  { %v4406_v47 = vpop.f32.mrb[16].mxu0  ;;  %v4408_v48 = vpop.f32.mrb[16].mxu1 }
  0xff   :  { %v2950_v50 = vpop.f32.mrb[17].mxu0  ;;  %v3105_v51 = vpop.f32.mrb[17].mxu1  ;;  %3271 = vmatmul.mubr.msk.f32.gmra.mrb[122].mxu0 %vm67_vm4, %v2517_v45  ;;  %3426 = vmatmul.mubr.msk.f32.gmra.mrb[122].mxu1 %vm67_vm4, %v2616_v46  ;;  %v2531_v45 = vld [vmem:[%s5484_s0 + $0x3e0] sm:$0xff] }
 0x100   :  { %3273 = vmatprep.mubr.msk.f32.mxu0 %vm3569_vm1, %v3570_v6  ;;  %3428 = vmatprep.mubr.msk.f32.mxu1 %vm3569_vm1, %v3570_v6  ;;  %v2523_v51 = vld [vmem:[%s5484_s0 + $0x3a0] sm:$0xff] }
 0x102   :  { %v4424_v57 = vpop.f32.mrb[18].mxu0  ;;  %v4426_v58 = vpop.f32.mrb[18].mxu1 }
 0x103   :  { %v2953_v60 = vpop.f32.mrb[19].mxu0  ;;  %v3108_v0 = vpop.f32.mrb[19].mxu1  ;;  %3274 = vmatmul.mubr.msk.f32.gmra.mrb[124].mxu0 %vm67_vm4, %v2518_v52  ;;  %3429 = vmatmul.mubr.msk.f32.gmra.mrb[124].mxu1 %vm67_vm4, %v2617_v53  ;;  %v2622_v52 = vld [vmem:[%s5484_s0 + $0x528] sm:$0xff] }
 0x104   :  { %3276 = vmatprep.mubr.msk.f32.mxu0 %vm3569_vm1, %v3570_v6  ;;  %3431 = vmatprep.mubr.msk.f32.mxu1 %vm3569_vm1, %v3570_v6 }
 0x106   :  { %v4442_v3 = vpop.f32.mrb[20].mxu0  ;;  %v4444_v8 = vpop.f32.mrb[20].mxu1 }
 0x107   :  { %v2956_v10 = vpop.f32.mrb[21].mxu0  ;;  %v3111_v11 = vpop.f32.mrb[21].mxu1  ;;  %3277 = vmatmul.mubr.msk.f32.gmra.mrb[126].mxu0 %vm67_vm4, %v2519_v1  ;;  %3432 = vmatmul.mubr.msk.f32.gmra.mrb[126].mxu1 %vm67_vm4, %v2618_v2 }
 0x108   :  { %3279 = vmatprep.mubr.msk.f32.mxu0 %vm3569_vm1, %v3570_v6  ;;  %3434 = vmatprep.mubr.msk.f32.mxu1 %vm3569_vm1, %v3570_v6  ;;  %v2524_v10 = vld [vmem:[%s5484_s0 + $0x3a8] sm:$0xff]  ;;  %v2623_v11 = vld [vmem:[%s5484_s0 + $0x530] sm:$0xff] }
 0x10a   :  { %v4460_v17 = vpop.f32.mrb[22].mxu0  ;;  %v4462_v18 = vpop.f32.mrb[22].mxu1 }
 0x10b   :  { %v2959_v23 = vpop.f32.mrb[23].mxu0  ;;  %v3114_v24 = vpop.f32.mrb[23].mxu1  ;;  %3280 = vmatmul.mubr.msk.f32.gmra.mrb[128].mxu0 %vm67_vm4, %v2520_v15  ;;  %3435 = vmatmul.mubr.msk.f32.gmra.mrb[128].mxu1 %vm67_vm4, %v2619_v16 }
 0x10c   :  { %3282 = vmatprep.mubr.msk.f32.mxu0 %vm3569_vm1, %v3570_v6  ;;  %3437 = vmatprep.mubr.msk.f32.mxu1 %vm3569_vm1, %v3570_v6  ;;  %v2530_v23 = vld [vmem:[%s5484_s0 + $0x3d8] sm:$0xff] }
 0x10e   :  { %v4478_v30 = vpop.f32.mrb[24].mxu0  ;;  %v4480_v31 = vpop.f32.mrb[24].mxu1 }
 0x10f   :  { %v2962_v36 = vpop.f32.mrb[25].mxu0  ;;  %v3117_v37 = vpop.f32.mrb[25].mxu1  ;;  %3283 = vmatmul.mubr.msk.f32.gmra.mrb[130].mxu0 %vm67_vm4, %v2521_v25  ;;  %3438 = vmatmul.mubr.msk.f32.gmra.mrb[130].mxu1 %vm67_vm4, %v2620_v29  ;;  %v2525_v29 = vld [vmem:[%s5484_s0 + $0x3b0] sm:$0xff] }
 0x110   :  { %3285 = vmatprep.mubr.msk.f32.mxu0 %vm3569_vm1, %v3570_v6  ;;  %3440 = vmatprep.mubr.msk.f32.mxu1 %vm3569_vm1, %v3570_v6  ;;  %v2624_v36 = vld [vmem:[%s5484_s0 + $0x538] sm:$0xff] }
 0x112   :  { %v4496_v43 = vpop.f32.mrb[26].mxu0  ;;  %v4498_v44 = vpop.f32.mrb[26].mxu1 }
 0x113   :  { %v2965_v46 = vpop.f32.mrb[27].mxu0  ;;  %v3120_v50 = vpop.f32.mrb[27].mxu1  ;;  %3286 = vmatmul.mubr.msk.f32.gmra.mrb[132].mxu0 %vm67_vm4, %v2522_v38  ;;  %3441 = vmatmul.mubr.msk.f32.gmra.mrb[132].mxu1 %vm67_vm4, %v2621_v39 }
 0x114   :  { %3288 = vmatprep.mubr.msk.f32.mxu0 %vm3569_vm1, %v3570_v6  ;;  %3443 = vmatprep.mubr.msk.f32.mxu1 %vm3569_vm1, %v3570_v6 }
 0x116   :  { %v4514_v53 = vpop.f32.mrb[28].mxu0  ;;  %v4516_v60 = vpop.f32.mrb[28].mxu1 }
 0x117   :  { %v2968_v1 = vpop.f32.mrb[29].mxu0  ;;  %v3123_v2 = vpop.f32.mrb[29].mxu1  ;;  %3289 = vmatmul.mubr.msk.f32.gmra.mrb[134].mxu0 %vm67_vm4, %v2523_v51  ;;  %3444 = vmatmul.mubr.msk.f32.gmra.mrb[134].mxu1 %vm67_vm4, %v2622_v52  ;;  %v2526_v51 = vld [vmem:[%s5484_s0 + $0x3b8] sm:$0xff]  ;;  %v2625_v52 = vld [vmem:[%s5484_s0 + $0x540] sm:$0xff] }
 0x118   :  { %3291 = vmatprep.mubr.msk.f32.mxu0 %vm3569_vm1, %v3570_v6  ;;  %3446 = vmatprep.mubr.msk.f32.mxu1 %vm3569_vm1, %v3570_v6 }
 0x11a   :  { %v4532_v15 = vpop.f32.mrb[30].mxu0  ;;  %v4534_v16 = vpop.f32.mrb[30].mxu1 }
 0x11b   :  { %v2971_v24 = vpop.f32.mrb[31].mxu0  ;;  %v3126_v25 = vpop.f32.mrb[31].mxu1  ;;  %3292 = vmatmul.mubr.msk.f32.gmra.mrb[136].mxu0 %vm67_vm4, %v2524_v10  ;;  %3447 = vmatmul.mubr.msk.f32.gmra.mrb[136].mxu1 %vm67_vm4, %v2623_v11  ;;  %v2529_v10 = vld [vmem:[%s5484_s0 + $0x3d0] sm:$0xff] }
 0x11c   :  { %3294 = vmatprep.mubr.msk.f32.mxu0 %vm3569_vm1, %v3570_v6  ;;  %3449 = vmatprep.mubr.msk.f32.mxu1 %vm3569_vm1, %v3570_v6  ;;  %v2527_v25 = vld [vmem:[%s5484_s0 + $0x3c0] sm:$0xff] }
 0x11e   :  { %v4550_v37 = vpop.f32.mrb[32].mxu0  ;;  %v4552_v38 = vpop.f32.mrb[32].mxu1 }
 0x11f   :  { %v2974_v46 = vpop.f32.mrb[33].mxu0  ;;  %v3129_v50 = vpop.f32.mrb[33].mxu1  ;;  %3295 = vmatmul.mubr.msk.f32.gmra.mrb[138].mxu0 %vm67_vm4, %v2525_v29  ;;  %3450 = vmatmul.mubr.msk.f32.gmra.mrb[138].mxu1 %vm67_vm4, %v2624_v36  ;;  %v2626_v29 = vld [vmem:[%s5484_s0 + $0x548] sm:$0xff] }
 0x120   :  { %3297 = vmatprep.mubr.msk.f32.mxu0 %vm3569_vm1, %v3570_v6  ;;  %3452 = vmatprep.mubr.msk.f32.mxu1 %vm3569_vm1, %v3570_v6 }
 0x122   :  { %v4568_v1 = vpop.f32.mrb[34].mxu0  ;;  %v4570_v2 = vpop.f32.mrb[34].mxu1 }
 0x123   :  { %v2977_v11 = vpop.f32.mrb[35].mxu0  ;;  %v3132_v24 = vpop.f32.mrb[35].mxu1  ;;  %3298 = vmatmul.mubr.msk.f32.gmra.mrb[140].mxu0 %vm67_vm4, %v2526_v51  ;;  %3453 = vmatmul.mubr.msk.f32.gmra.mrb[140].mxu1 %vm67_vm4, %v2625_v52 }
 0x124   :  { %3300 = vmatprep.mubr.msk.f32.mxu0 %vm3569_vm1, %v3570_v6  ;;  %3455 = vmatprep.mubr.msk.f32.mxu1 %vm3569_vm1, %v3570_v6  ;;  %v2528_v11 = vld [vmem:[%s5484_s0 + $0x3c8] sm:$0xff]  ;;  %v2627_v24 = vld [vmem:[%s5484_s0 + $0x550] sm:$0xff] }
 0x126   :  { %v4586_v36 = vpop.f32.mrb[36].mxu0  ;;  %v4588_v46 = vpop.f32.mrb[36].mxu1 }
 0x127   :  { %v2980_v51 = vpop.f32.mrb[37].mxu0  ;;  %v3135_v52 = vpop.f32.mrb[37].mxu1  ;;  %3301 = vmatmul.mubr.msk.f32.gmra.mrb[142].mxu0 %vm67_vm4, %v2527_v25  ;;  %3456 = vmatmul.mubr.msk.f32.gmra.mrb[142].mxu1 %vm67_vm4, %v2626_v29  ;;  %v2628_v25 = vld [vmem:[%s5484_s0 + $0x558] sm:$0xff] }
 0x128   :  { %3303 = vmatprep.mubr.msk.f32.mxu0 %vm3569_vm1, %v3570_v6  ;;  %3458 = vmatprep.mubr.msk.f32.mxu1 %vm3569_vm1, %v3570_v6 }
 0x12a   :  { %v4604_v51 = vpop.f32.mrb[38].mxu0  ;;  %v4606_v52 = vpop.f32.mrb[38].mxu1 }
 0x12b   :  { %v2983_v29 = vpop.f32.mrb[39].mxu0  ;;  %v3138_v50 = vpop.f32.mrb[39].mxu1  ;;  %3304 = vmatmul.mubr.msk.f32.gmra.mrb[144].mxu0 %vm67_vm4, %v2528_v11  ;;  %3459 = vmatmul.mubr.msk.f32.gmra.mrb[144].mxu1 %vm67_vm4, %v2627_v24  ;;  %v2629_v11 = vld [vmem:[%s5484_s0 + $0x560] sm:$0xff] }
 0x12c   :  { %3306 = vmatprep.mubr.msk.f32.mxu0 %vm3569_vm1, %v3570_v6  ;;  %3461 = vmatprep.mubr.msk.f32.mxu1 %vm3569_vm1, %v3570_v6 }
 0x12e   :  { %v4622_v29 = vpop.f32.mrb[40].mxu0  ;;  %v4624_v50 = vpop.f32.mrb[40].mxu1 }
 0x12f   :  { %v2986_v24 = vpop.f32.mrb[41].mxu0  ;;  %v3141_v39 = vpop.f32.mrb[41].mxu1  ;;  %3307 = vmatmul.mubr.msk.f32.gmra.mrb[146].mxu0 %vm67_vm4, %v2529_v10  ;;  %3462 = vmatmul.mubr.msk.f32.gmra.mrb[146].mxu1 %vm67_vm4, %v2628_v25  ;;  %v2630_v10 = vld [vmem:[%s5484_s0 + $0x568] sm:$0xff] }
 0x130   :  { %3309 = vmatprep.mubr.msk.f32.mxu0 %vm3569_vm1, %v3570_v6  ;;  %3464 = vmatprep.mubr.msk.f32.mxu1 %vm3569_vm1, %v3570_v6 }
 0x132   :  { %v4640_v24 = vpop.f32.mrb[42].mxu0  ;;  %v4642_v39 = vpop.f32.mrb[42].mxu1 }
 0x133   :  { %v2989_v25 = vpop.f32.mrb[43].mxu0  ;;  %v3144_v0 = vpop.f32.mrb[43].mxu1  ;;  %3310 = vmatmul.mubr.msk.f32.gmra.mrb[148].mxu0 %vm67_vm4, %v2530_v23  ;;  %3465 = vmatmul.mubr.msk.f32.gmra.mrb[148].mxu1 %vm67_vm4, %v2629_v11  ;;  %v2631_v23 = vld [vmem:[%s5484_s0 + $0x570] sm:$0xff] }
 0x134   :  { %3312 = vmatprep.mubr.msk.f32.mxu0 %vm3569_vm1, %v3570_v6  ;;  %3467 = vmatprep.mubr.msk.f32.mxu1 %vm3569_vm1, %v3570_v6 }
 0x136   :  { %v4658_v25 = vpop.f32.mrb[44].mxu0  ;;  %v4660_v0 = vpop.f32.mrb[44].mxu1 }
 0x137   :  { %v2992_v11 = vpop.f32.mrb[45].mxu0  ;;  %v3147_v32 = vpop.f32.mrb[45].mxu1  ;;  %3313 = vmatmul.mubr.msk.f32.gmra.mrb[150].mxu0 %vm67_vm4, %v2531_v45  ;;  %3468 = vmatmul.mubr.msk.f32.gmra.mrb[150].mxu1 %vm67_vm4, %v2630_v10  ;;  %v2632_v45 = vld [vmem:[%s5484_s0 + $0x578] sm:$0xff] }
 0x138   :  { %3315 = vmatprep.mubr.msk.f32.mxu0 %vm3569_vm1, %v3570_v6  ;;  %3470 = vmatprep.mubr.msk.f32.mxu1 %vm3569_vm1, %v3570_v6 }
 0x13a   :  { %v4676_v11 = vpop.f32.mrb[46].mxu0  ;;  %v4678_v32 = vpop.f32.mrb[46].mxu1 }
 0x13b   :  { %v2995_v10 = vpop.f32.mrb[47].mxu0  ;;  %v3150_v9 = vpop.f32.mrb[47].mxu1  ;;  %3316 = vmatmul.mubr.msk.f32.gmra.mrb[152].mxu0 %vm67_vm4, %v2532_v22  ;;  %3471 = vmatmul.mubr.msk.f32.gmra.mrb[152].mxu1 %vm67_vm4, %v2631_v23  ;;  %v2633_v22 = vld [vmem:[%s5484_s0 + $0x580] sm:$0xff] }
 0x13c   :  { %3318 = vmatprep.mubr.msk.f32.mxu0 %vm3569_vm1, %v3570_v6  ;;  %3473 = vmatprep.mubr.msk.f32.mxu1 %vm3569_vm1, %v3570_v6 }
 0x13e   :  { %v4694_v10 = vpop.f32.mrb[48].mxu0  ;;  %v4696_v9 = vpop.f32.mrb[48].mxu1 }
 0x13f   :  { %5538 = vst [vmem:[#allocation2_spill] sm:$0xff] %v4696_v9  ;;  %v2998_v23 = vpop.f32.mrb[49].mxu0  ;;  %v3153_v49 = vpop.f32.mrb[49].mxu1  ;;  %3319 = vmatmul.mubr.msk.f32.gmra.mrb[154].mxu0 %vm67_vm4, %v2533_v59  ;;  %3474 = vmatmul.mubr.msk.f32.gmra.mrb[154].mxu1 %vm67_vm4, %v2632_v45  ;;  %v2634_v59 = vld [vmem:[%s5484_s0 + $0x588] sm:$0xff] }
 0x140   :  { %3321 = vmatprep.mubr.msk.f32.mxu0 %vm3569_vm1, %v3570_v6  ;;  %3476 = vmatprep.mubr.msk.f32.mxu1 %vm3569_vm1, %v3570_v6 }
 0x142   :  { %v4712_v23 = vpop.f32.mrb[50].mxu0  ;;  %v4714_v49 = vpop.f32.mrb[50].mxu1 }
 0x143   :  { %5539 = vst [vmem:[#allocation3_spill] sm:$0xff] %v4712_v23  ;;  %5540 = vst [vmem:[#allocation4_spill] sm:$0xff] %v4714_v49  ;;  %v3001_v45 = vpop.f32.mrb[51].mxu0  ;;  %v3156_v35 = vpop.f32.mrb[51].mxu1  ;;  %3322 = vmatmul.mubr.msk.f32.gmra.mrb[156].mxu0 %vm67_vm4, %v2534_v42  ;;  %3477 = vmatmul.mubr.msk.f32.gmra.mrb[156].mxu1 %vm67_vm4, %v2633_v22  ;;  %v2635_v42 = vld [vmem:[%s5484_s0 + $0x590] sm:$0xff] }
 0x144   :  { %3324 = vmatprep.mubr.msk.f32.mxu0 %vm3569_vm1, %v3570_v6  ;;  %3479 = vmatprep.mubr.msk.f32.mxu1 %vm3569_vm1, %v3570_v6 }
 0x146   :  { %v4730_v45 = vpop.f32.mrb[52].mxu0  ;;  %v4732_v35 = vpop.f32.mrb[52].mxu1 }
 0x147   :  { %5541 = vst [vmem:[#allocation5_spill] sm:$0xff] %v4730_v45  ;;  %5542 = vst [vmem:[#allocation6_spill] sm:$0xff] %v4732_v35  ;;  %v3004_v22 = vpop.f32.mrb[53].mxu0  ;;  %v3159_v21 = vpop.f32.mrb[53].mxu1  ;;  %3325 = vmatmul.mubr.msk.f32.gmra.mrb[158].mxu0 %vm67_vm4, %v2535_v28  ;;  %3480 = vmatmul.mubr.msk.f32.gmra.mrb[158].mxu1 %vm67_vm4, %v2634_v59  ;;  %v2636_v28 = vld [vmem:[%s5484_s0 + $0x598] sm:$0xff] }
 0x148   :  { %3327 = vmatprep.mubr.msk.f32.mxu0 %vm3569_vm1, %v3570_v6  ;;  %3482 = vmatprep.mubr.msk.f32.mxu1 %vm3569_vm1, %v3570_v6 }
 0x14a   :  { %v4748_v22 = vpop.f32.mrb[54].mxu0  ;;  %v4750_v21 = vpop.f32.mrb[54].mxu1 }
 0x14b   :  { %5543 = vst [vmem:[#allocation7_spill] sm:$0xff] %v4748_v22  ;;  %5544 = vst [vmem:[#allocation8_spill] sm:$0xff] %v4750_v21  ;;  %v3007_v59 = vpop.f32.mrb[55].mxu0  ;;  %v3162_v7 = vpop.f32.mrb[55].mxu1  ;;  %3328 = vmatmul.mubr.msk.f32.gmra.mrb[160].mxu0 %vm67_vm4, %v2536_v14  ;;  %3483 = vmatmul.mubr.msk.f32.gmra.mrb[160].mxu1 %vm67_vm4, %v2635_v42  ;;  %v2538_v21 = vld [vmem:[%s5484_s0 + $0x418] sm:$0xff]  ;;  %v2637_v14 = vld [vmem:[%s5484_s0 + $0x5a0] sm:$0xff] }
 0x14c   :  { %3330 = vmatprep.mubr.msk.f32.mxu0 %vm3569_vm1, %v3570_v6  ;;  %3485 = vmatprep.mubr.msk.f32.mxu1 %vm3569_vm1, %v3570_v6 }
 0x14e   :  { %v4766_v59 = vpop.f32.mrb[56].mxu0  ;;  %v4768_v7 = vpop.f32.mrb[56].mxu1 }
 0x14f   :  { %5545 = vst [vmem:[#allocation9_spill] sm:$0xff] %v4766_v59  ;;  %5546 = vst [vmem:[#allocation10_spill] sm:$0xff] %v4768_v7  ;;  %v3010_v42 = vpop.f32.mrb[57].mxu0  ;;  %v3165_v56 = vpop.f32.mrb[57].mxu1  ;;  %3331 = vmatmul.mubr.msk.f32.gmra.mrb[162].mxu0 %vm67_vm4, %v2537_v63  ;;  %3486 = vmatmul.mubr.msk.f32.gmra.mrb[162].mxu1 %vm67_vm4, %v2636_v28  ;;  %v2539_v59 = vld [vmem:[%s5484_s0 + $0x420] sm:$0xff]  ;;  %v2638_v63 = vld [vmem:[%s5484_s0 + $0x5a8] sm:$0xff] }
 0x150   :  { %3333 = vmatprep.mubr.msk.f32.mxu0 %vm3569_vm1, %v3570_v6  ;;  %3488 = vmatprep.mubr.msk.f32.mxu1 %vm3569_vm1, %v3570_v6 }
 0x152   :  { %v4784_v42 = vpop.f32.mrb[58].mxu0  ;;  %v4786_v56 = vpop.f32.mrb[58].mxu1 }
 0x153   :  { %5547 = vst [vmem:[#allocation11_spill] sm:$0xff] %v4784_v42  ;;  %5548 = vst [vmem:[#allocation12_spill] sm:$0xff] %v4786_v56  ;;  %v3013_v28 = vpop.f32.mrb[59].mxu0  ;;  %v3168_v7 = vpop.f32.mrb[59].mxu1  ;;  %3334 = vmatmul.mubr.msk.f32.gmra.mrb[164].mxu0 %vm67_vm4, %v2538_v21  ;;  %3489 = vmatmul.mubr.msk.f32.gmra.mrb[164].mxu1 %vm67_vm4, %v2637_v14  ;;  %v2540_v42 = vld [vmem:[%s5484_s0 + $0x428] sm:$0xff]  ;;  %v2639_v21 = vld [vmem:[%s5484_s0 + $0x5b0] sm:$0xff] }
 0x154   :  { %3336 = vmatprep.mubr.msk.f32.mxu0 %vm3569_vm1, %v3570_v6  ;;  %3491 = vmatprep.mubr.msk.f32.mxu1 %vm3569_vm1, %v3570_v6 }
 0x156   :  { %v4802_v28 = vpop.f32.mrb[60].mxu0  ;;  %v4804_v7 = vpop.f32.mrb[60].mxu1 }
 0x157   :  { %5549 = vst [vmem:[#allocation13_spill] sm:$0xff] %v4802_v28  ;;  %5550 = vst [vmem:[#allocation14_spill] sm:$0xff] %v4804_v7  ;;  %v3016_v14 = vpop.f32.mrb[61].mxu0  ;;  %v3171_v56 = vpop.f32.mrb[61].mxu1  ;;  %3337 = vmatmul.mubr.msk.f32.gmra.mrb[166].mxu0 %vm67_vm4, %v2539_v59  ;;  %3492 = vmatmul.mubr.msk.f32.gmra.mrb[166].mxu1 %vm67_vm4, %v2638_v63  ;;  %v2541_v28 = vld [vmem:[%s5484_s0 + $0x430] sm:$0xff]  ;;  %v2640_v59 = vld [vmem:[%s5484_s0 + $0x5b8] sm:$0xff] }
 0x158   :  { %3339 = vmatprep.mubr.msk.f32.mxu0 %vm3569_vm1, %v3570_v6  ;;  %3494 = vmatprep.mubr.msk.f32.mxu1 %vm3569_vm1, %v3570_v6 }
 0x15a   :  { %v4820_v14 = vpop.f32.mrb[62].mxu0  ;;  %v4822_v56 = vpop.f32.mrb[62].mxu1 }
 0x15b   :  { %5551 = vst [vmem:[#allocation15_spill] sm:$0xff] %v4820_v14  ;;  %5552 = vst [vmem:[#allocation16_spill] sm:$0xff] %v4822_v56  ;;  %v3019_v63 = vpop.f32.mrb[63].mxu0  ;;  %v3174_v7 = vpop.f32.mrb[63].mxu1  ;;  %3340 = vmatmul.mubr.msk.f32.gmra.mrb[168].mxu0 %vm67_vm4, %v2540_v42  ;;  %3495 = vmatmul.mubr.msk.f32.gmra.mrb[168].mxu1 %vm67_vm4, %v2639_v21  ;;  %v2542_v14 = vld [vmem:[%s5484_s0 + $0x438] sm:$0xff]  ;;  %v2641_v42 = vld [vmem:[%s5484_s0 + $0x5c0] sm:$0xff] }
 0x15c   :  { %3342 = vmatprep.mubr.msk.f32.mxu0 %vm3569_vm1, %v3570_v6  ;;  %3497 = vmatprep.mubr.msk.f32.mxu1 %vm3569_vm1, %v3570_v6 }
 0x15e   :  { %v4838_v63 = vpop.f32.mrb[64].mxu0  ;;  %v4840_v7 = vpop.f32.mrb[64].mxu1 }
 0x15f   :  { %5553 = vst [vmem:[#allocation17_spill] sm:$0xff] %v4838_v63  ;;  %5554 = vst [vmem:[#allocation18_spill] sm:$0xff] %v4840_v7  ;;  %v3022_v21 = vpop.f32.mrb[65].mxu0  ;;  %v3177_v56 = vpop.f32.mrb[65].mxu1  ;;  %3343 = vmatmul.mubr.msk.f32.gmra.mrb[170].mxu0 %vm67_vm4, %v2541_v28  ;;  %3498 = vmatmul.mubr.msk.f32.gmra.mrb[170].mxu1 %vm67_vm4, %v2640_v59  ;;  %v2543_v63 = vld [vmem:[%s5484_s0 + $0x440] sm:$0xff]  ;;  %v2642_v28 = vld [vmem:[%s5484_s0 + $0x5c8] sm:$0xff] }
 0x160   :  { %3345 = vmatprep.mubr.msk.f32.mxu0 %vm3569_vm1, %v3570_v6  ;;  %3500 = vmatprep.mubr.msk.f32.mxu1 %vm3569_vm1, %v3570_v6 }
 0x162   :  { %v4856_v21 = vpop.f32.mrb[66].mxu0  ;;  %v4858_v56 = vpop.f32.mrb[66].mxu1 }
 0x163   :  { %5555 = vst [vmem:[#allocation19_spill] sm:$0xff] %v4856_v21  ;;  %5556 = vst [vmem:[#allocation20_spill] sm:$0xff] %v4858_v56  ;;  %v3025_v59 = vpop.f32.mrb[67].mxu0  ;;  %v3180_v7 = vpop.f32.mrb[67].mxu1  ;;  %3346 = vmatmul.mubr.msk.f32.gmra.mrb[172].mxu0 %vm67_vm4, %v2542_v14  ;;  %3501 = vmatmul.mubr.msk.f32.gmra.mrb[172].mxu1 %vm67_vm4, %v2641_v42  ;;  %v2544_v21 = vld [vmem:[%s5484_s0 + $0x448] sm:$0xff]  ;;  %v2643_v14 = vld [vmem:[%s5484_s0 + $0x5d0] sm:$0xff] }
 0x164   :  { %3348 = vmatprep.mubr.msk.f32.mxu0 %vm3569_vm1, %v3570_v6  ;;  %3503 = vmatprep.mubr.msk.f32.mxu1 %vm3569_vm1, %v3570_v6 }
 0x166   :  { %v4874_v59 = vpop.f32.mrb[68].mxu0  ;;  %v4876_v7 = vpop.f32.mrb[68].mxu1 }
 0x167   :  { %5557 = vst [vmem:[#allocation21_spill] sm:$0xff] %v4874_v59  ;;  %5558 = vst [vmem:[#allocation22_spill] sm:$0xff] %v4876_v7  ;;  %v3028_v42 = vpop.f32.mrb[69].mxu0  ;;  %v3183_v56 = vpop.f32.mrb[69].mxu1  ;;  %3349 = vmatmul.mubr.msk.f32.gmra.mrb[174].mxu0 %vm67_vm4, %v2543_v63  ;;  %3504 = vmatmul.mubr.msk.f32.gmra.mrb[174].mxu1 %vm67_vm4, %v2642_v28  ;;  %v2545_v59 = vld [vmem:[%s5484_s0 + $0x450] sm:$0xff]  ;;  %v2644_v63 = vld [vmem:[%s5484_s0 + $0x5d8] sm:$0xff] }
 0x168   :  { %3351 = vmatprep.mubr.msk.f32.mxu0 %vm3569_vm1, %v3570_v6  ;;  %3506 = vmatprep.mubr.msk.f32.mxu1 %vm3569_vm1, %v3570_v6 }
 0x16a   :  { %v4892_v42 = vpop.f32.mrb[70].mxu0  ;;  %v4894_v56 = vpop.f32.mrb[70].mxu1 }
 0x16b   :  { %5559 = vst [vmem:[#allocation23_spill] sm:$0xff] %v4892_v42  ;;  %5560 = vst [vmem:[#allocation24_spill] sm:$0xff] %v4894_v56  ;;  %v3031_v28 = vpop.f32.mrb[71].mxu0  ;;  %v3186_v7 = vpop.f32.mrb[71].mxu1  ;;  %3352 = vmatmul.mubr.msk.f32.gmra.mrb[176].mxu0 %vm67_vm4, %v2544_v21  ;;  %3507 = vmatmul.mubr.msk.f32.gmra.mrb[176].mxu1 %vm67_vm4, %v2643_v14  ;;  %v2546_v42 = vld [vmem:[%s5484_s0 + $0x458] sm:$0xff]  ;;  %v2645_v21 = vld [vmem:[%s5484_s0 + $0x5e0] sm:$0xff] }
 0x16c   :  { %3354 = vmatprep.mubr.msk.f32.mxu0 %vm3569_vm1, %v3570_v6  ;;  %3509 = vmatprep.mubr.msk.f32.mxu1 %vm3569_vm1, %v3570_v6 }
 0x16e   :  { %v4910_v28 = vpop.f32.mrb[72].mxu0  ;;  %v4912_v7 = vpop.f32.mrb[72].mxu1 }
 0x16f   :  { %5561 = vst [vmem:[#allocation25_spill] sm:$0xff] %v4910_v28  ;;  %5562 = vst [vmem:[#allocation26_spill] sm:$0xff] %v4912_v7  ;;  %v3034_v14 = vpop.f32.mrb[73].mxu0  ;;  %v3189_v56 = vpop.f32.mrb[73].mxu1  ;;  %3355 = vmatmul.mubr.msk.f32.gmra.mrb[178].mxu0 %vm67_vm4, %v2545_v59  ;;  %3510 = vmatmul.mubr.msk.f32.gmra.mrb[178].mxu1 %vm67_vm4, %v2644_v63  ;;  %v2547_v28 = vld [vmem:[%s5484_s0 + $0x460] sm:$0xff]  ;;  %v2646_v59 = vld [vmem:[%s5484_s0 + $0x5e8] sm:$0xff] }
 0x170   :  { %3357 = vmatprep.mubr.msk.f32.mxu0 %vm3569_vm1, %v3570_v6  ;;  %3512 = vmatprep.mubr.msk.f32.mxu1 %vm3569_vm1, %v3570_v6 }
 0x172   :  { %v4928_v14 = vpop.f32.mrb[74].mxu0  ;;  %v4930_v56 = vpop.f32.mrb[74].mxu1 }
 0x173   :  { %5563 = vst [vmem:[#allocation27_spill] sm:$0xff] %v4928_v14  ;;  %5564 = vst [vmem:[#allocation28_spill] sm:$0xff] %v4930_v56  ;;  %v3037_v63 = vpop.f32.mrb[75].mxu0  ;;  %v3192_v7 = vpop.f32.mrb[75].mxu1  ;;  %3358 = vmatmul.mubr.msk.f32.gmra.mrb[180].mxu0 %vm67_vm4, %v2546_v42  ;;  %3513 = vmatmul.mubr.msk.f32.gmra.mrb[180].mxu1 %vm67_vm4, %v2645_v21  ;;  %v2548_v14 = vld [vmem:[%s5484_s0 + $0x468] sm:$0xff]  ;;  %v2647_v42 = vld [vmem:[%s5484_s0 + $0x5f0] sm:$0xff] }
 0x174   :  { %3360 = vmatprep.mubr.msk.f32.mxu0 %vm3569_vm1, %v3570_v6  ;;  %3515 = vmatprep.mubr.msk.f32.mxu1 %vm3569_vm1, %v3570_v6 }
 0x176   :  { %v4946_v63 = vpop.f32.mrb[76].mxu0  ;;  %v4948_v7 = vpop.f32.mrb[76].mxu1 }
 0x177   :  { %5565 = vst [vmem:[#allocation29_spill] sm:$0xff] %v4946_v63  ;;  %5566 = vst [vmem:[#allocation30_spill] sm:$0xff] %v4948_v7  ;;  %v3040_v21 = vpop.f32.mrb[77].mxu0  ;;  %v3195_v56 = vpop.f32.mrb[77].mxu1  ;;  %3361 = vmatmul.mubr.msk.f32.gmra.mrb[182].mxu0 %vm67_vm4, %v2547_v28  ;;  %3516 = vmatmul.mubr.msk.f32.gmra.mrb[182].mxu1 %vm67_vm4, %v2646_v59  ;;  %v2549_v63 = vld [vmem:[%s5484_s0 + $0x470] sm:$0xff]  ;;  %v2648_v28 = vld [vmem:[%s5484_s0 + $0x5f8] sm:$0xff] }
 0x178   :  { %3363 = vmatprep.mubr.msk.f32.mxu0 %vm3569_vm1, %v3570_v6  ;;  %3518 = vmatprep.mubr.msk.f32.mxu1 %vm3569_vm1, %v3570_v6 }
 0x17a   :  { %v4964_v21 = vpop.f32.mrb[78].mxu0  ;;  %v4966_v56 = vpop.f32.mrb[78].mxu1 }
 0x17b   :  { %5567 = vst [vmem:[#allocation31_spill] sm:$0xff] %v4964_v21  ;;  %5568 = vst [vmem:[#allocation32_spill] sm:$0xff] %v4966_v56  ;;  %v3043_v59 = vpop.f32.mrb[79].mxu0  ;;  %v3198_v7 = vpop.f32.mrb[79].mxu1  ;;  %3364 = vmatmul.mubr.msk.f32.gmra.mrb[184].mxu0 %vm67_vm4, %v2548_v14  ;;  %3519 = vmatmul.mubr.msk.f32.gmra.mrb[184].mxu1 %vm67_vm4, %v2647_v42  ;;  %v2550_v21 = vld [vmem:[%s5484_s0 + $0x478] sm:$0xff]  ;;  %v2649_v14 = vld [vmem:[%s5484_s0 + $0x600] sm:$0xff] }
 0x17c   :  { %3366 = vmatprep.mubr.msk.f32.mxu0 %vm3569_vm1, %v3570_v6  ;;  %3521 = vmatprep.mubr.msk.f32.mxu1 %vm3569_vm1, %v3570_v6 }
 0x17e   :  { %v4982_v59 = vpop.f32.mrb[80].mxu0  ;;  %v4984_v7 = vpop.f32.mrb[80].mxu1 }
 0x17f   :  { %5569 = vst [vmem:[#allocation33_spill] sm:$0xff] %v4982_v59  ;;  %5570 = vst [vmem:[#allocation34_spill] sm:$0xff] %v4984_v7  ;;  %v3046_v42 = vpop.f32.mrb[81].mxu0  ;;  %v3201_v56 = vpop.f32.mrb[81].mxu1  ;;  %3367 = vmatmul.mubr.msk.f32.gmra.mrb[186].mxu0 %vm67_vm4, %v2549_v63  ;;  %3522 = vmatmul.mubr.msk.f32.gmra.mrb[186].mxu1 %vm67_vm4, %v2648_v28  ;;  %v2551_v59 = vld [vmem:[%s5484_s0 + $0x480] sm:$0xff]  ;;  %v2650_v63 = vld [vmem:[%s5484_s0 + $0x608] sm:$0xff] }
 0x180   :  { %3369 = vmatprep.mubr.msk.f32.mxu0 %vm3569_vm1, %v3570_v6  ;;  %3524 = vmatprep.mubr.msk.f32.mxu1 %vm3569_vm1, %v3570_v6 }
 0x182   :  { %v5000_v42 = vpop.f32.mrb[82].mxu0  ;;  %v5002_v56 = vpop.f32.mrb[82].mxu1 }
 0x183   :  { %5571 = vst [vmem:[#allocation35_spill] sm:$0xff] %v5000_v42  ;;  %5572 = vst [vmem:[#allocation36_spill] sm:$0xff] %v5002_v56  ;;  %v3049_v28 = vpop.f32.mrb[83].mxu0  ;;  %v3204_v7 = vpop.f32.mrb[83].mxu1  ;;  %3370 = vmatmul.mubr.msk.f32.gmra.mrb[188].mxu0 %vm67_vm4, %v2550_v21  ;;  %3525 = vmatmul.mubr.msk.f32.gmra.mrb[188].mxu1 %vm67_vm4, %v2649_v14  ;;  %v2552_v42 = vld [vmem:[%s5484_s0 + $0x488] sm:$0xff]  ;;  %v2651_v21 = vld [vmem:[%s5484_s0 + $0x610] sm:$0xff] }
 0x184   :  { %3372 = vmatprep.mubr.msk.f32.mxu0 %vm3569_vm1, %v3570_v6  ;;  %3527 = vmatprep.mubr.msk.f32.mxu1 %vm3569_vm1, %v3570_v6 }
 0x186   :  { %v5018_v28 = vpop.f32.mrb[84].mxu0  ;;  %v5020_v7 = vpop.f32.mrb[84].mxu1 }
 0x187   :  { %5573 = vst [vmem:[#allocation37_spill] sm:$0xff] %v5018_v28  ;;  %5574 = vst [vmem:[#allocation38_spill] sm:$0xff] %v5020_v7  ;;  %v3052_v14 = vpop.f32.mrb[85].mxu0  ;;  %v3207_v56 = vpop.f32.mrb[85].mxu1  ;;  %3373 = vmatmul.mubr.msk.f32.gmra.mrb[190].mxu0 %vm67_vm4, %v2551_v59  ;;  %3528 = vmatmul.mubr.msk.f32.gmra.mrb[190].mxu1 %vm67_vm4, %v2650_v63  ;;  %v2553_v28 = vld [vmem:[%s5484_s0 + $0x490] sm:$0xff]  ;;  %v2652_v59 = vld [vmem:[%s5484_s0 + $0x618] sm:$0xff] }
 0x188   :  { %3375 = vmatprep.mubr.msk.f32.mxu0 %vm3569_vm1, %v3570_v6  ;;  %3530 = vmatprep.mubr.msk.f32.mxu1 %vm3569_vm1, %v3570_v6 }
 0x18a   :  { %v5036_v14 = vpop.f32.mrb[86].mxu0  ;;  %v5038_v56 = vpop.f32.mrb[86].mxu1 }
 0x18b   :  { %5575 = vst [vmem:[#allocation39_spill] sm:$0xff] %v5036_v14  ;;  %5576 = vst [vmem:[#allocation40_spill] sm:$0xff] %v5038_v56  ;;  %v3055_v63 = vpop.f32.mrb[87].mxu0  ;;  %v3210_v7 = vpop.f32.mrb[87].mxu1  ;;  %3376 = vmatmul.mubr.msk.f32.gmra.mrb[192].mxu0 %vm67_vm4, %v2552_v42  ;;  %3531 = vmatmul.mubr.msk.f32.gmra.mrb[192].mxu1 %vm67_vm4, %v2651_v21 }
 0x18c   :  { %3378 = vmatprep.mubr.msk.f32.mxu0 %vm3569_vm1, %v3570_v6  ;;  %3533 = vmatprep.mubr.msk.f32.mxu1 %vm3569_vm1, %v3570_v6 }
 0x18e   :  { %v5054_v63 = vpop.f32.mrb[88].mxu0  ;;  %v5056_v7 = vpop.f32.mrb[88].mxu1 }
 0x18f   :  { %5577 = vst [vmem:[#allocation41_spill] sm:$0xff] %v5054_v63  ;;  %5578 = vst [vmem:[#allocation42_spill] sm:$0xff] %v5056_v7  ;;  %v3058_v21 = vpop.f32.mrb[89].mxu0  ;;  %v3213_v56 = vpop.f32.mrb[89].mxu1  ;;  %3379 = vmatmul.mubr.msk.f32.gmra.mrb[194].mxu0 %vm67_vm4, %v2553_v28  ;;  %3534 = vmatmul.mubr.msk.f32.gmra.mrb[194].mxu1 %vm67_vm4, %v2652_v59  ;;  %v5089_v7 = vld [vmem:[%s5485_s2] ss:$0 sm:$0xff] }
 0x192   :  { %v5062_v6 = vpop.f32.mrb[90].mxu0  ;;  %v5064_v14 = vpop.f32.mrb[90].mxu1 }
 0x193   :  { %5579 = vst [vmem:[#allocation43_spill] sm:$0xff] %v5062_v6  ;;  %5580 = vst [vmem:[#allocation44_spill] sm:$0xff] %v5064_v14  ;;  %v3061_v35 = vpop.f32.mrb[91].mxu0  ;;  %v3216_v45 = vpop.f32.mrb[91].mxu1 }
 0x196   :  { %v5068_v49 = vpop.f32.mrb[92].mxu0  ;;  %v5070_v23 = vpop.f32.mrb[92].mxu1 }
 0x197   :  { %5581 = vst [vmem:[#allocation45_spill] sm:$0xff] %v5068_v49  ;;  %5582 = vst [vmem:[#allocation46_spill] sm:$0xff] %v5070_v23  ;;  %v3064_v21 = vpop.f32.mrb[93].mxu0  ;;  %v3219_v28 = vpop.f32.mrb[93].mxu1 }
 0x19a   :  { %v5074_v42 = vpop.f32.mrb[94].mxu0  ;;  %v5076_v59 = vpop.f32.mrb[94].mxu1 }
 0x19b   :  { %5583 = vst [vmem:[#allocation47_spill] sm:$0xff] %v5074_v42  ;;  %5584 = vst [vmem:[#allocation48_spill] sm:$0xff] %v5076_v59  ;;  %v3067_v63 = vpop.f32.mrb[95].mxu0  ;;  %v3222_v22 = vpop.f32.mrb[95].mxu1 }
 0x19c   :  { %v5587_v22 = vmax.f32 %v4262_v54, %v4264_v55 }
 0x19e   :  { %v5080_v35 = vpop.f32.mrb[96].mxu0  ;;  %v5082_v45 = vpop.f32.mrb[96].mxu1 }
 0x19f   :  { %5585 = vst [vmem:[#allocation49_spill] sm:$0xff] %v5080_v35  ;;  %5586 = vst [vmem:[#allocation50_spill] sm:$0xff] %v5082_v45  ;;  %v3070_v6 = vpop.f32.mrb[97].mxu0  ;;  %v3225_v56 = vpop.f32.mrb[97].mxu1 }
 0x1a2   :  { %v1299_v21 = vpop.f32.mrb[98].mxu0  ;;  %v1806_v28 = vpop.f32.mrb[98].mxu1 }
 0x1a3   :  { %v2099_v23 = vmax.f32 %v1299_v21, %v1806_v28  ;;  %v3236_v49 = vpop.f32.mrb[99].mxu0  ;;  %v3391_v9 = vpop.f32.mrb[99].mxu1 }
 0x1a4   :  { %v5588_v9 = vmax.f32 %v4280_v61, %v4282_v62 }
 0x1a5   :  { %v2148_v63 = vmax.f32 %v5587_v22, %v2099_v23 }
 0x1a6   :  { %v1304_v59 = vpop.f32.mrb[100].mxu0  ;;  %v1811_v42 = vpop.f32.mrb[100].mxu1 }
 0x1a7   :  { %v2204_v14 = vadd.f32 %v5089_v7, %v2148_v63  ;;  %v2100_v6 = vmax.f32 %v1304_v59, %v1811_v42  ;;  %v3239_v56 = vpop.f32.mrb[101].mxu0  ;;  %v3394_v45 = vpop.f32.mrb[101].mxu1 }
 0x1a9   :  { %v2253_v21 = vmax.f32 %v2204_v14, 0.0  ;;  %v2149_v49 = vmax.f32 %v5588_v9, %v2100_v6  ;;  %v5589_v14 = vmax.f32 %v4298_v4, %v4300_v5 }
 0x1aa   :  { %v1309_v28 = vpop.f32.mrb[102].mxu0  ;;  %v1816_v35 = vpop.f32.mrb[102].mxu1 }
 0x1ab   :  { %2303 = vst.msk [vmem:[%s5486_s3] sm:$0xff] %vm2302_vm5, %v2253_v21  ;;  %v2205_v54 = vadd.f32 %v5089_v7, %v2149_v49  ;;  %v2101_v55 = vmax.f32 %v1309_v28, %v1816_v35  ;;  %v3242_v23 = vpop.f32.mrb[103].mxu0  ;;  %v3397_v42 = vpop.f32.mrb[103].mxu1  ;;  %v5590_v21 = vmax.f32 %v4316_v12, %v4318_v13 }
 0x1ac   :  { %v5591_v42 = vmax.f32 %v4334_v19, %v4336_v20 }
 0x1ad   :  { %v2254_v59 = vmax.f32 %v2205_v54, 0.0  ;;  %v2150_v45 = vmax.f32 %v5589_v14, %v2101_v55 }
 0x1ae   :  { %v1314_v22 = vpop.f32.mrb[104].mxu0  ;;  %v1821_v61 = vpop.f32.mrb[104].mxu1 }
 0x1af   :  { %2304 = vst.msk [vmem:[%s5486_s3 + $0x8] sm:$0xff] %vm2302_vm5, %v2254_v59  ;;  %v2206_v62 = vadd.f32 %v5089_v7, %v2150_v45  ;;  %v2102_v63 = vmax.f32 %v1314_v22, %v1821_v61  ;;  %v3245_v6 = vpop.f32.mrb[105].mxu0  ;;  %v3400_v56 = vpop.f32.mrb[105].mxu1 }
 0x1b1   :  { %v2255_v35 = vmax.f32 %v2206_v62, 0.0  ;;  %v2151_v9 = vmax.f32 %v5590_v21, %v2102_v63  ;;  %v5592_v63 = vmax.f32 %v4352_v26, %v4354_v27 }
 0x1b2   :  { %v1319_v49 = vpop.f32.mrb[106].mxu0  ;;  %v1826_v4 = vpop.f32.mrb[106].mxu1 }
 0x1b3   :  { %2305 = vst.msk [vmem:[%s5486_s3 + $0x10] sm:$0xff] %vm2302_vm5, %v2255_v35  ;;  %v2207_v5 = vadd.f32 %v5089_v7, %v2151_v9  ;;  %v2103_v28 = vmax.f32 %v1319_v49, %v1826_v4  ;;  %v3248_v54 = vpop.f32.mrb[107].mxu0  ;;  %v3403_v55 = vpop.f32.mrb[107].mxu1  ;;  %v5593_v4 = vmax.f32 %v4370_v33, %v4372_v34 }
 0x1b5   :  { %v2256_v23 = vmax.f32 %v2207_v5, 0.0  ;;  %v2152_v59 = vmax.f32 %v5591_v42, %v2103_v28 }
 0x1b6   :  { %v1324_v14 = vpop.f32.mrb[108].mxu0  ;;  %v1831_v12 = vpop.f32.mrb[108].mxu1 }
 0x1b7   :  { %2306 = vst.msk [vmem:[%s5486_s3 + $0x18] sm:$0xff] %vm2302_vm5, %v2256_v23  ;;  %v2208_v13 = vadd.f32 %v5089_v7, %v2152_v59  ;;  %v2104_v45 = vmax.f32 %v1324_v14, %v1831_v12  ;;  %v3251_v22 = vpop.f32.mrb[109].mxu0  ;;  %v3406_v61 = vpop.f32.mrb[109].mxu1  ;;  %v5594_v59 = vmax.f32 %v4388_v40, %v4390_v41 }
 0x1b9   :  { %v2257_v62 = vmax.f32 %v2208_v13, 0.0  ;;  %v2153_v6 = vmax.f32 %v5592_v63, %v2104_v45 }
 0x1ba   :  { %v1329_v56 = vpop.f32.mrb[110].mxu0  ;;  %v1836_v19 = vpop.f32.mrb[110].mxu1 }
 0x1bb   :  { %2307 = vst.msk [vmem:[%s5486_s3 + $0x20] sm:$0xff] %vm2302_vm5, %v2257_v62  ;;  %v2209_v20 = vadd.f32 %v5089_v7, %v2153_v6  ;;  %v2105_v35 = vmax.f32 %v1329_v56, %v1836_v19  ;;  %v3254_v21 = vpop.f32.mrb[111].mxu0  ;;  %v3409_v9 = vpop.f32.mrb[111].mxu1  ;;  %v5595_v62 = vmax.f32 %v4406_v47, %v4408_v48 }
 0x1bc   :  { %v5596_v21 = vmax.f32 %v4424_v57, %v4426_v58 }
 0x1bd   :  { %v2258_v49 = vmax.f32 %v2209_v20, 0.0  ;;  %v2154_v5 = vmax.f32 %v5593_v4, %v2105_v35 }
 0x1be   :  { %v1334_v28 = vpop.f32.mrb[112].mxu0  ;;  %v1841_v26 = vpop.f32.mrb[112].mxu1 }
 0x1bf   :  { %2308 = vst.msk [vmem:[%s5486_s3 + $0x28] sm:$0xff] %vm2302_vm5, %v2258_v49  ;;  %v2210_v27 = vadd.f32 %v5089_v7, %v2154_v5  ;;  %v2106_v54 = vmax.f32 %v1334_v28, %v1841_v26  ;;  %v3257_v55 = vpop.f32.mrb[113].mxu0  ;;  %v3412_v23 = vpop.f32.mrb[113].mxu1 }
 0x1c1   :  { %v2259_v42 = vmax.f32 %v2210_v27, 0.0  ;;  %v2155_v14 = vmax.f32 %v5594_v59, %v2106_v54  ;;  %v5597_v27 = vmax.f32 %v4442_v3, %v4444_v8 }
 0x1c2   :  { %v1339_v12 = vpop.f32.mrb[114].mxu0  ;;  %v1846_v33 = vpop.f32.mrb[114].mxu1 }
 0x1c3   :  { %2309 = vst.msk [vmem:[%s5486_s3 + $0x30] sm:$0xff] %vm2302_vm5, %v2259_v42  ;;  %v2211_v34 = vadd.f32 %v5089_v7, %v2155_v14  ;;  %v2107_v13 = vmax.f32 %v1339_v12, %v1846_v33  ;;  %v3260_v45 = vpop.f32.mrb[115].mxu0  ;;  %v3415_v22 = vpop.f32.mrb[115].mxu1  ;;  %v5598_v12 = vmax.f32 %v4460_v17, %v4462_v18 }
 0x1c5   :  { %v2260_v61 = vmax.f32 %v2211_v34, 0.0  ;;  %v2156_v63 = vmax.f32 %v5595_v62, %v2107_v13  ;;  %v5599_v62 = vmax.f32 %v4478_v30, %v4480_v31 }
 0x1c6   :  { %v1344_v6 = vpop.f32.mrb[116].mxu0  ;;  %v1851_v40 = vpop.f32.mrb[116].mxu1 }
 0x1c7   :  { %2310 = vst.msk [vmem:[%s5486_s3 + $0x38] sm:$0xff] %vm2302_vm5, %v2260_v61  ;;  %v2212_v41 = vadd.f32 %v5089_v7, %v2156_v63  ;;  %v2108_v56 = vmax.f32 %v1344_v6, %v1851_v40  ;;  %v3263_v19 = vpop.f32.mrb[117].mxu0  ;;  %v3418_v20 = vpop.f32.mrb[117].mxu1 }
 0x1c8   :  { %v5600_v20 = vmax.f32 %v4496_v43, %v4498_v44 }
 0x1c9   :  { %v2261_v35 = vmax.f32 %v2212_v41, 0.0  ;;  %v2157_v9 = vmax.f32 %v5596_v21, %v2108_v56 }
 0x1ca   :  { %v1349_v49 = vpop.f32.mrb[118].mxu0  ;;  %v1856_v47 = vpop.f32.mrb[118].mxu1 }
 0x1cb   :  { %2311 = vst.msk [vmem:[%s5486_s3 + $0x40] sm:$0xff] %vm2302_vm5, %v2261_v35  ;;  %v2213_v48 = vadd.f32 %v5089_v7, %v2157_v9  ;;  %v2109_v4 = vmax.f32 %v1349_v49, %v1856_v47  ;;  %v3266_v5 = vpop.f32.mrb[119].mxu0  ;;  %v3421_v28 = vpop.f32.mrb[119].mxu1 }
 0x1cd   :  { %v2262_v26 = vmax.f32 %v2213_v48, 0.0  ;;  %v2158_v54 = vmax.f32 %v5597_v27, %v2109_v4  ;;  %v5601_v4 = vmax.f32 %v4514_v53, %v4516_v60 }
 0x1ce   :  { %v1354_v55 = vpop.f32.mrb[120].mxu0  ;;  %v1861_v57 = vpop.f32.mrb[120].mxu1 }
 0x1cf   :  { %2312 = vst.msk [vmem:[%s5486_s3 + $0x48] sm:$0xff] %vm2302_vm5, %v2262_v26  ;;  %v2214_v58 = vadd.f32 %v5089_v7, %v2158_v54  ;;  %v2110_v23 = vmax.f32 %v1354_v55, %v1861_v57  ;;  %v3269_v42 = vpop.f32.mrb[121].mxu0  ;;  %v3424_v59 = vpop.f32.mrb[121].mxu1  ;;  %v5602_v57 = vmax.f32 %v4532_v15, %v4534_v16 }
 0x1d1   :  { %v2263_v14 = vmax.f32 %v2214_v58, 0.0  ;;  %v2159_v33 = vmax.f32 %v5598_v12, %v2110_v23 }
 0x1d2   :  { %v1359_v34 = vpop.f32.mrb[122].mxu0  ;;  %v1866_v3 = vpop.f32.mrb[122].mxu1 }
 0x1d3   :  { %2313 = vst.msk [vmem:[%s5486_s3 + $0x50] sm:$0xff] %vm2302_vm5, %v2263_v14  ;;  %v2215_v8 = vadd.f32 %v5089_v7, %v2159_v33  ;;  %v2111_v13 = vmax.f32 %v1359_v34, %v1866_v3  ;;  %v3272_v45 = vpop.f32.mrb[123].mxu0  ;;  %v3427_v22 = vpop.f32.mrb[123].mxu1  ;;  %v5603_v33 = vmax.f32 %v4550_v37, %v4552_v38 }
 0x1d5   :  { %v2264_v61 = vmax.f32 %v2215_v8, 0.0  ;;  %v2160_v63 = vmax.f32 %v5599_v62, %v2111_v13 }
 0x1d6   :  { %v1364_v6 = vpop.f32.mrb[124].mxu0  ;;  %v1871_v17 = vpop.f32.mrb[124].mxu1 }
 0x1d7   :  { %2314 = vst.msk [vmem:[%s5486_s3 + $0x58] sm:$0xff] %vm2302_vm5, %v2264_v61  ;;  %v2216_v18 = vadd.f32 %v5089_v7, %v2160_v63  ;;  %v2112_v40 = vmax.f32 %v1364_v6, %v1871_v17  ;;  %v3275_v41 = vpop.f32.mrb[125].mxu0  ;;  %v3430_v56 = vpop.f32.mrb[125].mxu1  ;;  %v5604_v61 = vmax.f32 %v4568_v1, %v4570_v2 }
 0x1d8   :  { %v5605_v41 = vmax.f32 %v4586_v36, %v4588_v46 }
 0x1d9   :  { %v2265_v19 = vmax.f32 %v2216_v18, 0.0  ;;  %v2161_v35 = vmax.f32 %v5600_v20, %v2112_v40 }
 0x1da   :  { %v1369_v21 = vpop.f32.mrb[126].mxu0  ;;  %v1876_v30 = vpop.f32.mrb[126].mxu1 }
 0x1db   :  { %2315 = vst.msk [vmem:[%s5486_s3 + $0x60] sm:$0xff] %vm2302_vm5, %v2265_v19  ;;  %v2217_v31 = vadd.f32 %v5089_v7, %v2161_v35  ;;  %v2113_v9 = vmax.f32 %v1369_v21, %v1876_v30  ;;  %v3278_v49 = vpop.f32.mrb[127].mxu0  ;;  %v3433_v47 = vpop.f32.mrb[127].mxu1 }
 0x1dd   :  { %v2266_v48 = vmax.f32 %v2217_v31, 0.0  ;;  %v2162_v5 = vmax.f32 %v5601_v4, %v2113_v9  ;;  %v5606_v31 = vmax.f32 %v4604_v51, %v4606_v52 }
 0x1de   :  { %v1374_v28 = vpop.f32.mrb[128].mxu0  ;;  %v1881_v43 = vpop.f32.mrb[128].mxu1 }
 0x1df   :  { %2316 = vst.msk [vmem:[%s5486_s3 + $0x68] sm:$0xff] %vm2302_vm5, %v2266_v48  ;;  %v2218_v44 = vadd.f32 %v5089_v7, %v2162_v5  ;;  %v2114_v26 = vmax.f32 %v1374_v28, %v1881_v43  ;;  %v3281_v27 = vpop.f32.mrb[129].mxu0  ;;  %v3436_v54 = vpop.f32.mrb[129].mxu1  ;;  %v5607_v28 = vmax.f32 %v4622_v29, %v4624_v50 }
 0x1e1   :  { %v2267_v55 = vmax.f32 %v2218_v44, 0.0  ;;  %v2163_v58 = vmax.f32 %v5602_v57, %v2114_v26  ;;  %v5608_v57 = vmax.f32 %v4640_v24, %v4642_v39 }
 0x1e2   :  { %v1379_v23 = vpop.f32.mrb[130].mxu0  ;;  %v1886_v53 = vpop.f32.mrb[130].mxu1 }
 0x1e3   :  { %2317 = vst.msk [vmem:[%s5486_s3 + $0x70] sm:$0xff] %vm2302_vm5, %v2267_v55  ;;  %v2219_v60 = vadd.f32 %v5089_v7, %v2163_v58  ;;  %v2115_v42 = vmax.f32 %v1379_v23, %v1886_v53  ;;  %v3284_v59 = vpop.f32.mrb[131].mxu0  ;;  %v3439_v14 = vpop.f32.mrb[131].mxu1 }
 0x1e4   :  { %v5609_v14 = vmax.f32 %v4658_v25, %v4660_v0 }
 0x1e5   :  { %v2268_v12 = vmax.f32 %v2219_v60, 0.0  ;;  %v2164_v34 = vmax.f32 %v5603_v33, %v2115_v42 }
 0x1e6   :  { %v1384_v3 = vpop.f32.mrb[132].mxu0  ;;  %v1891_v15 = vpop.f32.mrb[132].mxu1 }
 0x1e7   :  { %2318 = vst.msk [vmem:[%s5486_s3 + $0x78] sm:$0xff] %vm2302_vm5, %v2268_v12  ;;  %v2220_v16 = vadd.f32 %v5089_v7, %v2164_v34  ;;  %v2116_v8 = vmax.f32 %v1384_v3, %v1891_v15  ;;  %v3287_v13 = vpop.f32.mrb[133].mxu0  ;;  %v3442_v45 = vpop.f32.mrb[133].mxu1 }
 0x1e9   :  { %v2269_v22 = vmax.f32 %v2220_v16, 0.0  ;;  %v2165_v62 = vmax.f32 %v5604_v61, %v2116_v8  ;;  %v5610_v8 = vmax.f32 %v4676_v11, %v4678_v32 }
 0x1ea   :  { %v1389_v63 = vpop.f32.mrb[134].mxu0  ;;  %v1896_v37 = vpop.f32.mrb[134].mxu1 }
 0x1eb   :  { %2319 = vst.msk [vmem:[%s5486_s3 + $0x80] sm:$0xff] %vm2302_vm5, %v2269_v22  ;;  %v2221_v38 = vadd.f32 %v5089_v7, %v2165_v62  ;;  %v2117_v6 = vmax.f32 %v1389_v63, %v1896_v37  ;;  %v3290_v17 = vpop.f32.mrb[135].mxu0  ;;  %v3445_v18 = vpop.f32.mrb[135].mxu1  ;;  %v5611_v37 = vld [vmem:[#allocation2_spill] sm:$0xff] }
 0x1ed   :  { %v2270_v40 = vmax.f32 %v2221_v38, 0.0  ;;  %v2166_v56 = vmax.f32 %v5605_v41, %v2117_v6  ;;  %v5612_v38 = vmax.f32 %v4694_v10, %v5611_v37 }
 0x1ee   :  { %v1394_v19 = vpop.f32.mrb[136].mxu0  ;;  %v1901_v1 = vpop.f32.mrb[136].mxu1 }
 0x1ef   :  { %2320 = vst.msk [vmem:[%s5486_s3 + $0x88] sm:$0xff] %vm2302_vm5, %v2270_v40  ;;  %v2222_v2 = vadd.f32 %v5089_v7, %v2166_v56  ;;  %v2118_v20 = vmax.f32 %v1394_v19, %v1901_v1  ;;  %v3293_v35 = vpop.f32.mrb[137].mxu0  ;;  %v3448_v21 = vpop.f32.mrb[137].mxu1  ;;  %v5613_v19 = vld [vmem:[#allocation3_spill] sm:$0xff]  ;;  %v5614_v1 = vld [vmem:[#allocation4_spill] sm:$0xff] }
 0x1f1   :  { %v2271_v30 = vmax.f32 %v2222_v2, 0.0  ;;  %v2167_v9 = vmax.f32 %v5606_v31, %v2118_v20  ;;  %v5615_v2 = vmax.f32 %v5613_v19, %v5614_v1 }
 0x1f2   :  { %v1399_v49 = vpop.f32.mrb[138].mxu0  ;;  %v1906_v36 = vpop.f32.mrb[138].mxu1 }
 0x1f3   :  { %2321 = vst.msk [vmem:[%s5486_s3 + $0x90] sm:$0xff] %vm2302_vm5, %v2271_v30  ;;  %v2223_v46 = vadd.f32 %v5089_v7, %v2167_v9  ;;  %v2119_v47 = vmax.f32 %v1399_v49, %v1906_v36  ;;  %v3296_v48 = vpop.f32.mrb[139].mxu0  ;;  %v3451_v4 = vpop.f32.mrb[139].mxu1  ;;  %v5616_v36 = vld [vmem:[#allocation5_spill] sm:$0xff] }
 0x1f5   :  { %v2272_v5 = vmax.f32 %v2223_v46, 0.0  ;;  %v2168_v43 = vmax.f32 %v5607_v28, %v2119_v47  ;;  %v5617_v46 = vld [vmem:[#allocation6_spill] sm:$0xff] }
 0x1f6   :  { %v1404_v44 = vpop.f32.mrb[140].mxu0  ;;  %v1911_v51 = vpop.f32.mrb[140].mxu1  ;;  %v5618_v47 = vmax.f32 %v5616_v36, %v5617_v46 }
 0x1f7   :  { %2322 = vst.msk [vmem:[%s5486_s3 + $0x98] sm:$0xff] %vm2302_vm5, %v2272_v5  ;;  %v2224_v52 = vadd.f32 %v5089_v7, %v2168_v43  ;;  %v2120_v26 = vmax.f32 %v1404_v44, %v1911_v51  ;;  %v3299_v27 = vpop.f32.mrb[141].mxu0  ;;  %v3454_v54 = vpop.f32.mrb[141].mxu1 }
 0x1f8   :  { %v5620_v27 = vld [vmem:[#allocation8_spill] sm:$0xff] }
 0x1f9   :  { %v2273_v55 = vmax.f32 %v2224_v52, 0.0  ;;  %v2169_v58 = vmax.f32 %v5608_v57, %v2120_v26  ;;  %v5619_v26 = vld [vmem:[#allocation7_spill] sm:$0xff] }
 0x1fa   :  { %v1409_v23 = vpop.f32.mrb[142].mxu0  ;;  %v1916_v29 = vpop.f32.mrb[142].mxu1  ;;  %v5621_v54 = vmax.f32 %v5619_v26, %v5620_v27 }
 0x1fb   :  { %2323 = vst.msk [vmem:[%s5486_s3 + $0xa0] sm:$0xff] %vm2302_vm5, %v2273_v55  ;;  %v2225_v50 = vadd.f32 %v5089_v7, %v2169_v58  ;;  %v2121_v53 = vmax.f32 %v1409_v23, %v1916_v29  ;;  %v3302_v60 = vpop.f32.mrb[143].mxu0  ;;  %v3457_v42 = vpop.f32.mrb[143].mxu1 }
 0x1fc   :  { %v5622_v42 = vld [vmem:[#allocation9_spill] sm:$0xff] }
 0x1fd   :  { %v2274_v59 = vmax.f32 %v2225_v50, 0.0  ;;  %v2170_v12 = vmax.f32 %v5609_v14, %v2121_v53 }
 0x1fe   :  { %v1414_v33 = vpop.f32.mrb[144].mxu0  ;;  %v1921_v24 = vpop.f32.mrb[144].mxu1 }
 0x1ff   :  { %2324 = vst.msk [vmem:[%s5486_s3 + $0xa8] sm:$0xff] %vm2302_vm5, %v2274_v59  ;;  %v2226_v39 = vadd.f32 %v5089_v7, %v2170_v12  ;;  %v2122_v34 = vmax.f32 %v1414_v33, %v1921_v24  ;;  %v3305_v3 = vpop.f32.mrb[145].mxu0  ;;  %v3460_v15 = vpop.f32.mrb[145].mxu1  ;;  %v5623_v59 = vld [vmem:[#allocation10_spill] sm:$0xff] }
 0x200   :  { %v5624_v14 = vmax.f32 %v5622_v42, %v5623_v59 }
 0x201   :  { %v2275_v16 = vmax.f32 %v2226_v39, 0.0  ;;  %v2171_v13 = vmax.f32 %v5610_v8, %v2122_v34  ;;  %v5625_v8 = vld [vmem:[#allocation11_spill] sm:$0xff] }
 0x202   :  { %v1419_v45 = vpop.f32.mrb[146].mxu0  ;;  %v1926_v25 = vpop.f32.mrb[146].mxu1 }
 0x203   :  { %2325 = vst.msk [vmem:[%s5486_s3 + $0xb0] sm:$0xff] %vm2302_vm5, %v2275_v16  ;;  %v2227_v0 = vadd.f32 %v5089_v7, %v2171_v13  ;;  %v2123_v22 = vmax.f32 %v1419_v45, %v1926_v25  ;;  %v3308_v61 = vpop.f32.mrb[147].mxu0  ;;  %v3463_v62 = vpop.f32.mrb[147].mxu1  ;;  %v5626_v13 = vld [vmem:[#allocation12_spill] sm:$0xff] }
 0x204   :  { %v5627_v45 = vmax.f32 %v5625_v8, %v5626_v13 }
 0x205   :  { %v2276_v63 = vmax.f32 %v2227_v0, 0.0  ;;  %v2172_v6 = vmax.f32 %v5612_v38, %v2123_v22 }
 0x206   :  { %v1424_v17 = vpop.f32.mrb[148].mxu0  ;;  %v1931_v11 = vpop.f32.mrb[148].mxu1 }
 0x207   :  { %2326 = vst.msk [vmem:[%s5486_s3 + $0xb8] sm:$0xff] %vm2302_vm5, %v2276_v63  ;;  %v2228_v32 = vadd.f32 %v5089_v7, %v2172_v6  ;;  %v2124_v18 = vmax.f32 %v1424_v17, %v1931_v11  ;;  %v3311_v40 = vpop.f32.mrb[149].mxu0  ;;  %v3466_v41 = vpop.f32.mrb[149].mxu1  ;;  %v5628_v6 = vld [vmem:[#allocation13_spill] sm:$0xff]  ;;  %v5629_v17 = vld [vmem:[#allocation14_spill] sm:$0xff] }
 0x208   :  { %v5630_v11 = vmax.f32 %v5628_v6, %v5629_v17 }
 0x209   :  { %v2277_v56 = vmax.f32 %v2228_v32, 0.0  ;;  %v2173_v20 = vmax.f32 %v5615_v2, %v2124_v18 }
 0x20a   :  { %v1429_v35 = vpop.f32.mrb[150].mxu0  ;;  %v1936_v10 = vpop.f32.mrb[150].mxu1 }
 0x20b   :  { %2327 = vst.msk [vmem:[%s5486_s3 + $0xc0] sm:$0xff] %vm2302_vm5, %v2277_v56  ;;  %v2229_v21 = vadd.f32 %v5089_v7, %v2173_v20  ;;  %v2125_v30 = vmax.f32 %v1429_v35, %v1936_v10  ;;  %v3314_v31 = vpop.f32.mrb[151].mxu0  ;;  %v3469_v9 = vpop.f32.mrb[151].mxu1  ;;  %v5631_v20 = vld [vmem:[#allocation15_spill] sm:$0xff]  ;;  %v5632_v35 = vld [vmem:[#allocation16_spill] sm:$0xff] }
 0x20c   :  { %v5633_v10 = vmax.f32 %v5631_v20, %v5632_v35 }
 0x20d   :  { %v2278_v49 = vmax.f32 %v2229_v21, 0.0  ;;  %v2174_v48 = vmax.f32 %v5618_v47, %v2125_v30 }
 0x20e   :  { %v1434_v4 = vpop.f32.mrb[152].mxu0  ;;  %v1941_v5 = vpop.f32.mrb[152].mxu1 }
 0x20f   :  { %2328 = vst.msk [vmem:[%s5486_s3 + $0xc8] sm:$0xff] %vm2302_vm5, %v2278_v49  ;;  %v2230_v28 = vadd.f32 %v5089_v7, %v2174_v48  ;;  %v2126_v43 = vmax.f32 %v1434_v4, %v1941_v5  ;;  %v3317_v44 = vpop.f32.mrb[153].mxu0  ;;  %v3472_v51 = vpop.f32.mrb[153].mxu1  ;;  %v5634_v48 = vld [vmem:[#allocation17_spill] sm:$0xff]  ;;  %v5635_v4 = vld [vmem:[#allocation18_spill] sm:$0xff] }
 0x210   :  { %v5636_v5 = vmax.f32 %v5634_v48, %v5635_v4 }
 0x211   :  { %v2279_v52 = vmax.f32 %v2230_v28, 0.0  ;;  %v2175_v55 = vmax.f32 %v5621_v54, %v2126_v43 }
 0x212   :  { %v1439_v57 = vpop.f32.mrb[154].mxu0  ;;  %v1946_v58 = vpop.f32.mrb[154].mxu1 }
 0x213   :  { %2329 = vst.msk [vmem:[%s5486_s3 + $0xd0] sm:$0xff] %vm2302_vm5, %v2279_v52  ;;  %v2231_v23 = vadd.f32 %v5089_v7, %v2175_v55  ;;  %v2127_v29 = vmax.f32 %v1439_v57, %v1946_v58  ;;  %v3320_v50 = vpop.f32.mrb[155].mxu0  ;;  %v3475_v53 = vpop.f32.mrb[155].mxu1  ;;  %v5637_v55 = vld [vmem:[#allocation19_spill] sm:$0xff]  ;;  %v5638_v57 = vld [vmem:[#allocation20_spill] sm:$0xff] }
 0x214   :  { %v5639_v58 = vmax.f32 %v5637_v55, %v5638_v57 }
 0x215   :  { %v2280_v60 = vmax.f32 %v2231_v23, 0.0  ;;  %v2176_v12 = vmax.f32 %v5624_v14, %v2127_v29 }
 0x216   :  { %v1444_v33 = vpop.f32.mrb[156].mxu0  ;;  %v1951_v24 = vpop.f32.mrb[156].mxu1 }
 0x217   :  { %2330 = vst.msk [vmem:[%s5486_s3 + $0xd8] sm:$0xff] %vm2302_vm5, %v2280_v60  ;;  %v2232_v39 = vadd.f32 %v5089_v7, %v2176_v12  ;;  %v2128_v34 = vmax.f32 %v1444_v33, %v1951_v24  ;;  %v3323_v3 = vpop.f32.mrb[157].mxu0  ;;  %v3478_v15 = vpop.f32.mrb[157].mxu1  ;;  %v5640_v12 = vld [vmem:[#allocation21_spill] sm:$0xff]  ;;  %v5641_v33 = vld [vmem:[#allocation22_spill] sm:$0xff] }
 0x218   :  { %v5642_v24 = vmax.f32 %v5640_v12, %v5641_v33 }
 0x219   :  { %v2281_v16 = vmax.f32 %v2232_v39, 0.0  ;;  %v2177_v25 = vmax.f32 %v5627_v45, %v2128_v34 }
 0x21a   :  { %v1449_v0 = vpop.f32.mrb[158].mxu0  ;;  %v1956_v22 = vpop.f32.mrb[158].mxu1 }
 0x21b   :  { %2331 = vst.msk [vmem:[%s5486_s3 + $0xe0] sm:$0xff] %vm2302_vm5, %v2281_v16  ;;  %v2233_v61 = vadd.f32 %v5089_v7, %v2177_v25  ;;  %v2129_v62 = vmax.f32 %v1449_v0, %v1956_v22  ;;  %v3326_v63 = vpop.f32.mrb[159].mxu0  ;;  %v3481_v37 = vpop.f32.mrb[159].mxu1  ;;  %v5643_v25 = vld [vmem:[#allocation23_spill] sm:$0xff]  ;;  %v5644_v0 = vld [vmem:[#allocation24_spill] sm:$0xff] }
 0x21c   :  { %v5645_v22 = vmax.f32 %v5643_v25, %v5644_v0 }
 0x21d   :  { %v2282_v38 = vmax.f32 %v2233_v61, 0.0  ;;  %v2178_v32 = vmax.f32 %v5630_v11, %v2129_v62 }
 0x21e   :  { %v1454_v18 = vpop.f32.mrb[160].mxu0  ;;  %v1961_v40 = vpop.f32.mrb[160].mxu1 }
 0x21f   :  { %2332 = vst.msk [vmem:[%s5486_s3 + $0xe8] sm:$0xff] %vm2302_vm5, %v2282_v38  ;;  %v2234_v41 = vadd.f32 %v5089_v7, %v2178_v32  ;;  %v2130_v56 = vmax.f32 %v1454_v18, %v1961_v40  ;;  %v3329_v19 = vpop.f32.mrb[161].mxu0  ;;  %v3484_v1 = vpop.f32.mrb[161].mxu1  ;;  %v5646_v32 = vld [vmem:[#allocation25_spill] sm:$0xff]  ;;  %v5647_v18 = vld [vmem:[#allocation26_spill] sm:$0xff] }
 0x220   :  { %v5648_v40 = vmax.f32 %v5646_v32, %v5647_v18 }
 0x221   :  { %v2283_v2 = vmax.f32 %v2234_v41, 0.0  ;;  %v2179_v21 = vmax.f32 %v5633_v10, %v2130_v56 }
 0x222   :  { %v1459_v30 = vpop.f32.mrb[162].mxu0  ;;  %v1966_v31 = vpop.f32.mrb[162].mxu1 }
 0x223   :  { %2333 = vst.msk [vmem:[%s5486_s3 + $0xf0] sm:$0xff] %vm2302_vm5, %v2283_v2  ;;  %v2235_v9 = vadd.f32 %v5089_v7, %v2179_v21  ;;  %v2131_v49 = vmax.f32 %v1459_v30, %v1966_v31  ;;  %v3332_v36 = vpop.f32.mrb[163].mxu0  ;;  %v3487_v46 = vpop.f32.mrb[163].mxu1  ;;  %v5649_v21 = vld [vmem:[#allocation27_spill] sm:$0xff]  ;;  %v5650_v30 = vld [vmem:[#allocation28_spill] sm:$0xff] }
 0x224   :  { %v5651_v31 = vmax.f32 %v5649_v21, %v5650_v30 }
 0x225   :  { %v2284_v47 = vmax.f32 %v2235_v9, 0.0  ;;  %v2180_v28 = vmax.f32 %v5636_v5, %v2131_v49 }
 0x226   :  { %v1464_v43 = vpop.f32.mrb[164].mxu0  ;;  %v1971_v44 = vpop.f32.mrb[164].mxu1 }
 0x227   :  { %2334 = vst.msk [vmem:[%s5486_s3 + $0xf8] sm:$0xff] %vm2302_vm5, %v2284_v47  ;;  %v2236_v51 = vadd.f32 %v5089_v7, %v2180_v28  ;;  %v2132_v52 = vmax.f32 %v1464_v43, %v1971_v44  ;;  %v3335_v26 = vpop.f32.mrb[165].mxu0  ;;  %v3490_v27 = vpop.f32.mrb[165].mxu1  ;;  %v5652_v28 = vld [vmem:[#allocation29_spill] sm:$0xff]  ;;  %v5653_v43 = vld [vmem:[#allocation30_spill] sm:$0xff] }
 0x228   :  { %v5654_v44 = vmax.f32 %v5652_v28, %v5653_v43 }
 0x229   :  { %v2285_v54 = vmax.f32 %v2236_v51, 0.0  ;;  %v2181_v23 = vmax.f32 %v5639_v58, %v2132_v52 }
 0x22a   :  { %v1469_v29 = vpop.f32.mrb[166].mxu0  ;;  %v1976_v50 = vpop.f32.mrb[166].mxu1 }
 0x22b   :  { %2335 = vst.msk [vmem:[%s5486_s3 + $0x100] sm:$0xff] %vm2302_vm5, %v2285_v54  ;;  %v2237_v53 = vadd.f32 %v5089_v7, %v2181_v23  ;;  %v2133_v60 = vmax.f32 %v1469_v29, %v1976_v50  ;;  %v3338_v42 = vpop.f32.mrb[167].mxu0  ;;  %v3493_v59 = vpop.f32.mrb[167].mxu1  ;;  %v5655_v23 = vld [vmem:[#allocation31_spill] sm:$0xff]  ;;  %v5656_v29 = vld [vmem:[#allocation32_spill] sm:$0xff] }
 0x22c   :  { %v5657_v50 = vmax.f32 %v5655_v23, %v5656_v29 }
 0x22d   :  { %v2286_v14 = vmax.f32 %v2237_v53, 0.0  ;;  %v2182_v39 = vmax.f32 %v5642_v24, %v2133_v60 }
 0x22e   :  { %v1474_v34 = vpop.f32.mrb[168].mxu0  ;;  %v1981_v3 = vpop.f32.mrb[168].mxu1 }
 0x22f   :  { %2336 = vst.msk [vmem:[%s5486_s3 + $0x108] sm:$0xff] %vm2302_vm5, %v2286_v14  ;;  %v2238_v15 = vadd.f32 %v5089_v7, %v2182_v39  ;;  %v2134_v16 = vmax.f32 %v1474_v34, %v1981_v3  ;;  %v3341_v8 = vpop.f32.mrb[169].mxu0  ;;  %v3496_v13 = vpop.f32.mrb[169].mxu1  ;;  %v5658_v39 = vld [vmem:[#allocation33_spill] sm:$0xff]  ;;  %v5659_v34 = vld [vmem:[#allocation34_spill] sm:$0xff] }
 0x230   :  { %v5660_v3 = vmax.f32 %v5658_v39, %v5659_v34 }
 0x231   :  { %v2287_v45 = vmax.f32 %v2238_v15, 0.0  ;;  %v2183_v61 = vmax.f32 %v5645_v22, %v2134_v16 }
 0x232   :  { %v1479_v62 = vpop.f32.mrb[170].mxu0  ;;  %v1986_v63 = vpop.f32.mrb[170].mxu1 }
 0x233   :  { %2337 = vst.msk [vmem:[%s5486_s3 + $0x110] sm:$0xff] %vm2302_vm5, %v2287_v45  ;;  %v2239_v37 = vadd.f32 %v5089_v7, %v2183_v61  ;;  %v2135_v38 = vmax.f32 %v1479_v62, %v1986_v63  ;;  %v3344_v6 = vpop.f32.mrb[171].mxu0  ;;  %v3499_v17 = vpop.f32.mrb[171].mxu1  ;;  %v5661_v61 = vld [vmem:[#allocation35_spill] sm:$0xff]  ;;  %v5662_v62 = vld [vmem:[#allocation36_spill] sm:$0xff] }
 0x234   :  { %v5663_v63 = vmax.f32 %v5661_v61, %v5662_v62 }
 0x235   :  { %v2288_v11 = vmax.f32 %v2239_v37, 0.0  ;;  %v2184_v41 = vmax.f32 %v5648_v40, %v2135_v38 }
 0x236   :  { %v1484_v56 = vpop.f32.mrb[172].mxu0  ;;  %v1991_v19 = vpop.f32.mrb[172].mxu1 }
 0x237   :  { %2338 = vst.msk [vmem:[%s5486_s3 + $0x118] sm:$0xff] %vm2302_vm5, %v2288_v11  ;;  %v2240_v1 = vadd.f32 %v5089_v7, %v2184_v41  ;;  %v2136_v2 = vmax.f32 %v1484_v56, %v1991_v19  ;;  %v3347_v20 = vpop.f32.mrb[173].mxu0  ;;  %v3502_v35 = vpop.f32.mrb[173].mxu1  ;;  %v5664_v41 = vld [vmem:[#allocation37_spill] sm:$0xff]  ;;  %v5665_v56 = vld [vmem:[#allocation38_spill] sm:$0xff] }
 0x238   :  { %v5666_v19 = vmax.f32 %v5664_v41, %v5665_v56 }
 0x239   :  { %v2289_v10 = vmax.f32 %v2240_v1, 0.0  ;;  %v2185_v9 = vmax.f32 %v5651_v31, %v2136_v2 }
 0x23a   :  { %v1489_v49 = vpop.f32.mrb[174].mxu0  ;;  %v1996_v36 = vpop.f32.mrb[174].mxu1 }
 0x23b   :  { %2339 = vst.msk [vmem:[%s5486_s3 + $0x120] sm:$0xff] %vm2302_vm5, %v2289_v10  ;;  %v2241_v46 = vadd.f32 %v5089_v7, %v2185_v9  ;;  %v2137_v47 = vmax.f32 %v1489_v49, %v1996_v36  ;;  %v3350_v48 = vpop.f32.mrb[175].mxu0  ;;  %v3505_v4 = vpop.f32.mrb[175].mxu1  ;;  %v5667_v9 = vld [vmem:[#allocation39_spill] sm:$0xff]  ;;  %v5668_v49 = vld [vmem:[#allocation40_spill] sm:$0xff] }
 0x23c   :  { %v5669_v36 = vmax.f32 %v5667_v9, %v5668_v49 }
 0x23d   :  { %v2290_v5 = vmax.f32 %v2241_v46, 0.0  ;;  %v2186_v51 = vmax.f32 %v5654_v44, %v2137_v47 }
 0x23e   :  { %v1494_v52 = vpop.f32.mrb[176].mxu0  ;;  %v2001_v26 = vpop.f32.mrb[176].mxu1 }
 0x23f   :  { %2340 = vst.msk [vmem:[%s5486_s3 + $0x128] sm:$0xff] %vm2302_vm5, %v2290_v5  ;;  %v2242_v27 = vadd.f32 %v5089_v7, %v2186_v51  ;;  %v2138_v54 = vmax.f32 %v1494_v52, %v2001_v26  ;;  %v3353_v55 = vpop.f32.mrb[177].mxu0  ;;  %v3508_v57 = vpop.f32.mrb[177].mxu1  ;;  %v5670_v51 = vld [vmem:[#allocation41_spill] sm:$0xff]  ;;  %v5671_v52 = vld [vmem:[#allocation42_spill] sm:$0xff] }
 0x240   :  { %v5672_v26 = vmax.f32 %v5670_v51, %v5671_v52 }
 0x241   :  { %v2291_v58 = vmax.f32 %v2242_v27, 0.0  ;;  %v2187_v53 = vmax.f32 %v5657_v50, %v2138_v54 }
 0x242   :  { %v1499_v60 = vpop.f32.mrb[178].mxu0  ;;  %v2006_v42 = vpop.f32.mrb[178].mxu1 }
 0x243   :  { %2341 = vst.msk [vmem:[%s5486_s3 + $0x130] sm:$0xff] %vm2302_vm5, %v2291_v58  ;;  %v2243_v59 = vadd.f32 %v5089_v7, %v2187_v53  ;;  %v2139_v14 = vmax.f32 %v1499_v60, %v2006_v42  ;;  %v3356_v12 = vpop.f32.mrb[179].mxu0  ;;  %v3511_v33 = vpop.f32.mrb[179].mxu1  ;;  %v5673_v53 = vld [vmem:[#allocation43_spill] sm:$0xff]  ;;  %v5674_v60 = vld [vmem:[#allocation44_spill] sm:$0xff] }
 0x244   :  { %v5675_v42 = vmax.f32 %v5673_v53, %v5674_v60 }
 0x245   :  { %v2292_v24 = vmax.f32 %v2243_v59, 0.0  ;;  %v2188_v15 = vmax.f32 %v5660_v3, %v2139_v14 }
 0x246   :  { %v1504_v16 = vpop.f32.mrb[180].mxu0  ;;  %v2011_v8 = vpop.f32.mrb[180].mxu1 }
 0x247   :  { %2342 = vst.msk [vmem:[%s5486_s3 + $0x138] sm:$0xff] %vm2302_vm5, %v2292_v24  ;;  %v2244_v13 = vadd.f32 %v5089_v7, %v2188_v15  ;;  %v2140_v45 = vmax.f32 %v1504_v16, %v2011_v8  ;;  %v3359_v25 = vpop.f32.mrb[181].mxu0  ;;  %v3514_v0 = vpop.f32.mrb[181].mxu1  ;;  %v5676_v15 = vld [vmem:[#allocation45_spill] sm:$0xff]  ;;  %v5677_v16 = vld [vmem:[#allocation46_spill] sm:$0xff] }
 0x248   :  { %v5678_v8 = vmax.f32 %v5676_v15, %v5677_v16 }
 0x249   :  { %v2293_v22 = vmax.f32 %v2244_v13, 0.0  ;;  %v2189_v37 = vmax.f32 %v5663_v63, %v2140_v45 }
 0x24a   :  { %v1509_v38 = vpop.f32.mrb[182].mxu0  ;;  %v2016_v6 = vpop.f32.mrb[182].mxu1 }
 0x24b   :  { %2343 = vst.msk [vmem:[%s5486_s3 + $0x140] sm:$0xff] %vm2302_vm5, %v2293_v22  ;;  %v2245_v17 = vadd.f32 %v5089_v7, %v2189_v37  ;;  %v2141_v11 = vmax.f32 %v1509_v38, %v2016_v6  ;;  %v3362_v32 = vpop.f32.mrb[183].mxu0  ;;  %v3517_v18 = vpop.f32.mrb[183].mxu1  ;;  %v5679_v37 = vld [vmem:[#allocation47_spill] sm:$0xff]  ;;  %v5680_v38 = vld [vmem:[#allocation48_spill] sm:$0xff] }
 0x24c   :  { %v5681_v6 = vmax.f32 %v5679_v37, %v5680_v38 }
 0x24d   :  { %v2294_v40 = vmax.f32 %v2245_v17, 0.0  ;;  %v2190_v1 = vmax.f32 %v5666_v19, %v2141_v11 }
 0x24e   :  { %v1514_v2 = vpop.f32.mrb[184].mxu0  ;;  %v2021_v20 = vpop.f32.mrb[184].mxu1 }
 0x24f   :  { %2344 = vst.msk [vmem:[%s5486_s3 + $0x148] sm:$0xff] %vm2302_vm5, %v2294_v40  ;;  %v2246_v35 = vadd.f32 %v5089_v7, %v2190_v1  ;;  %v2142_v10 = vmax.f32 %v1514_v2, %v2021_v20  ;;  %v3365_v21 = vpop.f32.mrb[185].mxu0  ;;  %v3520_v30 = vpop.f32.mrb[185].mxu1  ;;  %v5682_v1 = vld [vmem:[#allocation49_spill] sm:$0xff]  ;;  %v5683_v2 = vld [vmem:[#allocation50_spill] sm:$0xff] }
 0x250   :  { %v5684_v20 = vmax.f32 %v5682_v1, %v5683_v2 }
 0x251   :  { %v2295_v31 = vmax.f32 %v2246_v35, 0.0  ;;  %v2191_v46 = vmax.f32 %v5669_v36, %v2142_v10 }
 0x252   :  { %v1519_v47 = vpop.f32.mrb[186].mxu0  ;;  %v2026_v48 = vpop.f32.mrb[186].mxu1 }
 0x253   :  { %2345 = vst.msk [vmem:[%s5486_s3 + $0x150] sm:$0xff] %vm2302_vm5, %v2295_v31  ;;  %v2247_v4 = vadd.f32 %v5089_v7, %v2191_v46  ;;  %v2143_v5 = vmax.f32 %v1519_v47, %v2026_v48  ;;  %v3368_v28 = vpop.f32.mrb[187].mxu0  ;;  %v3523_v43 = vpop.f32.mrb[187].mxu1 }
 0x255   :  { %v2296_v44 = vmax.f32 %v2247_v4, 0.0  ;;  %v2192_v27 = vmax.f32 %v5672_v26, %v2143_v5 }
 0x256   :  { %v1524_v54 = vpop.f32.mrb[188].mxu0  ;;  %v2031_v55 = vpop.f32.mrb[188].mxu1 }
 0x257   :  { %2346 = vst.msk [vmem:[%s5486_s3 + $0x158] sm:$0xff] %vm2302_vm5, %v2296_v44  ;;  %v2248_v57 = vadd.f32 %v5089_v7, %v2192_v27  ;;  %v2144_v58 = vmax.f32 %v1524_v54, %v2031_v55  ;;  %v3371_v23 = vpop.f32.mrb[189].mxu0  ;;  %v3526_v29 = vpop.f32.mrb[189].mxu1 }
 0x259   :  { %v2297_v50 = vmax.f32 %v2248_v57, 0.0  ;;  %v2193_v59 = vmax.f32 %v5675_v42, %v2144_v58 }
 0x25a   :  { %v1529_v14 = vpop.f32.mrb[190].mxu0  ;;  %v2036_v12 = vpop.f32.mrb[190].mxu1 }
 0x25b   :  { %2347 = vst.msk [vmem:[%s5486_s3 + $0x160] sm:$0xff] %vm2302_vm5, %v2297_v50  ;;  %v2249_v33 = vadd.f32 %v5089_v7, %v2193_v59  ;;  %v2145_v24 = vmax.f32 %v1529_v14, %v2036_v12  ;;  %v3374_v39 = vpop.f32.mrb[191].mxu0  ;;  %v3529_v34 = vpop.f32.mrb[191].mxu1 }
 0x25d   :  { %v2298_v3 = vmax.f32 %v2249_v33, 0.0  ;;  %v2194_v13 = vmax.f32 %v5678_v8, %v2145_v24 }
 0x25e   :  { %v1534_v45 = vpop.f32.mrb[192].mxu0  ;;  %v2041_v25 = vpop.f32.mrb[192].mxu1 }
 0x25f   :  { %2348 = vst.msk [vmem:[%s5486_s3 + $0x168] sm:$0xff] %vm2302_vm5, %v2298_v3  ;;  %v2250_v0 = vadd.f32 %v5089_v7, %v2194_v13  ;;  %v2146_v22 = vmax.f32 %v1534_v45, %v2041_v25  ;;  %v3377_v61 = vpop.f32.mrb[193].mxu0  ;;  %v3532_v62 = vpop.f32.mrb[193].mxu1 }
 0x261   :  { %v2299_v63 = vmax.f32 %v2250_v0, 0.0  ;;  %v2195_v17 = vmax.f32 %v5681_v6, %v2146_v22 }
 0x262   :  { %v1539_v11 = vpop.f32.mrb[194].mxu0  ;;  %v2046_v32 = vpop.f32.mrb[194].mxu1 }
 0x263   :  { %2349 = vst.msk [vmem:[%s5486_s3 + $0x170] sm:$0xff] %vm2302_vm5, %v2299_v63  ;;  %v2251_v18 = vadd.f32 %v5089_v7, %v2195_v17  ;;  %v2147_v40 = vmax.f32 %v1539_v11, %v2046_v32  ;;  %v3380_v41 = vpop.f32.mrb[195].mxu0  ;;  %v3535_v56 = vpop.f32.mrb[195].mxu1 }
 0x265   :  { %v2300_v19 = vmax.f32 %v2251_v18, 0.0  ;;  %v2196_v35 = vmax.f32 %v5684_v20, %v2147_v40 }
 0x267   :  { %2350 = vst.msk [vmem:[%s5486_s3 + $0x178] sm:$0xff] %vm2302_vm5, %v2300_v19  ;;  %v2252_v10 = vadd.f32 %v5089_v7, %v2196_v35 }
 0x269   :  { %v2301_v21 = vmax.f32 %v2252_v10, 0.0 }
 0x26b   :  { %2351 = vst.msk [vmem:[%s5486_s3 + $0x180] sm:$0xff] %vm2302_vm5, %v2301_v21 }

// kernel: a_call__.4
= control target key start
LH: loop header
LB: loop body
LE: loop exit
PB: predicated region body
PF: predicated region fallthrough
CT: control target
= control target key end

     0   :  { %vm60_vm0 = vcmask 998400   ;;  %vm82_vm1 = vcmask 1041408   ;;  %vm1069_vm2 = vmmov 1   ;;  %vm636_vm4 = vcmask 162816   ;;  %s1580_s1 = inlined_call_operand.vmem [shape: f32[250,20], index: 1, kind: input, shape index: {}]   ;;  %s1581_s0 = inlined_call_operand.vmem [shape: f32[4,50,250], index: 0, kind: input, shape index: {}]   ;;  %s1582_s2 = inlined_call_operand.vmem [shape: f32[1,20], index: 2, kind: input, shape index: {}]   ;;  %s1583_s3 = inlined_call_operand.vmem [shape: f32[50,20], index: 3, kind: output, shape index: {}]  }
   0x1   :  { %v30_v0 = vld [vmem:[%s1580_s1 + $0x80] sm:$0xff]  ;;  %v31_v1 = vld [vmem:[%s1580_s1 + $0x88] sm:$0xff]  ;;  %v32_v5 = vld [vmem:[%s1580_s1 + $0x90] sm:$0xff]  ;;  %vm643_vm5 = vcmask 156672  }
   0x2   :  { %v14_v2 = vld [vmem:[%s1580_s1] sm:$0xff]  ;;  %v1099_v3 = vpack.c.bf16 %v31_v1, %v30_v0  ;;  %v15_v4 = vld [vmem:[%s1580_s1 + $0x8] sm:$0xff]  ;;  %v33_v6 = vld [vmem:[%s1580_s1 + $0x98] sm:$0xff] }
   0x3   :  { %v1110_v7 = vpack.c.bf16 %v15_v4, %v14_v2  ;;  %v1112_v8 = vpack.c.bf16 %v33_v6, %v32_v5  ;;  %v16_v9 = vld [vmem:[%s1580_s1 + $0x10] sm:$0xff]  ;;  %v17_v10 = vld [vmem:[%s1580_s1 + $0x18] sm:$0xff]  ;;  %v34_v11 = vld [vmem:[%s1580_s1 + $0xa0] sm:$0xff] }
   0x4   :  { %937 = vmatprep.subr.bf16.mxu0 %v1099_v3  ;;  %970 = vmatprep.subr.bf16.mxu1 %v1099_v3  ;;  %v35_v12 = vld [vmem:[%s1580_s1 + $0xa8] sm:$0xff]  ;;  %v1130_v13 = vpack.c.bf16 %v17_v10, %v16_v9  ;;  %v18_v15 = vld [vmem:[%s1580_s1 + $0x20] sm:$0xff]  ;;  %v36_v17 = vld [vmem:[%s1580_s1 + $0xb0] sm:$0xff] }
   0x5   :  { %939 = vmatpush3.bf16.msra.mxu0 %v1110_v7  ;;  %972 = vmatpush3.bf16.msra.mxu1 %v1110_v7  ;;  %v1134_v14 = vpack.c.bf16 %v35_v12, %v34_v11  ;;  %v19_v16 = vld [vmem:[%s1580_s1 + $0x28] sm:$0xff]  ;;  %v37_v18 = vld [vmem:[%s1580_s1 + $0xb8] sm:$0xff]  ;;  %v20_v21 = vld [vmem:[%s1580_s1 + $0x30] sm:$0xff] }
   0x6   :  { %941 = vmatprep.subr.bf16.mxu0 %v1112_v8  ;;  %974 = vmatprep.subr.bf16.mxu1 %v1112_v8  ;;  %v1150_v19 = vpack.c.bf16 %v19_v16, %v18_v15  ;;  %v1154_v20 = vpack.c.bf16 %v37_v18, %v36_v17  ;;  %v21_v22 = vld [vmem:[%s1580_s1 + $0x38] sm:$0xff]  ;;  %v38_v23 = vld [vmem:[%s1580_s1 + $0xc0] sm:$0xff]  ;;  %v39_v24 = vld [vmem:[%s1580_s1 + $0xc8] sm:$0xff] }
   0x7   :  { %v47_v25 = vld [vmem:[%s1581_s0 + $0x8] sm:$0xff]  ;;  %v658_v26 = vld [vmem:[%s1581_s0 + $0x78] sm:$0xff]  ;;  %v1176_v27 = vpack.c.bf16 %v21_v22, %v20_v21  ;;  %v1180_v28 = vpack.c.bf16 %v39_v24, %v38_v23  ;;  %v22_v29 = vld [vmem:[%s1580_s1 + $0x40] sm:$0xff] }
   0x8   :  { %v23_v30 = vld [vmem:[%s1580_s1 + $0x48] sm:$0xff]  ;;  %v40_v31 = vld [vmem:[%s1580_s1 + $0xd0] sm:$0xff]  ;;  %v41_v32 = vld [vmem:[%s1580_s1 + $0xd8] sm:$0xff]  ;;  %650 = vmatprep.mubr.msk.f32.mxu0 %vm60_vm0, %v47_v25  ;;  %672 = vmatprep.mubr.msk.f32.mxu1 %vm60_vm0, %v658_v26 }
   0x9   :  { %943 = vmatpush3.bf16.msra.mxu0 %v1130_v13  ;;  %976 = vmatpush3.bf16.msra.mxu1 %v1130_v13  ;;  %v1198_v33 = vpack.c.bf16 %v23_v30, %v22_v29  ;;  %v1202_v34 = vpack.c.bf16 %v41_v32, %v40_v31  ;;  %v24_v35 = vld [vmem:[%s1580_s1 + $0x50] sm:$0xff]  ;;  %v25_v36 = vld [vmem:[%s1580_s1 + $0x58] sm:$0xff]  ;;  %v42_v37 = vld [vmem:[%s1580_s1 + $0xe0] sm:$0xff] }
   0xa   :  { %945 = vmatprep.subr.bf16.mxu0 %v1134_v14  ;;  %978 = vmatprep.subr.bf16.mxu1 %v1134_v14  ;;  %v43_v38 = vld [vmem:[%s1580_s1 + $0xe8] sm:$0xff]  ;;  %v1218_v39 = vpack.c.bf16 %v25_v36, %v24_v35  ;;  %v26_v41 = vld [vmem:[%s1580_s1 + $0x60] sm:$0xff]  ;;  %v44_v43 = vld [vmem:[%s1580_s1 + $0xf0] sm:$0xff] }
   0xb   :  { %v1222_v40 = vpack.c.bf16 %v43_v38, %v42_v37  ;;  %v27_v42 = vld [vmem:[%s1580_s1 + $0x68] sm:$0xff]  ;;  %v45_v44 = vld [vmem:[%s1580_s1 + $0xf8] sm:$0x3]  ;;  %v28_v47 = vld [vmem:[%s1580_s1 + $0x70] sm:$0xff] }
   0xc   :  { %v1238_v45 = vpack.c.bf16 %v27_v42, %v26_v41  ;;  %v1242_v46 = vpack.c.bf16 %v45_v44, %v44_v43  ;;  %v29_v48 = vld [vmem:[%s1580_s1 + $0x78] sm:$0xff]  ;;  %vm1250_vm3 = vmpackc.low %vm82_vm1, %vm1069_vm2  ;;  %v46_v51 = vld [vmem:[%s1581_s0] sm:$0xff] }
   0xd   :  { %947 = vmatpush3.bf16.msra.mxu0 %v1150_v19  ;;  %980 = vmatpush3.bf16.msra.mxu1 %v1150_v19  ;;  %v1256_v50 = vpack.c.bf16 %v29_v48, %v28_v47  ;;  %v657_v52 = vld [vmem:[%s1581_s0 + $0x70] sm:$0xff]  ;;  %v49_v53 = vld [vmem:[%s1581_s0 + $0x18] sm:$0xff]  ;;  %v660_v54 = vld [vmem:[%s1581_s0 + $0x88] sm:$0xff] }
   0xe   :  { %949 = vmatprep.subr.bf16.mxu0 %v1154_v20  ;;  %982 = vmatprep.subr.bf16.mxu1 %v1154_v20  ;;  %v48_v55 = vld [vmem:[%s1581_s0 + $0x10] sm:$0xff]  ;;  %v659_v56 = vld [vmem:[%s1581_s0 + $0x80] sm:$0xff]  ;;  %v51_v57 = vld [vmem:[%s1581_s0 + $0x28] sm:$0xff] }
   0xf   :  { %v662_v58 = vld [vmem:[%s1581_s0 + $0x98] sm:$0xff]  ;;  %v50_v59 = vld [vmem:[%s1581_s0 + $0x20] sm:$0xff]  ;;  %v661_v60 = vld [vmem:[%s1581_s0 + $0x90] sm:$0xff] }
  0x10   :  { %v53_v61 = vld [vmem:[%s1581_s0 + $0x38] sm:$0xff]  ;;  %v664_v62 = vld [vmem:[%s1581_s0 + $0xa8] sm:$0xff]  ;;  %v52_v63 = vld [vmem:[%s1581_s0 + $0x30] sm:$0xff] }
  0x11   :  { %951 = vmatpush3.bf16.msra.mxu0 %v1176_v27  ;;  %984 = vmatpush3.bf16.msra.mxu1 %v1176_v27  ;;  %v663_v0 = vld [vmem:[%s1581_s0 + $0xa0] sm:$0xff]  ;;  %v55_v1 = vld [vmem:[%s1581_s0 + $0x48] sm:$0xff]  ;;  %v666_v2 = vld [vmem:[%s1581_s0 + $0xb8] sm:$0xff] }
  0x12   :  { %953 = vmatprep.subr.bf16.mxu0 %v1180_v28  ;;  %986 = vmatprep.subr.bf16.mxu1 %v1180_v28  ;;  %v665_v4 = vld [vmem:[%s1581_s0 + $0xb0] sm:$0xff]  ;;  %v57_v5 = vld [vmem:[%s1581_s0 + $0x58] sm:$0xff]  ;;  %v668_v6 = vld [vmem:[%s1581_s0 + $0xc8] sm:$0xff] }
  0x13   :  { %v59_v9 = vld [vmem:[%s1581_s0 + $0x68] sm:$0x3]  ;;  %v670_v10 = vld [vmem:[%s1581_s0 + $0xd8] sm:$0x3]  ;;  %v58_v11 = vld [vmem:[%s1581_s0 + $0x60] sm:$0x3] }
  0x14   :  { %v669_v12 = vld [vmem:[%s1581_s0 + $0xd0] sm:$0x3]  ;;  %v679_v15 = vld [vmem:[%s1581_s0 + $0xe0] sm:$0xff]  ;;  %v682_v17 = vld [vmem:[%s1581_s0 + $0xf8] sm:$0xff] }
  0x15   :  { %955 = vmatpush3.bf16.msra.mxu0 %v1198_v33  ;;  %988 = vmatpush3.bf16.msra.mxu1 %v1198_v33  ;;  %v701_v16 = vld [vmem:[%s1581_s0 + $0x150] sm:$0xff]  ;;  %v704_v18 = vld [vmem:[%s1581_s0 + $0x168] sm:$0xff]  ;;  %v706_v22 = vld [vmem:[%s1581_s0 + $0x178] sm:$0xff] }
  0x16   :  { %957 = vmatprep.subr.bf16.mxu0 %v1202_v34  ;;  %990 = vmatprep.subr.bf16.mxu1 %v1202_v34  ;;  %v684_v21 = vld [vmem:[%s1581_s0 + $0x108] sm:$0xff]  ;;  %v683_v23 = vld [vmem:[%s1581_s0 + $0x100] sm:$0xff]  ;;  %v705_v24 = vld [vmem:[%s1581_s0 + $0x170] sm:$0xff] }
  0x17   :  { %v686_v25 = vld [vmem:[%s1581_s0 + $0x118] sm:$0xff]  ;;  %v708_v26 = vld [vmem:[%s1581_s0 + $0x188] sm:$0xff]  ;;  %v687_v31 = vld [vmem:[%s1581_s0 + $0x120] sm:$0xff] }
  0x18   :  { %v688_v29 = vld [vmem:[%s1581_s0 + $0x128] sm:$0xff]  ;;  %v710_v30 = vld [vmem:[%s1581_s0 + $0x198] sm:$0xff]  ;;  %v709_v32 = vld [vmem:[%s1581_s0 + $0x190] sm:$0xff] }
  0x19   :  { %959 = vmatpush3.bf16.msra.mxu0 %v1218_v39  ;;  %992 = vmatpush3.bf16.msra.mxu1 %v1218_v39  ;;  %v689_v35 = vld [vmem:[%s1581_s0 + $0x130] sm:$0xff]  ;;  %v711_v36 = vld [vmem:[%s1581_s0 + $0x1a0] sm:$0xff]  ;;  %v692_v37 = vld [vmem:[%s1581_s0 + $0x148] sm:$0x3] }
  0x1a   :  { %961 = vmatprep.subr.bf16.mxu0 %v1222_v40  ;;  %994 = vmatprep.subr.bf16.mxu1 %v1222_v40  ;;  %v714_v38 = vld [vmem:[%s1581_s0 + $0x1b8] sm:$0x3] }
  0x1d   :  { %963 = vmatpush3.bf16.msra.mxu0 %v1238_v45  ;;  %996 = vmatpush3.bf16.msra.mxu1 %v1238_v45 }
  0x1e   :  { %966 = vmatprep.subr.msk.bf16.mxu0 %vm1250_vm3, %v1242_v46  ;;  %999 = vmatprep.subr.msk.bf16.mxu1 %vm1250_vm3, %v1242_v46 }
  0x21   :  { %968 = vmatpush3.bf16.msra.mxu0 %v1256_v50  ;;  %1001 = vmatpush3.bf16.msra.mxu1 %v1256_v50 }
  0x22   :  { %1003 = vmatprep.subr.bf16.mxu0 %v1099_v3  ;;  %1036 = vmatprep.subr.bf16.mxu1 %v1099_v3  ;;  %v54_v3 = vld [vmem:[%s1581_s0 + $0x40] sm:$0xff] }
  0x24   :  { %151 = vmatmul.mubr.f32.vlgmr.msra.gmra.mrb[0].mxu0 %v46_v51  ;;  %287 = vmatmul.mubr.f32.vlgmr.msra.gmra.mrb[0].mxu1 %v657_v52 }
  0x25   :  { %1005 = vmatpush3.bf16.msra.mxu0 %v1110_v7  ;;  %1038 = vmatpush3.bf16.msra.mxu1 %v1110_v7  ;;  %v56_v7 = vld [vmem:[%s1581_s0 + $0x50] sm:$0xff] }
  0x26   :  { %1007 = vmatprep.subr.bf16.mxu0 %v1112_v8  ;;  %1040 = vmatprep.subr.bf16.mxu1 %v1112_v8  ;;  %v667_v8 = vld [vmem:[%s1581_s0 + $0xc0] sm:$0xff] }
  0x27   :  { %651 = vmatprep.mubr.msk.f32.mxu0 %vm60_vm0, %v49_v53  ;;  %673 = vmatprep.mubr.msk.f32.mxu1 %vm60_vm0, %v660_v54 }
  0x28   :  { %156 = vmatmul.mubr.f32.gmra.mrb[2].mxu0 %v48_v55  ;;  %292 = vmatmul.mubr.f32.gmra.mrb[2].mxu1 %v659_v56 }
  0x29   :  { %1009 = vmatpush3.bf16.msra.mxu0 %v1130_v13  ;;  %1042 = vmatpush3.bf16.msra.mxu1 %v1130_v13  ;;  %v680_v13 = vld [vmem:[%s1581_s0 + $0xe8] sm:$0xff] }
  0x2a   :  { %1011 = vmatprep.subr.bf16.mxu0 %v1134_v14  ;;  %1044 = vmatprep.subr.bf16.mxu1 %v1134_v14  ;;  %v702_v14 = vld [vmem:[%s1581_s0 + $0x158] sm:$0xff] }
  0x2b   :  { %652 = vmatprep.mubr.msk.f32.mxu0 %vm60_vm0, %v51_v57  ;;  %674 = vmatprep.mubr.msk.f32.mxu1 %vm60_vm0, %v662_v58 }
  0x2c   :  { %161 = vmatmul.mubr.f32.gmra.mrb[4].mxu0 %v50_v59  ;;  %297 = vmatmul.mubr.f32.gmra.mrb[4].mxu1 %v661_v60 }
  0x2d   :  { %1013 = vmatpush3.bf16.msra.mxu0 %v1150_v19  ;;  %1046 = vmatpush3.bf16.msra.mxu1 %v1150_v19  ;;  %v681_v19 = vld [vmem:[%s1581_s0 + $0xf0] sm:$0xff] }
  0x2e   :  { %1015 = vmatprep.subr.bf16.mxu0 %v1154_v20  ;;  %1048 = vmatprep.subr.bf16.mxu1 %v1154_v20  ;;  %v703_v20 = vld [vmem:[%s1581_s0 + $0x160] sm:$0xff] }
  0x2f   :  { %653 = vmatprep.mubr.msk.f32.mxu0 %vm60_vm0, %v53_v61  ;;  %675 = vmatprep.mubr.msk.f32.mxu1 %vm60_vm0, %v664_v62 }
  0x30   :  { %166 = vmatmul.mubr.f32.gmra.mrb[6].mxu0 %v52_v63  ;;  %302 = vmatmul.mubr.f32.gmra.mrb[6].mxu1 %v663_v0 }
  0x31   :  { %1017 = vmatpush3.bf16.msra.mxu0 %v1176_v27  ;;  %1050 = vmatpush3.bf16.msra.mxu1 %v1176_v27  ;;  %v685_v27 = vld [vmem:[%s1581_s0 + $0x110] sm:$0xff] }
  0x32   :  { %1019 = vmatprep.subr.bf16.mxu0 %v1180_v28  ;;  %1052 = vmatprep.subr.bf16.mxu1 %v1180_v28  ;;  %v707_v28 = vld [vmem:[%s1581_s0 + $0x180] sm:$0xff] }
  0x33   :  { %654 = vmatprep.mubr.msk.f32.mxu0 %vm60_vm0, %v55_v1  ;;  %676 = vmatprep.mubr.msk.f32.mxu1 %vm60_vm0, %v666_v2 }
  0x34   :  { %171 = vmatmul.mubr.f32.gmra.mrb[8].mxu0 %v54_v3  ;;  %307 = vmatmul.mubr.f32.gmra.mrb[8].mxu1 %v665_v4 }
  0x35   :  { %1021 = vmatpush3.bf16.msra.mxu0 %v1198_v33  ;;  %1054 = vmatpush3.bf16.msra.mxu1 %v1198_v33  ;;  %v690_v33 = vld [vmem:[%s1581_s0 + $0x138] sm:$0xff] }
  0x36   :  { %1023 = vmatprep.subr.bf16.mxu0 %v1202_v34  ;;  %1056 = vmatprep.subr.bf16.mxu1 %v1202_v34  ;;  %v712_v34 = vld [vmem:[%s1581_s0 + $0x1a8] sm:$0xff] }
  0x37   :  { %655 = vmatprep.mubr.msk.f32.mxu0 %vm60_vm0, %v57_v5  ;;  %677 = vmatprep.mubr.msk.f32.mxu1 %vm60_vm0, %v668_v6 }
  0x38   :  { %176 = vmatmul.mubr.f32.gmra.mrb[10].mxu0 %v56_v7  ;;  %312 = vmatmul.mubr.f32.gmra.mrb[10].mxu1 %v667_v8 }
  0x39   :  { %1025 = vmatpush3.bf16.msra.mxu0 %v1218_v39  ;;  %1058 = vmatpush3.bf16.msra.mxu1 %v1218_v39  ;;  %v691_v39 = vld [vmem:[%s1581_s0 + $0x140] sm:$0x3] }
  0x3a   :  { %1027 = vmatprep.subr.bf16.mxu0 %v1222_v40  ;;  %1060 = vmatprep.subr.bf16.mxu1 %v1222_v40  ;;  %v713_v40 = vld [vmem:[%s1581_s0 + $0x1b0] sm:$0x3] }
  0x3b   :  { %656 = vmatprep.mubr.msk.f32.mxu0 %vm60_vm0, %v59_v9  ;;  %678 = vmatprep.mubr.msk.f32.mxu1 %vm60_vm0, %v670_v10 }
  0x3c   :  { %181 = vmatmul.mubr.f32.gmra.mrb[12].mxu0 %v58_v11  ;;  %317 = vmatmul.mubr.f32.gmra.mrb[12].mxu1 %v669_v12 }
  0x3d   :  { %1029 = vmatpush3.bf16.msra.mxu0 %v1238_v45  ;;  %1062 = vmatpush3.bf16.msra.mxu1 %v1238_v45 }
  0x3e   :  { %1032 = vmatprep.subr.msk.bf16.mxu0 %vm1250_vm3, %v1242_v46  ;;  %1065 = vmatprep.subr.msk.bf16.mxu1 %vm1250_vm3, %v1242_v46 }
  0x3f   :  { %694 = vmatprep.mubr.msk.f32.mxu0 %vm60_vm0, %v680_v13  ;;  %716 = vmatprep.mubr.msk.f32.mxu1 %vm60_vm0, %v702_v14 }
  0x41   :  { %1034 = vmatpush3.bf16.msra.mxu0 %v1256_v50  ;;  %1067 = vmatpush3.bf16.msra.mxu1 %v1256_v50 }
  0x44   :  { %423 = vmatmul.mubr.f32.vlgmr.msra.gmra.mrb[14].mxu0 %v679_v15  ;;  %559 = vmatmul.mubr.f32.vlgmr.msra.gmra.mrb[14].mxu1 %v701_v16 }
  0x45   :  { %695 = vmatprep.mubr.msk.f32.mxu0 %vm60_vm0, %v682_v17  ;;  %717 = vmatprep.mubr.msk.f32.mxu1 %vm60_vm0, %v704_v18 }
  0x48   :  { %428 = vmatmul.mubr.f32.gmra.mrb[16].mxu0 %v681_v19  ;;  %564 = vmatmul.mubr.f32.gmra.mrb[16].mxu1 %v703_v20 }
  0x49   :  { %696 = vmatprep.mubr.msk.f32.mxu0 %vm60_vm0, %v684_v21  ;;  %718 = vmatprep.mubr.msk.f32.mxu1 %vm60_vm0, %v706_v22 }
  0x4c   :  { %433 = vmatmul.mubr.f32.gmra.mrb[18].mxu0 %v683_v23  ;;  %569 = vmatmul.mubr.f32.gmra.mrb[18].mxu1 %v705_v24 }
  0x4d   :  { %697 = vmatprep.mubr.msk.f32.mxu0 %vm60_vm0, %v686_v25  ;;  %719 = vmatprep.mubr.msk.f32.mxu1 %vm60_vm0, %v708_v26 }
  0x50   :  { %438 = vmatmul.mubr.f32.gmra.mrb[20].mxu0 %v685_v27  ;;  %574 = vmatmul.mubr.f32.gmra.mrb[20].mxu1 %v707_v28 }
  0x51   :  { %698 = vmatprep.mubr.msk.f32.mxu0 %vm60_vm0, %v688_v29  ;;  %720 = vmatprep.mubr.msk.f32.mxu1 %vm60_vm0, %v710_v30 }
  0x54   :  { %443 = vmatmul.mubr.f32.gmra.mrb[22].mxu0 %v687_v31  ;;  %579 = vmatmul.mubr.f32.gmra.mrb[22].mxu1 %v709_v32 }
  0x55   :  { %699 = vmatprep.mubr.msk.f32.mxu0 %vm60_vm0, %v690_v33  ;;  %721 = vmatprep.mubr.msk.f32.mxu1 %vm60_vm0, %v712_v34 }
  0x58   :  { %448 = vmatmul.mubr.f32.gmra.mrb[24].mxu0 %v689_v35  ;;  %584 = vmatmul.mubr.f32.gmra.mrb[24].mxu1 %v711_v36  ;;  %v1529_v35 = vld [vmem:[%s1582_s2] ss:$0 sm:$0xff] }
  0x59   :  { %700 = vmatprep.mubr.msk.f32.mxu0 %vm60_vm0, %v692_v37  ;;  %722 = vmatprep.mubr.msk.f32.mxu1 %vm60_vm0, %v714_v38 }
  0x5c   :  { %453 = vmatmul.mubr.f32.gmra.mrb[26].mxu0 %v691_v39  ;;  %589 = vmatmul.mubr.f32.gmra.mrb[26].mxu1 %v713_v40 }
  0xf7   :  { %v756_v41 = vpop.f32.mrb[0].mxu0  ;;  %v809_v42 = vpop.f32.mrb[0].mxu1 }
  0xf8   :  { %v757_v43 = vpop.f32.mrb[1].mxu0  ;;  %v810_v44 = vpop.f32.mrb[1].mxu1 }
  0xf9   :  { %v758_v45 = vadd.f32 %v757_v43, %v756_v41  ;;  %v811_v46 = vadd.f32 %v810_v44, %v809_v42 }
  0xfb   :  { %v594_v47 = vmax.f32 %v758_v45, %v811_v46  ;;  %v759_v48 = vpop.f32.mrb[2].mxu0  ;;  %v812_v49 = vpop.f32.mrb[2].mxu1 }
  0xfc   :  { %v760_v50 = vpop.f32.mrb[3].mxu0  ;;  %v813_v51 = vpop.f32.mrb[3].mxu1 }
  0xfd   :  { %v1490_v52 = vadd.f32 %v760_v50, %v759_v48  ;;  %v1492_v53 = vadd.f32 %v813_v51, %v812_v49 }
  0xff   :  { %v595_v54 = vmax.f32 %v1490_v52, %v1492_v53  ;;  %v762_v55 = vpop.f32.mrb[4].mxu0  ;;  %v815_v56 = vpop.f32.mrb[4].mxu1 }
 0x100   :  { %v763_v57 = vpop.f32.mrb[5].mxu0  ;;  %v816_v58 = vpop.f32.mrb[5].mxu1 }
 0x101   :  { %v1496_v59 = vadd.f32 %v763_v57, %v762_v55  ;;  %v1498_v60 = vadd.f32 %v816_v58, %v815_v56 }
 0x103   :  { %v596_v61 = vmax.f32 %v1496_v59, %v1498_v60  ;;  %v765_v62 = vpop.f32.mrb[6].mxu0  ;;  %v818_v63 = vpop.f32.mrb[6].mxu1 }
 0x104   :  { %v766_v0 = vpop.f32.mrb[7].mxu0  ;;  %v819_v1 = vpop.f32.mrb[7].mxu1 }
 0x105   :  { %v1502_v2 = vadd.f32 %v766_v0, %v765_v62  ;;  %v1504_v3 = vadd.f32 %v819_v1, %v818_v63 }
 0x107   :  { %v597_v4 = vmax.f32 %v1502_v2, %v1504_v3  ;;  %v768_v5 = vpop.f32.mrb[8].mxu0  ;;  %v821_v6 = vpop.f32.mrb[8].mxu1 }
 0x108   :  { %v769_v7 = vpop.f32.mrb[9].mxu0  ;;  %v822_v8 = vpop.f32.mrb[9].mxu1 }
 0x109   :  { %v1508_v9 = vadd.f32 %v769_v7, %v768_v5  ;;  %v1510_v10 = vadd.f32 %v822_v8, %v821_v6 }
 0x10b   :  { %v598_v11 = vmax.f32 %v1508_v9, %v1510_v10  ;;  %v771_v12 = vpop.f32.mrb[10].mxu0  ;;  %v824_v13 = vpop.f32.mrb[10].mxu1 }
 0x10c   :  { %v772_v14 = vpop.f32.mrb[11].mxu0  ;;  %v825_v15 = vpop.f32.mrb[11].mxu1 }
 0x10d   :  { %v1514_v16 = vadd.f32 %v772_v14, %v771_v12  ;;  %v1516_v17 = vadd.f32 %v825_v15, %v824_v13 }
 0x10f   :  { %v599_v18 = vmax.f32 %v1514_v16, %v1516_v17  ;;  %v774_v19 = vpop.f32.mrb[12].mxu0  ;;  %v827_v20 = vpop.f32.mrb[12].mxu1 }
 0x110   :  { %v775_v21 = vpop.f32.mrb[13].mxu0  ;;  %v828_v22 = vpop.f32.mrb[13].mxu1 }
 0x111   :  { %v1520_v23 = vadd.f32 %v775_v21, %v774_v19  ;;  %v1522_v24 = vadd.f32 %v828_v22, %v827_v20 }
 0x113   :  { %v600_v25 = vmax.f32 %v1520_v23, %v1522_v24 }
 0x117   :  { %v862_v26 = vpop.f32.mrb[14].mxu0  ;;  %v915_v27 = vpop.f32.mrb[14].mxu1 }
 0x118   :  { %v863_v28 = vpop.f32.mrb[15].mxu0  ;;  %v916_v29 = vpop.f32.mrb[15].mxu1 }
 0x119   :  { %v864_v30 = vadd.f32 %v863_v28, %v862_v26  ;;  %v917_v31 = vadd.f32 %v916_v29, %v915_v27 }
 0x11b   :  { %v601_v32 = vmax.f32 %v864_v30, %v917_v31  ;;  %v865_v33 = vpop.f32.mrb[16].mxu0  ;;  %v918_v34 = vpop.f32.mrb[16].mxu1 }
 0x11c   :  { %v866_v36 = vpop.f32.mrb[17].mxu0  ;;  %v919_v37 = vpop.f32.mrb[17].mxu1 }
 0x11d   :  { %v608_v38 = vmax.f32 %v594_v47, %v601_v32  ;;  %v867_v39 = vadd.f32 %v866_v36, %v865_v33  ;;  %v920_v40 = vadd.f32 %v919_v37, %v918_v34 }
 0x11f   :  { %v622_v41 = vadd.f32 %v1529_v35, %v608_v38  ;;  %v602_v42 = vmax.f32 %v867_v39, %v920_v40  ;;  %v868_v43 = vpop.f32.mrb[18].mxu0  ;;  %v921_v44 = vpop.f32.mrb[18].mxu1 }
 0x120   :  { %v869_v45 = vpop.f32.mrb[19].mxu0  ;;  %v922_v46 = vpop.f32.mrb[19].mxu1 }
 0x121   :  { %v629_v48 = vmax.f32 %v622_v41, 0.0  ;;  %v609_v49 = vmax.f32 %v595_v54, %v602_v42  ;;  %v870_v50 = vadd.f32 %v869_v45, %v868_v43  ;;  %v923_v51 = vadd.f32 %v922_v46, %v921_v44 }
 0x123   :  { %637 = vst.msk [vmem:[%s1583_s3] sm:$0xff] %vm636_vm4, %v629_v48  ;;  %v623_v47 = vadd.f32 %v1529_v35, %v609_v49  ;;  %v603_v52 = vmax.f32 %v870_v50, %v923_v51  ;;  %v871_v53 = vpop.f32.mrb[20].mxu0  ;;  %v924_v55 = vpop.f32.mrb[20].mxu1 }
 0x124   :  { %v872_v56 = vpop.f32.mrb[21].mxu0  ;;  %v925_v57 = vpop.f32.mrb[21].mxu1 }
 0x125   :  { %v630_v58 = vmax.f32 %v623_v47, 0.0  ;;  %v610_v62 = vmax.f32 %v596_v61, %v603_v52  ;;  %v873_v54 = vadd.f32 %v872_v56, %v871_v53  ;;  %v926_v63 = vadd.f32 %v925_v57, %v924_v55 }
 0x127   :  { %638 = vst.msk [vmem:[%s1583_s3 + $0x8] sm:$0xff] %vm636_vm4, %v630_v58  ;;  %v624_v0 = vadd.f32 %v1529_v35, %v610_v62  ;;  %v604_v1 = vmax.f32 %v873_v54, %v926_v63  ;;  %v874_v5 = vpop.f32.mrb[22].mxu0  ;;  %v927_v6 = vpop.f32.mrb[22].mxu1 }
 0x128   :  { %v875_v7 = vpop.f32.mrb[23].mxu0  ;;  %v928_v8 = vpop.f32.mrb[23].mxu1 }
 0x129   :  { %v631_v12 = vmax.f32 %v624_v0, 0.0  ;;  %v611_v59 = vmax.f32 %v597_v4, %v604_v1  ;;  %v876_v60 = vadd.f32 %v875_v7, %v874_v5  ;;  %v929_v61 = vadd.f32 %v928_v8, %v927_v6 }
 0x12b   :  { %639 = vst.msk [vmem:[%s1583_s3 + $0x10] sm:$0xff] %vm636_vm4, %v631_v12  ;;  %v625_v13 = vadd.f32 %v1529_v35, %v611_v59  ;;  %v605_v14 = vmax.f32 %v876_v60, %v929_v61  ;;  %v877_v15 = vpop.f32.mrb[24].mxu0  ;;  %v930_v19 = vpop.f32.mrb[24].mxu1 }
 0x12c   :  { %v878_v20 = vpop.f32.mrb[25].mxu0  ;;  %v931_v21 = vpop.f32.mrb[25].mxu1 }
 0x12d   :  { %v632_v22 = vmax.f32 %v625_v13, 0.0  ;;  %v612_v2 = vmax.f32 %v598_v11, %v605_v14  ;;  %v879_v3 = vadd.f32 %v878_v20, %v877_v15  ;;  %v932_v4 = vadd.f32 %v931_v21, %v930_v19 }
 0x12f   :  { %640 = vst.msk [vmem:[%s1583_s3 + $0x18] sm:$0xff] %vm636_vm4, %v632_v22  ;;  %v626_v26 = vadd.f32 %v1529_v35, %v612_v2  ;;  %v606_v27 = vmax.f32 %v879_v3, %v932_v4  ;;  %v880_v28 = vpop.f32.mrb[26].mxu0  ;;  %v933_v29 = vpop.f32.mrb[26].mxu1 }
 0x130   :  { %v881_v30 = vpop.f32.mrb[27].mxu0  ;;  %v934_v31 = vpop.f32.mrb[27].mxu1 }
 0x131   :  { %v633_v32 = vmax.f32 %v626_v26, 0.0  ;;  %v613_v9 = vmax.f32 %v599_v18, %v606_v27  ;;  %v882_v10 = vadd.f32 %v881_v30, %v880_v28  ;;  %v935_v11 = vadd.f32 %v934_v31, %v933_v29 }
 0x133   :  { %641 = vst.msk [vmem:[%s1583_s3 + $0x20] sm:$0xff] %vm636_vm4, %v633_v32  ;;  %v627_v33 = vadd.f32 %v1529_v35, %v613_v9  ;;  %v607_v34 = vmax.f32 %v882_v10, %v935_v11 }
 0x135   :  { %v634_v36 = vmax.f32 %v627_v33, 0.0  ;;  %v614_v37 = vmax.f32 %v600_v25, %v607_v34 }
 0x137   :  { %642 = vst.msk [vmem:[%s1583_s3 + $0x28] sm:$0xff] %vm636_vm4, %v634_v36  ;;  %v628_v16 = vadd.f32 %v1529_v35, %v614_v37 }
 0x139   :  { %v635_v17 = vmax.f32 %v628_v16, 0.0 }
 0x13b   :  { %644 = vst.msk [vmem:[%s1583_s3 + $0x30] sm:$0x3] %vm643_vm5, %v635_v17 }

// kernel: a_call__.5
= control target key start
LH: loop header
LB: loop body
LE: loop exit
PB: predicated region body
PF: predicated region fallthrough
CT: control target
= control target key end

     0   :  { %v551_v3 = vmov 0.0|0.0   ;;  %v552_v29 = vmov 1983009808   ;;  %v97_v31 = vlaneseq  ;;  %s840_s0 = inlined_call_operand.vmem [shape: f32[2,500], index: 0, kind: input, shape index: {}]   ;;  %s841_s1 = inlined_call_operand.vmem [shape: f32[500,50], index: 1, kind: input, shape index: {}]   ;;  %s842_s2 = inlined_call_operand.vmem [shape: f32[1,50], index: 2, kind: input, shape index: {}]   ;;  %s843_s3 = inlined_call_operand.vmem [shape: f32[50,10], index: 3, kind: input, shape index: {}]   ;;  %s844_s4 = inlined_call_operand.vmem [shape: f32[1,10], index: 4, kind: input, shape index: {}]   ;;  %s845_s5 = inlined_call_operand.hbm [shape: f32[2,10], index: 5, kind: output, shape index: {}]  }
   0x1   :  { %v54_v0 = vld [vmem:[%s841_s1 + $0x100] sm:$0xff]  ;;  %v55_v1 = vld [vmem:[%s841_s1 + $0x108] sm:$0xff]  ;;  %v56_v2 = vld [vmem:[%s841_s1 + $0x110] sm:$0xff]  ;;  %467 = vmatprep.subr.bf16.mxu1 %v551_v3  ;;  %v95_v30 = vunpack.c.l.s4 %v552_v29 }
   0x2   :  { %v468_v4 = vpack.c.bf16 %v55_v1, %v54_v0  ;;  %v57_v5 = vld [vmem:[%s841_s1 + $0x118] sm:$0xff]  ;;  %v58_v7 = vld [vmem:[%s841_s1 + $0x120] sm:$0xff]  ;;  %v59_v8 = vld [vmem:[%s841_s1 + $0x128] sm:$0xff]  ;;  %v98_v42 = vshrl.u32 %v97_v31, 7 }
   0x3   :  { %v471_v6 = vpack.c.bf16 %v57_v5, %v56_v2  ;;  %v38_v9 = vld [vmem:[%s841_s1 + $0x80] sm:$0xff]  ;;  %v39_v10 = vld [vmem:[%s841_s1 + $0x88] sm:$0xff]  ;;  %v40_v15 = vld [vmem:[%s841_s1 + $0x90] sm:$0xff]  ;;  %v474_v18 = vpack.c.bf16 %v59_v8, %v58_v7  ;;  %v96_v41 = vunpack.c.0.s8 %v95_v30 }
   0x4   :  { %469 = vmatpush1.bf16.msra.mxu1 %v468_v4  ;;  %v22_v11 = vld [vmem:[%s841_s1] sm:$0xff]  ;;  %v435_v12 = vpack.c.bf16 %v39_v10, %v38_v9  ;;  %v23_v13 = vld [vmem:[%s841_s1 + $0x8] sm:$0xff]  ;;  %v41_v16 = vld [vmem:[%s841_s1 + $0x98] sm:$0xff] }
   0x5   :  { %470 = vmatprep.subr.bf16.mxu1 %v551_v3  ;;  %v437_v14 = vpack.c.bf16 %v23_v13, %v22_v11  ;;  %v24_v17 = vld [vmem:[%s841_s1 + $0x10] sm:$0xff]  ;;  %v439_v20 = vpack.c.bf16 %v41_v16, %v40_v15  ;;  %v25_v21 = vld [vmem:[%s841_s1 + $0x18] sm:$0xff]  ;;  %v42_v24 = vld [vmem:[%s841_s1 + $0xa0] sm:$0xff]  ;;  %v99_v52 = vsub.s32 %v96_v41, %v98_v42 }
   0x6   :  { %v60_v19 = vld [vmem:[%s841_s1 + $0x130] sm:$0xff]  ;;  %436 = vmatprep.subr.bf16.mxu0 %v435_v12  ;;  %v61_v22 = vld [vmem:[%s841_s1 + $0x138] sm:$0xff]  ;;  %v441_v23 = vpack.c.bf16 %v25_v21, %v24_v17  ;;  %v43_v25 = vld [vmem:[%s841_s1 + $0xa8] sm:$0xff] }
   0x7   :  { %438 = vmatpush3.bf16.msra.mxu0 %v437_v14  ;;  %v443_v26 = vpack.c.bf16 %v43_v25, %v42_v24  ;;  %v26_v27 = vld [vmem:[%s841_s1 + $0x20] sm:$0xff]  ;;  %v27_v28 = vld [vmem:[%s841_s1 + $0x28] sm:$0xff]  ;;  %v44_v32 = vld [vmem:[%s841_s1 + $0xb0] sm:$0xff]  ;;  %v477_v34 = vpack.c.bf16 %v61_v22, %v60_v19 }
   0x8   :  { %472 = vmatpush1.bf16.msra.mxu1 %v471_v6  ;;  %440 = vmatprep.subr.bf16.mxu0 %v439_v20  ;;  %v45_v33 = vld [vmem:[%s841_s1 + $0xb8] sm:$0xff]  ;;  %v62_v35 = vld [vmem:[%s841_s1 + $0x140] sm:$0xff]  ;;  %v63_v36 = vld [vmem:[%s841_s1 + $0x148] sm:$0xff]  ;;  %v445_v37 = vpack.c.bf16 %v27_v28, %v26_v27 }
   0x9   :  { %473 = vmatprep.subr.bf16.mxu1 %v551_v3  ;;  %v447_v38 = vpack.c.bf16 %v45_v33, %v44_v32  ;;  %v28_v39 = vld [vmem:[%s841_s1 + $0x30] sm:$0xff]  ;;  %v29_v40 = vld [vmem:[%s841_s1 + $0x38] sm:$0xff]  ;;  %v46_v43 = vld [vmem:[%s841_s1 + $0xc0] sm:$0xff]  ;;  %v480_v45 = vpack.c.bf16 %v63_v36, %v62_v35 }
   0xa   :  { %v47_v44 = vld [vmem:[%s841_s1 + $0xc8] sm:$0xff]  ;;  %v64_v46 = vld [vmem:[%s841_s1 + $0x150] sm:$0xff]  ;;  %v65_v47 = vld [vmem:[%s841_s1 + $0x158] sm:$0xff]  ;;  %v449_v48 = vpack.c.bf16 %v29_v40, %v28_v39 }
   0xb   :  { %442 = vmatpush3.bf16.msra.mxu0 %v441_v23  ;;  %v451_v49 = vpack.c.bf16 %v47_v44, %v46_v43  ;;  %v30_v50 = vld [vmem:[%s841_s1 + $0x40] sm:$0xff]  ;;  %v31_v51 = vld [vmem:[%s841_s1 + $0x48] sm:$0xff]  ;;  %v48_v53 = vld [vmem:[%s841_s1 + $0xd0] sm:$0xff]  ;;  %v483_v55 = vpack.c.bf16 %v65_v47, %v64_v46 }
   0xc   :  { %475 = vmatpush1.bf16.msra.mxu1 %v474_v18  ;;  %444 = vmatprep.subr.bf16.mxu0 %v443_v26  ;;  %v49_v54 = vld [vmem:[%s841_s1 + $0xd8] sm:$0xff]  ;;  %v66_v56 = vld [vmem:[%s841_s1 + $0x160] sm:$0xff]  ;;  %v67_v57 = vld [vmem:[%s841_s1 + $0x168] sm:$0xff]  ;;  %v453_v58 = vpack.c.bf16 %v31_v51, %v30_v50 }
   0xd   :  { %476 = vmatprep.subr.bf16.mxu1 %v551_v3  ;;  %v21_v59 = vld [vmem:[%s840_s0] sm:$0xff]  ;;  %v455_v60 = vpack.c.bf16 %v49_v54, %v48_v53  ;;  %v32_v61 = vld [vmem:[%s841_s1 + $0x50] sm:$0xff]  ;;  %v33_v62 = vld [vmem:[%s841_s1 + $0x58] sm:$0xff] }
   0xe   :  { %v93_v63 = vcombine.high %v21_v59, %v21_v59  ;;  %v100_v0 = vrot.slane %v21_v59, %v99_v52  ;;  %v50_v1 = vld [vmem:[%s841_s1 + $0xe0] sm:$0xff]  ;;  %v51_v2 = vld [vmem:[%s841_s1 + $0xe8] sm:$0xff] }
   0xf   :  { %446 = vmatpush3.bf16.msra.mxu0 %v445_v37 }
  0x10   :  { %478 = vmatpush1.bf16.msra.mxu1 %v477_v34  ;;  %448 = vmatprep.subr.bf16.mxu0 %v447_v38 }
  0x11   :  { %479 = vmatprep.subr.bf16.mxu1 %v551_v3 }
  0x13   :  { %450 = vmatpush3.bf16.msra.mxu0 %v449_v48 }
  0x14   :  { %481 = vmatpush1.bf16.msra.mxu1 %v480_v45  ;;  %452 = vmatprep.subr.bf16.mxu0 %v451_v49 }
  0x15   :  { %482 = vmatprep.subr.bf16.mxu1 %v551_v3 }
  0x16   :  { %10 = vsyncpa [#allocation3], 0  ;;  %v486_v4 = vpack.c.bf16 %v67_v57, %v66_v56  ;;  %v108_v5 = vcombine.high %v100_v0, %v100_v0  ;;  %v715_v6 = vrot.slane %v93_v63, %v99_v52  ;;  %v68_v7 = vld [vmem:[%s841_s1 + $0x170] sm:$0xff]  ;;  %v69_v8 = vld [vmem:[%s841_s1 + $0x178] sm:$0xff]  ;;  %v457_v9 = vpack.c.bf16 %v33_v62, %v32_v61  ;;  %s555_s9 = smov [#allocation2]  }
  0x17   :  { %454 = vmatpush3.bf16.msra.mxu0 %v453_v58  ;;  %vm113_vm0 = vcmask 949248   ;;  %v459_v10 = vpack.c.bf16 %v51_v2, %v50_v1  ;;  %v34_v11 = vld [vmem:[%s841_s1 + $0x60] sm:$0xff]  ;;  %v35_v12 = vld [vmem:[%s841_s1 + $0x68] sm:$0xff]  ;;  %v52_v14 = vld [vmem:[%s841_s1 + $0xf0] sm:$0xff]  ;;  %v489_v16 = vpack.c.bf16 %v69_v8, %v68_v7  ;;  %v553_v46 = vmov 0.0   ;;  %s361_s10 = sshll.u32 %s555_s9, 4  ;;  %s362_s10 = int_to_ptr.vmem [resolvable:$true] %s361_s10 }
  0x18   :  { %484 = vmatpush1.bf16.msra.mxu1 %v483_v55  ;;  %456 = vmatprep.subr.bf16.mxu0 %v455_v60  ;;  %v109_v13 = vcombine.high %v715_v6, %v715_v6  ;;  %v53_v15 = vld [vmem:[%s841_s1 + $0xf8] sm:$0xff]  ;;  %v70_v17 = vld [vmem:[%s841_s1 + $0x180] sm:$0xff]  ;;  %v71_v18 = vld [vmem:[%s841_s1 + $0x188] sm:$0xff]  ;;  %v461_v19 = vpack.c.bf16 %v35_v12, %v34_v11  ;;  %vm116_vm1 = vcmask 1043456   ;;  %vm279_vm2 = vcmask 1041408   ;;  %p532_p1 = scmp.lt.s32.totalorder %s362_s10, %s362_s10 }
  0x19   :  { %485 = vmatprep.subr.bf16.mxu1 %v551_v3  ;;  %184 = vmatprep.mubr.f32.mxu0 %v108_v5  ;;  %v463_v20 = vpack.c.bf16 %v53_v15, %v52_v14  ;;  %v36_v21 = vld [vmem:[%s841_s1 + $0x70] sm:$0xff]  ;;  %v37_v22 = vld [vmem:[%s841_s1 + $0x78] sm:$0xff]  ;;  %v492_v23 = vpack.c.bf16 %v71_v18, %v70_v17  ;;  %v261_v27 = vld [vmem:[%s843_s3] sm:$0xff]  ;;  %vm554_vm3 = vmmov 0   ;;  %vm275_vm4 = vcmask 408576  }
  0x1a   :  { %371 = vmatprep.mubr.msk.f32.mxu1 %vm113_vm0, %v109_v13  ;;  %v72_v24 = vld [vmem:[%s841_s1 + $0x190] sm:$0xff]  ;;  %v73_v25 = vld [vmem:[%s841_s1 + $0x198] sm:$0xff]  ;;  %v465_v26 = vpack.c.bf16 %v37_v22, %v36_v21  ;;  %v262_v28 = vld [vmem:[%s843_s3 + $0x8] sm:$0xff]  ;;  %vm353_vm5 = vcmask 74752  }
  0x1b   :  { %458 = vmatpush3.bf16.msra.mxu0 %v457_v9  ;;  %v495_v29 = vpack.c.bf16 %v73_v25, %v72_v24  ;;  %v74_v30 = vld [vmem:[%s841_s1 + $0x1a0] sm:$0xff]  ;;  %v75_v31 = vld [vmem:[%s841_s1 + $0x1a8] sm:$0xff]  ;;  %v513_v32 = vpack.c.bf16 %v262_v28, %v261_v27  ;;  %v76_v34 = vld [vmem:[%s841_s1 + $0x1b0] sm:$0xff] }
  0x1c   :  { %487 = vmatpush1.bf16.msra.mxu1 %v486_v4  ;;  %460 = vmatprep.subr.bf16.mxu0 %v459_v10  ;;  %v498_v33 = vpack.c.bf16 %v75_v31, %v74_v30  ;;  %v77_v35 = vld [vmem:[%s841_s1 + $0x1b8] sm:$0xff]  ;;  %v78_v37 = vld [vmem:[%s841_s1 + $0x1c0] sm:$0xff]  ;;  %v79_v38 = vld [vmem:[%s841_s1 + $0x1c8] sm:$0xff] }
  0x1d   :  { %488 = vmatprep.subr.bf16.mxu1 %v551_v3  ;;  %v501_v36 = vpack.c.bf16 %v77_v35, %v76_v34  ;;  %v504_v39 = vpack.c.bf16 %v79_v38, %v78_v37  ;;  %v80_v40 = vld [vmem:[%s841_s1 + $0x1d0] sm:$0xff]  ;;  %v81_v41 = vld [vmem:[%s841_s1 + $0x1d8] sm:$0xff]  ;;  %v82_v43 = vld [vmem:[%s841_s1 + $0x1e0] sm:$0xff] }
  0x1e   :  { %v507_v42 = vpack.c.bf16 %v81_v41, %v80_v40  ;;  %v83_v44 = vld [vmem:[%s841_s1 + $0x1e8] sm:$0xff]  ;;  %v84_v47 = vld [vmem:[%s841_s1 + $0x1f0] sm:$0xf]  ;;  %v264_v49 = vld [vmem:[%s843_s3 + $0x18] sm:$0xff] }
  0x1f   :  { %462 = vmatpush3.bf16.msra.mxu0 %v461_v19  ;;  %v510_v45 = vpack.c.bf16 %v83_v44, %v82_v43  ;;  %v263_v48 = vld [vmem:[%s843_s3 + $0x10] sm:$0xff]  ;;  %v265_v51 = vld [vmem:[%s843_s3 + $0x20] sm:$0xff]  ;;  %v266_v52 = vld [vmem:[%s843_s3 + $0x28] sm:$0xff] }
  0x20   :  { %490 = vmatpush1.bf16.msra.mxu1 %v489_v16  ;;  %464 = vmatprep.subr.bf16.mxu0 %v463_v20  ;;  %v516_v50 = vpack.c.bf16 %v264_v49, %v263_v48  ;;  %v519_v53 = vpack.c.bf16 %v266_v52, %v265_v51  ;;  %v267_v54 = vld [vmem:[%s843_s3 + $0x30] sm:$0x3]  ;;  %v369_v57 = vld [vmem:[%s842_s2] ss:$0 sm:$0xff]  ;;  %s527_s2 = scalar_lea.vmem %s362_s10, 32 }
  0x21   :  { %491 = vmatprep.subr.bf16.mxu1 %v551_v3  ;;  %v372_v63 = vld [vmem:[%s844_s4] ss:$0 sm:$0xff]  ;;  %p528_p0 = scmp.ne.s32.totalorder %s362_s10, %s527_s2  ;;  %p533_p2 = scmp.lt.s32.totalorder %s527_s2, %s527_s2 }
  0x23   :  { %466 = vmatpush3.bf16.msra.mxu0 %v465_v26  ;;  %p534_p3 = por %p533_p2, %p532_p1 }
  0x24   :  { %493 = vmatpush1.bf16.msra.mxu1 %v492_v23  ;;  %512 = vmatprep.subr.bf16.mxu0 %v551_v3 }
  0x25   :  { %494 = vmatprep.subr.bf16.mxu1 %v551_v3  ;;  %p535_p4 = pnand %p534_p3, %p528_p0 }
  0x26   :  { %185 = vmatmul.mubr.f32.vlgmr.msra.gmra.mrb[0].mxu0 %v100_v0 }
  0x27   :  { %514 = vmatpush3.bf16.msra.mxu0 %v513_v32  ;;  %432 = vmatprep.mubr.msk.f32.mxu0 %vm554_vm3, %v553_v46 }
  0x28   :  { %496 = vmatpush1.bf16.msra.mxu1 %v495_v29  ;;  %515 = vmatprep.subr.bf16.mxu0 %v551_v3 }
  0x29   :  { %497 = vmatprep.subr.bf16.mxu1 %v551_v3 }
  0x2b   :  { %517 = vmatpush3.bf16.msra.mxu0 %v516_v50 }
  0x2c   :  { %499 = vmatpush1.bf16.msra.mxu1 %v498_v33  ;;  %518 = vmatprep.subr.bf16.mxu0 %v551_v3 }
  0x2d   :  { %500 = vmatprep.subr.bf16.mxu1 %v551_v3 }
  0x2f   :  { %520 = vmatpush3.bf16.msra.mxu0 %v519_v53 }
  0x30   :  { %502 = vmatpush1.bf16.msra.mxu1 %v501_v36  ;;  %430 = vmatprep.subr.mxu0 %v553_v46 }
  0x31   :  { %503 = vmatprep.subr.bf16.mxu1 %v551_v3 }
  0x33   :  { %431 = vmatpush3.msk.msra.mxu0 %vm279_vm2, %v267_v54 }
  0x34   :  { %505 = vmatpush1.bf16.msra.mxu1 %v504_v39 }
  0x35   :  { %506 = vmatprep.subr.bf16.mxu1 %v551_v3 }
  0x38   :  { %508 = vmatpush1.bf16.msra.mxu1 %v507_v42 }
  0x39   :  { %509 = vmatprep.subr.bf16.mxu1 %v551_v3 }
  0x3c   :  { %511 = vmatpush1.bf16.msra.mxu1 %v510_v45 }
  0x3d   :  { %250 = vmatprep.subr.mxu1 %v553_v46 }
  0x40   :  { %370 = vmatpush1.msk.msra.mxu1 %vm116_vm1, %v84_v47 }
  0x41   :  { %255 = vmatmul.mubr.f32.vlgmr.msra.gmra.mrb[0].mxu1 %v715_v6 }
  0xf9   :  { %v407_v3 = vpop.f32.mrb[0].mxu0 }
  0xfa   :  { %v408_v55 = vpop.f32.mrb[1].mxu0 }
  0xfb   :  { %v409_v56 = vadd.f32 %v408_v55, %v407_v3 }
  0xfd   :  { %v187_v58 = vadd.f32 %v409_v56, %v369_v57 }
 0x114   :  { %v256_v59 = vpop.f32.mrb[0].mxu1 }
 0x115   :  { %v257_v60 = vadd.f32 %v256_v59, %v187_v58  ;;  %v258_v61 = vpop.f32.mrb[1].mxu1 }
 0x117   :  { %v260_v62 = vmax.f32 %v257_v60, 0.0 }
 0x119   :  { %433 = vmatmul.mubr.msk.f32.vlgmr.msra.gmra.mrb[2].mxu0 %vm275_vm4, %v260_v62 }
 0x1ec   :  { %v349_v0 = vpop.f32.mrb[2].mxu0 }
 0x1ed   :  { %v350_v1 = vadd.f32 %v372_v63, %v349_v0  ;;  %v434_v2 = vpop.f32.mrb[3].mxu0 }
 0x1ef   :  { %354 = vst.msk [vmem:[#allocation2] sm:$0x3] %vm353_vm5, %v350_v1 }
 0x1f0   :  { %538 = shalt.err (!%p535_p4)
}
 0x1f1   :  { %s539_s13 = scalar_lea.hbm %s845_s5, 32 }
 0x1f2   :  { %p540_p5 = scmp.ne.s32.totalorder %s845_s5, %s539_s13  ;;  %p543_p6 = scmp.lt.u32.totalorder %s539_s13, %s845_s5 }
 0x1f4   :  { %p545_p7 = pnand %p543_p6, %p540_p5 }
 0x1f6   :  { %548 = shalt.err (!%p545_p7)
}
 0x1f7   :  { %364 = dma.vmem_to_hbm [thread:$0]  %s362_s10, 32, %s845_s5, [#allocation3]  }
 0x1f8   :  { %549 = dma.done.wait [#allocation3], 32  }
 0x1f9   :  { %550 = vsyncadd [#allocation3], 4294967264 }
 0x1fa   :  { %368 = vsyncpa [#allocation3], 1 }

</bundles_post_ra>
